<compile_context>
chip_gen: v6e
topology: v6e:2x2x1
jax: 0.10.0
libtpu: 0.0.40
codegen_flags: <defaults>
</compile_context>

<pallas_src>
import functools

import jax
import jax.numpy as jnp
from jax.experimental import pallas as pl
from jax.experimental.pallas import tpu as pltpu


def _wmsa_kernel(x_ref, wqkv_ref, bqkv_ref, bm_ref, wproj_ref, bproj_ref, o_ref, ctx_ref,
                 *, num_heads, scale):
    """G windows per grid step.

    x_ref:     (G, Np, C)         caller dtype (cast to compute dtype in-kernel)
    wqkv_ref:  (C, 3C)            compute dtype
    bqkv_ref:  (1, 3C)            f32
    bm_ref:    (H, nwm, Np, Np)   bf16/f32   relative-position bias (+ shifted-window mask)
    wproj_ref: (C, C)             compute dtype
    bproj_ref: (1, C)             f32
    o_ref:     (G, Np, C)         output dtype
    ctx_ref:   (G*Np, C)          compute dtype VMEM scratch (lane-concat of head contexts)
    """
    G, Np, C = x_ref.shape
    H = num_heads
    dh = C // H
    nwm = bm_ref.shape[1]
    assert G % nwm == 0, "group size must be a multiple of the mask window count"
    cdt = wqkv_ref.dtype
    GN = G * Np

    # Fused QKV projection for all G windows at once: (G*Np, C) @ (C, 3C), f32 accumulate.
    x2 = x_ref[...].reshape(GN, C).astype(cdt)          # in-kernel cast (x arrives un-cast)
    qkv = jnp.dot(x2, wqkv_ref[...], preferred_element_type=jnp.float32) + bqkv_ref[0]

    # qkv last-dim layout is (k, h, c) per 'b n (k h c) -> k b h n c'.
    # Fold the qk-scale into q while still in f32, then cast MXU operands once.
    q_all = (qkv[:, 0 * C:1 * C] * scale).astype(cdt)   # (GN, C)
    k_all = qkv[:, 1 * C:2 * C].astype(cdt)
    v_all = qkv[:, 2 * C:3 * C].astype(cdt)

    def split_heads(a):
        # (GN, C) -> (H*G, Np, dh); batch index b = h*G + g.
        # NOTE: trace-time unroll over heads is only cheap lane slices + a leading-dim
        # stack; the matmuls below are batched over all H*G pairs in one dot_general.
        parts = [a[:, h * dh:(h + 1) * dh].reshape(G, Np, dh) for h in range(H)]
        return jnp.stack(parts, axis=0).reshape(H * G, Np, dh)

    q = split_heads(q_all)
    k = split_heads(k_all)
    v = split_heads(v_all)

    # Attention scores, batched over every (head, window) pair: (H*G, Np, Np).
    s = jnp.einsum('bnd,bmd->bnm', q, k, preferred_element_type=jnp.float32)

    # Single fused add of (relative-position bias [+ shifted-window mask]).
    # Window g of this block has in-image window index g % nwm because the block start
    # (block * G) is a multiple of nwm (G % nwm == 0, B_ % G == 0) — keep that invariant.
    bm = bm_ref[...].astype(jnp.float32)                 # (H, nwm, Np, Np)
    s = s.reshape(H, G // nwm, nwm, Np, Np) + bm[:, None]
    s = s.reshape(H * G, Np, Np)

    # Numerically-stable softmax along keys (f32 on VPU; reciprocal on the EUP slot).
    # NOTE: approx reciprocal -> ~1e-3 relative normalization error; set approx=False
    # if strict parity with the PyTorch reference is required.
    m = jnp.max(s, axis=-1, keepdims=True)
    p = jnp.exp(s - m)
    denom = jnp.sum(p, axis=-1, keepdims=True)
    probs = (p * pl.reciprocal(denom, approx=True)).astype(cdt)

    # Per-head context, batched: (H*G, Np, dh) with f32 accumulation.
    ctx = jnp.einsum('bnm,bmd->bnd', probs, v, preferred_element_type=jnp.float32)
    ctx = ctx.astype(cdt).reshape(H, GN, dh)

    # Lane-concat heads through VMEM scratch, then ONE full-K output projection
    # (K = C fills the MXU depth instead of H matmuls with K = dh).
    for h in range(H):
        ctx_ref[:, h * dh:(h + 1) * dh] = ctx[h]
    out = jnp.dot(ctx_ref[...], wproj_ref[...], preferred_element_type=jnp.float32) + bproj_ref[0]
    o_ref[...] = out.reshape(G, Np, C).astype(o_ref.dtype)


def _choose_group_size(B_, Np, C, num_heads, nwm, x_bytes, out_bytes, cdt_bytes,
                       block_budget, target_rows=1024):
    """Largest divisor G of B_ (multiple of nwm) whose per-block VMEM estimate fits the
    budget, targeting ~<=1024 MXU rows and keeping num_blocks >= 2 when possible."""
    cands = [g for g in range(nwm, B_ + 1, nwm) if B_ % g == 0]

    def est(g):
        rows = g * Np
        blocks = 2 * rows * C * (x_bytes + out_bytes)                 # double-buffered x / out
        scratch = rows * C * cdt_bytes                                # ctx lane-concat scratch
        work = rows * 3 * C * 4 + 2 * num_heads * g * Np * Np * 4     # qkv + scores/probs (f32)
        return blocks + scratch + work

    ok = [g for g in cands if est(g) <= block_budget] or [min(cands)]
    pref = [g for g in ok if B_ // g >= 2] or ok       # >=2 grid steps: v7x dual-TC + pipelining
    fit = [g for g in pref if g * Np <= target_rows]
    return max(fit) if fit else min(pref)


def window_msa_pallas(x, params, window_size, num_heads, mask=None, qk_scale=None,
                      compute_dtype=jnp.bfloat16, out_dtype=None):
    """Pallas implementation of WindowMultiHeadSelfAttention.forward.

    x:    (B_, N, C) with N == window_size[0] * window_size[1]
    mask: (num_windows, N, N) or None
    out_dtype defaults to x.dtype; pass jnp.bfloat16 to halve output HBM writeback
    (bf16 MXU operands already limit accuracy to ~1e-2 regardless of output dtype).
    """
    B_, N, C = x.shape
    Wh, Ww = window_size
    assert N == Wh * Ww
    assert C % num_heads == 0
    dh = C // num_heads
    scale = dh ** (-0.5) if qk_scale is None else qk_scale
    out_dtype = x.dtype if out_dtype is None else out_dtype

    wqkv, bqkv, wproj, bproj, rel_table, rel_index = params

    nw = None if mask is None else int(mask.shape[0])
    if nw is not None:
        assert B_ % nw == 0, "B_ must be a multiple of num_windows"

    # --- pad N up to the f32 sublane tile (8) so (G,Np,C)<->(G*Np,C) reshapes are layout
    #     preserving (real Swin windows, e.g. 7x7 -> N=49, need this). Padded keys are
    #     masked out through the bias operand; padded query rows are sliced off below.
    Np = ((N + 7) // 8) * 8
    pad = Np - N

    # --- glue: gather relative-position bias table -> (H, N, N), fold mask, pad, cast ---
    bias = rel_table[rel_index.reshape(-1)].reshape(N, N, num_heads)
    bias = jnp.transpose(bias, (2, 0, 1)).astype(jnp.float32)            # (H, N, N)
    if mask is None:
        bm = bias[:, None]                                               # (H, 1, N, N)
    else:
        bm = bias[:, None] + mask.astype(jnp.float32)[None]              # (H, nw, N, N)
    nwm = bm.shape[1]
    if pad:
        bm = jnp.pad(bm, ((0, 0), (0, 0), (0, pad), (0, pad)))
        key_is_pad = jnp.arange(Np) >= N
        bm = jnp.where(key_is_pad[None, None, None, :], -1e9, bm)        # kill padded keys
    bm_dtype = jnp.float32 if jnp.dtype(compute_dtype) == jnp.dtype(jnp.float32) else jnp.bfloat16
    bm = bm.astype(bm_dtype)                                             # halve biggest invariant operand

    # x stays in the caller dtype (cast happens in-kernel on the VPU); only pad if needed.
    x_in = jnp.pad(x, ((0, 0), (0, pad), (0, 0))) if pad else x

    # Weights cast once in the wrapper (fetched once per call); 1-D biases stay f32.
    wqkv_lp = wqkv.astype(compute_dtype)
    wproj_lp = wproj.astype(compute_dtype)
    bqkv2 = jnp.reshape(bqkv, (1, 3 * C)).astype(jnp.float32)
    bproj2 = jnp.reshape(bproj, (1, C)).astype(jnp.float32)

    # --- explicit VMEM budget (v7x: 64 MiB physical; v5e/v6e: 128 MiB) ---
    try:
        vmem_cap = pltpu.get_tpu_info().vmem_capacity_bytes
    except Exception:
        vmem_cap = 64 * 1024 * 1024
    vmem_limit = min(int(vmem_cap * 0.75), 112 * 1024 * 1024)

    cbytes = jnp.dtype(compute_dtype).itemsize
    obytes = jnp.dtype(out_dtype).itemsize
    xbytes = jnp.dtype(x.dtype).itemsize
    const_bytes = ((3 * C * C + C * C) * cbytes + 4 * C * 4
                   + num_heads * nwm * Np * Np * jnp.dtype(bm_dtype).itemsize)
    block_budget = max(vmem_limit - 2 * const_bytes - (4 << 20), 1 << 20)

    G = _choose_group_size(B_, Np, C, num_heads, nwm, xbytes, obytes, cbytes, block_budget)
    num_blocks = B_ // G

    kernel = functools.partial(_wmsa_kernel, num_heads=num_heads, scale=scale)

    def run(single_buffer_invariants):
        def const_spec(shape):
            nd = len(shape)
            imap = lambda *_: (0,) * nd
            if single_buffer_invariants:
                # Grid-invariant operands: fetched once, no need for double buffering.
                return pl.BlockSpec(shape, imap, pipeline_mode=pl.Buffered(1))
            return pl.BlockSpec(shape, imap)

        grid_spec = pltpu.PrefetchScalarGridSpec(
            num_scalar_prefetch=0,
            grid=(num_blocks,),
            in_specs=[
                pl.BlockSpec((G, Np, C), lambda b: (b, 0, 0)),            # x (G windows)
                const_spec((C, 3 * C)),                                   # W_qkv
                const_spec((1, 3 * C)),                                   # b_qkv
                const_spec((num_heads, nwm, Np, Np)),                     # bias (+ mask)
                const_spec((C, C)),                                       # W_proj
                const_spec((1, C)),                                       # b_proj
            ],
            out_specs=pl.BlockSpec((G, Np, C), lambda b: (b, 0, 0)),
            scratch_shapes=[pltpu.VMEM((G * Np, C), compute_dtype)],      # head lane-concat
        )
        return pl.pallas_call(
            kernel,
            out_shape=jax.ShapeDtypeStruct((B_, Np, C), out_dtype),
            grid_spec=grid_spec,
            compiler_params=pltpu.CompilerParams(
                dimension_semantics=("parallel",),
                vmem_limit_bytes=int(vmem_limit)),
        )(x_in, wqkv_lp, bqkv2, bm, wproj_lp, bproj2)

    try:
        out = run(True)
    except Exception:
        # TODO(synk): pipeline_mode=pl.Buffered(1) not supported on this jax version;
        # fall back to default (double-buffered) specs for the grid-invariant operands.
        out = run(False)

    return out[:, :N, :] if pad else out


# ----------------------------------------------------------------------------
# Parameter construction (deterministic) and pure-JAX reference for validation.
# ----------------------------------------------------------------------------
def make_params(key, dim, window_size, num_heads):
    Wh, Ww = window_size
    k1, k2, k3, k4 = jax.random.split(key, 4)
    wqkv = jax.random.normal(k1, (dim, 3 * dim), jnp.float32) * 0.05
    bqkv = jax.random.normal(k2, (3 * dim,), jnp.float32) * 0.01
    wproj = jax.random.normal(k3, (dim, dim), jnp.float32) * 0.05
    bproj = jnp.zeros((dim,), jnp.float32)
    rel_table = jax.random.normal(k4, ((2 * Wh - 1) * (2 * Ww - 1), num_heads),
                                  jnp.float32) * 0.02

    # relative_position_index (identical construction to the PyTorch buffer)
    coords_h = jnp.arange(Wh)
    coords_w = jnp.arange(Ww)
    coords = jnp.stack(jnp.meshgrid(coords_h, coords_w, indexing="ij"))   # (2, Wh, Ww)
    coords_flat = coords.reshape(2, -1)                                   # (2, N)
    rel = coords_flat[:, :, None] - coords_flat[:, None, :]               # (2, N, N)
    rel = jnp.transpose(rel, (1, 2, 0))                                   # (N, N, 2)
    rel = rel.at[:, :, 0].add(Wh - 1)
    rel = rel.at[:, :, 1].add(Ww - 1)
    rel = rel.at[:, :, 0].multiply(2 * Ww - 1)
    rel_index = rel.sum(-1).astype(jnp.int32)                             # (N, N)
    return (wqkv, bqkv, wproj, bproj, rel_table, rel_index)


def window_msa_reference(x, params, window_size, num_heads, mask=None, qk_scale=None):
    B_, N, C = x.shape
    dh = C // num_heads
    scale = dh ** (-0.5) if qk_scale is None else qk_scale
    wqkv, bqkv, wproj, bproj, rel_table, rel_index = params

    qkv = x @ wqkv + bqkv                                   # (B_, N, 3C)
    qkv = qkv.reshape(B_, N, 3, num_heads, dh)              # (k h c) split
    qkv = jnp.transpose(qkv, (2, 0, 3, 1, 4))               # (3, B_, H, N, dh)
    q, k, v = qkv[0], qkv[1], qkv[2]

    attn = jnp.einsum("bhid,bhjd->bhij", q, k) * scale
    bias = rel_table[rel_index.reshape(-1)].reshape(N, N, num_heads)
    bias = jnp.transpose(bias, (2, 0, 1))
    attn = attn + bias[None]
    if mask is not None:
        nw = mask.shape[0]
        attn = attn.reshape(B_ // nw, nw, num_heads, N, N)
        attn = attn + mask[None, :, None]
        attn = attn.reshape(B_, num_heads, N, N)
    attn = jax.nn.softmax(attn, axis=-1)
    ctx = jnp.einsum("bhij,bhjd->bhid", attn, v)
    ctx = jnp.transpose(ctx, (0, 2, 1, 3)).reshape(B_, N, C)
    return ctx @ wproj + bproj


if __name__ == "__main__":
    # small, module-consistent shapes: dim=32, heads=4, window 4x4 (N=16),
    # batch=2 images * 4 windows each -> B_=8
    dim = 32
    num_heads = 4
    window_size = (4, 4)
    N = window_size[0] * window_size[1]
    batch = 2
    num_windows = 4
    B_ = batch * num_windows

    key = jax.random.PRNGKey(0)
    kx, km, kp = jax.random.split(key, 3)
    x = jax.random.normal(kx, (B_, N, dim), jnp.float32)

    # shifted-window style 0/-100 mask (like Swin)
    mask_bits = jax.random.bernoulli(km, 0.2, (num_windows, N, N))
    mask = jnp.where(mask_bits, -100.0, 0.0).astype(jnp.float32)

    params = make_params(kp, dim, window_size, num_heads)

    # masked path, bf16 MXU operands (default) vs f32 reference
    out = jax.block_until_ready(
        window_msa_pallas(x, params, window_size, num_heads, mask=mask))
    ref = window_msa_reference(x, params, window_size, num_heads, mask=mask)
    assert out.shape == (B_, N, dim)
    assert jnp.allclose(out, ref, atol=2e-2, rtol=2e-2), \
        float(jnp.max(jnp.abs(out - ref)))

    # mask=None path
    out_nm = jax.block_until_ready(
        window_msa_pallas(x, params, window_size, num_heads))
    ref_nm = window_msa_reference(x, params, window_size, num_heads)
    assert jnp.allclose(out_nm, ref_nm, atol=2e-2, rtol=2e-2), \
        float(jnp.max(jnp.abs(out_nm - ref_nm)))

    # f32 MXU operands: tighter structural check of the same kernel
    out_f32 = jax.block_until_ready(
        window_msa_pallas(x, params, window_size, num_heads, mask=mask,
                          compute_dtype=jnp.float32))
    assert jnp.allclose(out_f32, ref, atol=2e-3, rtol=2e-3), \
        float(jnp.max(jnp.abs(out_f32 - ref)))

    # non-sublane-aligned window (3x3 -> N=9, padded to 16 in the wrapper), masked
    ws2 = (3, 3)
    N2 = ws2[0] * ws2[1]
    params2 = make_params(kp, dim, ws2, num_heads)
    x2 = jax.random.normal(kx, (B_, N2, dim), jnp.float32)
    mask2 = jnp.where(jax.random.bernoulli(km, 0.2, (num_windows, N2, N2)),
                      -100.0, 0.0).astype(jnp.float32)
    out2 = jax.block_until_ready(
        window_msa_pallas(x2, params2, ws2, num_heads, mask=mask2))
    ref2 = window_msa_reference(x2, params2, ws2, num_heads, mask=mask2)
    assert out2.shape == (B_, N2, dim)
    assert jnp.allclose(out2, ref2, atol=2e-2, rtol=2e-2), \
        float(jnp.max(jnp.abs(out2 - ref2)))

    print("KERNEL_OK")
</pallas_src>

<mosaic_0001>
module attributes {stable_mosaic.version = 11 : i64} {
  func.func @_wmsa_kernel(%arg0: i32, %arg1: memref<4x16x32xf32, #tpu.memory_space<vmem>>, %arg2: memref<32x96xbf16, #tpu.memory_space<vmem>>, %arg3: memref<1x96xf32, #tpu.memory_space<vmem>>, %arg4: memref<4x4x16x16xbf16, #tpu.memory_space<vmem>>, %arg5: memref<32x32xbf16, #tpu.memory_space<vmem>>, %arg6: memref<1x32xf32, #tpu.memory_space<vmem>>, %arg7: memref<4x16x32xf32, #tpu.memory_space<vmem>>, %arg8: memref<64x32xbf16, #tpu.memory_space<vmem>>) attributes {dimension_semantics = [#tpu.dimension_semantics<parallel>], iteration_bounds = array<i64: 2>, scalar_prefetch = 0 : i64, scratch_operands = 1 : i64, tpu.core_type = #tpu.core_type<tc>, window_params = [{transform_indices = @transform_0, window_bounds = array<i64: 4, 16, 32>}, {pipeline_mode = #tpu.pipeline_mode<synchronous>, transform_indices = @transform_1, window_bounds = array<i64: 32, 96>}, {pipeline_mode = #tpu.pipeline_mode<synchronous>, transform_indices = @transform_2, window_bounds = array<i64: 1, 96>}, {pipeline_mode = #tpu.pipeline_mode<synchronous>, transform_indices = @transform_3, window_bounds = array<i64: 4, 4, 16, 16>}, {pipeline_mode = #tpu.pipeline_mode<synchronous>, transform_indices = @transform_4, window_bounds = array<i64: 32, 32>}, {pipeline_mode = #tpu.pipeline_mode<synchronous>, transform_indices = @transform_5, window_bounds = array<i64: 1, 32>}, {transform_indices = @transform_6, window_bounds = array<i64: 4, 16, 32>}]} {
    %c0 = arith.constant 0 : index
    %c0_0 = arith.constant 0 : index
    %c0_1 = arith.constant 0 : index
    %0 = vector.load %arg1[%c0, %c0_0, %c0_1] : memref<4x16x32xf32, #tpu.memory_space<vmem>>, vector<4x16x32xf32>
    %1 = vector.shape_cast %0 : vector<4x16x32xf32> to vector<64x32xf32>
    %2 = arith.truncf %1 : vector<64x32xf32> to vector<64x32xbf16>
    %c0_2 = arith.constant 0 : index
    %c0_3 = arith.constant 0 : index
    %3 = vector.load %arg2[%c0_2, %c0_3] : memref<32x96xbf16, #tpu.memory_space<vmem>>, vector<32x96xbf16>
    %cst = arith.constant dense<0.000000e+00> : vector<64x96xf32>
    %4 = tpu.matmul %2, %3, %cst {dimension_numbers = #tpu.dot_dimension_numbers<[1], [0], [0], [1], [0, 0, 1, 1], [], []>} : vector<64x32xbf16>, vector<32x96xbf16>, vector<64x96xf32> -> vector<64x96xf32>
    %c0_4 = arith.constant 0 : index
    %c0_5 = arith.constant 0 : index
    %5 = vector.load %arg3[%c0_4, %c0_5] : memref<1x96xf32, #tpu.memory_space<vmem>>, vector<1x96xf32>
    %6 = vector.shape_cast %5 : vector<1x96xf32> to vector<96xf32>
    %7 = vector.shape_cast %6 : vector<96xf32> to vector<1x96xf32>
    %8 = vector.broadcast %7 : vector<1x96xf32> to vector<64x96xf32>
    %9 = arith.addf %4, %8 : vector<64x96xf32>
    %10 = vector.extract_strided_slice %9 {offsets = [0, 0], sizes = [64, 32], strides = [1, 1]} : vector<64x96xf32> to vector<64x32xf32>
    %cst_6 = arith.constant 0.353553385 : f32
    %11 = vector.broadcast %cst_6 : f32 to vector<64x32xf32>
    %12 = arith.mulf %10, %11 : vector<64x32xf32>
    %13 = arith.truncf %12 : vector<64x32xf32> to vector<64x32xbf16>
    %14 = vector.extract_strided_slice %9 {offsets = [0, 32], sizes = [64, 32], strides = [1, 1]} : vector<64x96xf32> to vector<64x32xf32>
    %15 = arith.truncf %14 : vector<64x32xf32> to vector<64x32xbf16>
    %16 = vector.extract_strided_slice %9 {offsets = [0, 64], sizes = [64, 32], strides = [1, 1]} : vector<64x96xf32> to vector<64x32xf32>
    %17 = arith.truncf %16 : vector<64x32xf32> to vector<64x32xbf16>
    %18 = vector.extract_strided_slice %13 {offsets = [0, 0], sizes = [64, 8], strides = [1, 1]} : vector<64x32xbf16> to vector<64x8xbf16>
    %19 = vector.shape_cast %18 : vector<64x8xbf16> to vector<4x16x8xbf16>
    %20 = vector.extract_strided_slice %13 {offsets = [0, 8], sizes = [64, 8], strides = [1, 1]} : vector<64x32xbf16> to vector<64x8xbf16>
    %21 = vector.shape_cast %20 : vector<64x8xbf16> to vector<4x16x8xbf16>
    %22 = vector.extract_strided_slice %13 {offsets = [0, 16], sizes = [64, 8], strides = [1, 1]} : vector<64x32xbf16> to vector<64x8xbf16>
    %23 = vector.shape_cast %22 : vector<64x8xbf16> to vector<4x16x8xbf16>
    %24 = vector.extract_strided_slice %13 {offsets = [0, 24], sizes = [64, 8], strides = [1, 1]} : vector<64x32xbf16> to vector<64x8xbf16>
    %25 = vector.shape_cast %24 : vector<64x8xbf16> to vector<4x16x8xbf16>
    %26 = vector.shape_cast %19 : vector<4x16x8xbf16> to vector<1x4x16x8xbf16>
    %27 = vector.shape_cast %21 : vector<4x16x8xbf16> to vector<1x4x16x8xbf16>
    %28 = vector.shape_cast %23 : vector<4x16x8xbf16> to vector<1x4x16x8xbf16>
    %29 = vector.shape_cast %25 : vector<4x16x8xbf16> to vector<1x4x16x8xbf16>
    %30 = tpu.concatenate %26, %27, %28, %29 in 0 : vector<1x4x16x8xbf16>, vector<1x4x16x8xbf16>, vector<1x4x16x8xbf16>, vector<1x4x16x8xbf16> -> vector<4x4x16x8xbf16>
    %31 = vector.shape_cast %30 : vector<4x4x16x8xbf16> to vector<16x16x8xbf16>
    %32 = vector.extract_strided_slice %15 {offsets = [0, 0], sizes = [64, 8], strides = [1, 1]} : vector<64x32xbf16> to vector<64x8xbf16>
    %33 = vector.shape_cast %32 : vector<64x8xbf16> to vector<4x16x8xbf16>
    %34 = vector.extract_strided_slice %15 {offsets = [0, 8], sizes = [64, 8], strides = [1, 1]} : vector<64x32xbf16> to vector<64x8xbf16>
    %35 = vector.shape_cast %34 : vector<64x8xbf16> to vector<4x16x8xbf16>
    %36 = vector.extract_strided_slice %15 {offsets = [0, 16], sizes = [64, 8], strides = [1, 1]} : vector<64x32xbf16> to vector<64x8xbf16>
    %37 = vector.shape_cast %36 : vector<64x8xbf16> to vector<4x16x8xbf16>
    %38 = vector.extract_strided_slice %15 {offsets = [0, 24], sizes = [64, 8], strides = [1, 1]} : vector<64x32xbf16> to vector<64x8xbf16>
    %39 = vector.shape_cast %38 : vector<64x8xbf16> to vector<4x16x8xbf16>
    %40 = vector.shape_cast %33 : vector<4x16x8xbf16> to vector<1x4x16x8xbf16>
    %41 = vector.shape_cast %35 : vector<4x16x8xbf16> to vector<1x4x16x8xbf16>
    %42 = vector.shape_cast %37 : vector<4x16x8xbf16> to vector<1x4x16x8xbf16>
    %43 = vector.shape_cast %39 : vector<4x16x8xbf16> to vector<1x4x16x8xbf16>
    %44 = tpu.concatenate %40, %41, %42, %43 in 0 : vector<1x4x16x8xbf16>, vector<1x4x16x8xbf16>, vector<1x4x16x8xbf16>, vector<1x4x16x8xbf16> -> vector<4x4x16x8xbf16>
    %45 = vector.shape_cast %44 : vector<4x4x16x8xbf16> to vector<16x16x8xbf16>
    %46 = vector.extract_strided_slice %17 {offsets = [0, 0], sizes = [64, 8], strides = [1, 1]} : vector<64x32xbf16> to vector<64x8xbf16>
    %47 = vector.shape_cast %46 : vector<64x8xbf16> to vector<4x16x8xbf16>
    %48 = vector.extract_strided_slice %17 {offsets = [0, 8], sizes = [64, 8], strides = [1, 1]} : vector<64x32xbf16> to vector<64x8xbf16>
    %49 = vector.shape_cast %48 : vector<64x8xbf16> to vector<4x16x8xbf16>
    %50 = vector.extract_strided_slice %17 {offsets = [0, 16], sizes = [64, 8], strides = [1, 1]} : vector<64x32xbf16> to vector<64x8xbf16>
    %51 = vector.shape_cast %50 : vector<64x8xbf16> to vector<4x16x8xbf16>
    %52 = vector.extract_strided_slice %17 {offsets = [0, 24], sizes = [64, 8], strides = [1, 1]} : vector<64x32xbf16> to vector<64x8xbf16>
    %53 = vector.shape_cast %52 : vector<64x8xbf16> to vector<4x16x8xbf16>
    %54 = vector.shape_cast %47 : vector<4x16x8xbf16> to vector<1x4x16x8xbf16>
    %55 = vector.shape_cast %49 : vector<4x16x8xbf16> to vector<1x4x16x8xbf16>
    %56 = vector.shape_cast %51 : vector<4x16x8xbf16> to vector<1x4x16x8xbf16>
    %57 = vector.shape_cast %53 : vector<4x16x8xbf16> to vector<1x4x16x8xbf16>
    %58 = tpu.concatenate %54, %55, %56, %57 in 0 : vector<1x4x16x8xbf16>, vector<1x4x16x8xbf16>, vector<1x4x16x8xbf16>, vector<1x4x16x8xbf16> -> vector<4x4x16x8xbf16>
    %59 = vector.shape_cast %58 : vector<4x4x16x8xbf16> to vector<16x16x8xbf16>
    "tpu.trace_start"() <{level = 10 : i32, message = "bnd,bmd->bnm"}> : () -> ()
    %cst_7 = arith.constant dense<0.000000e+00> : vector<16x16x16xf32>
    %60 = tpu.matmul %31, %45, %cst_7 {dimension_numbers = #tpu.dot_dimension_numbers<[2], [2], [1], [1], [0, 0, 0, 1, 1, 1], [0], [0]>} : vector<16x16x8xbf16>, vector<16x16x8xbf16>, vector<16x16x16xf32> -> vector<16x16x16xf32>
    "tpu.trace_stop"() : () -> ()
    %c0_8 = arith.constant 0 : index
    %c0_9 = arith.constant 0 : index
    %c0_10 = arith.constant 0 : index
    %c0_11 = arith.constant 0 : index
    %61 = vector.load %arg4[%c0_8, %c0_9, %c0_10, %c0_11] : memref<4x4x16x16xbf16, #tpu.memory_space<vmem>>, vector<4x4x16x16xbf16>
    %62 = arith.extf %61 : vector<4x4x16x16xbf16> to vector<4x4x16x16xf32>
    %63 = vector.shape_cast %60 : vector<16x16x16xf32> to vector<4x1x4x16x16xf32>
    %64 = vector.shape_cast %62 : vector<4x4x16x16xf32> to vector<4x1x4x16x16xf32>
    %65 = arith.addf %63, %64 : vector<4x1x4x16x16xf32>
    %66 = vector.shape_cast %65 : vector<4x1x4x16x16xf32> to vector<16x16x16xf32>
    %cst_12 = arith.constant dense<0xFF800000> : vector<16x16xf32>
    %67 = vector.multi_reduction <maximumf>, %66, %cst_12 [2] : vector<16x16x16xf32> to vector<16x16xf32>
    %68 = vector.shape_cast %67 : vector<16x16xf32> to vector<16x16x1xf32>
    %69 = vector.broadcast %68 : vector<16x16x1xf32> to vector<16x16x16xf32>
    %70 = arith.subf %66, %69 : vector<16x16x16xf32>
    %71 = math.exp %70 : vector<16x16x16xf32>
    %cst_13 = arith.constant dense<0.000000e+00> : vector<16x16xf32>
    %72 = vector.multi_reduction <add>, %71, %cst_13 [2] : vector<16x16x16xf32> to vector<16x16xf32>
    %73 = vector.shape_cast %72 : vector<16x16xf32> to vector<16x16x1xf32>
    %74 = tpu.reciprocal %73 {approx = true} : vector<16x16x1xf32> -> vector<16x16x1xf32>
    %75 = vector.broadcast %74 : vector<16x16x1xf32> to vector<16x16x16xf32>
    %76 = arith.mulf %71, %75 : vector<16x16x16xf32>
    %77 = arith.truncf %76 : vector<16x16x16xf32> to vector<16x16x16xbf16>
    "tpu.trace_start"() <{level = 10 : i32, message = "bnm,bmd->bnd"}> : () -> ()
    %cst_14 = arith.constant dense<0.000000e+00> : vector<16x16x8xf32>
    %78 = tpu.matmul %77, %59, %cst_14 {dimension_numbers = #tpu.dot_dimension_numbers<[2], [1], [1], [2], [0, 0, 0, 1, 1, 2], [0], [0]>} : vector<16x16x16xbf16>, vector<16x16x8xbf16>, vector<16x16x8xf32> -> vector<16x16x8xf32>
    "tpu.trace_stop"() : () -> ()
    %79 = arith.truncf %78 : vector<16x16x8xf32> to vector<16x16x8xbf16>
    %80 = vector.shape_cast %79 : vector<16x16x8xbf16> to vector<4x64x8xbf16>
    %81 = vector.extract_strided_slice %80 {offsets = [0, 0, 0], sizes = [1, 64, 8], strides = [1, 1, 1]} : vector<4x64x8xbf16> to vector<1x64x8xbf16>
    %82 = vector.shape_cast %81 : vector<1x64x8xbf16> to vector<64x8xbf16>
    %c0_15 = arith.constant 0 : index
    %c0_16 = arith.constant 0 : index
    %83 = vector.load %arg8[%c0_15, %c0_16] : memref<64x32xbf16, #tpu.memory_space<vmem>>, vector<64x8xbf16>
    tpu.vector_store %arg8[%c0_15, %c0_16], %82 {strides = array<i32>} : memref<64x32xbf16, #tpu.memory_space<vmem>>, vector<64x8xbf16>,
    %84 = vector.extract_strided_slice %80 {offsets = [1, 0, 0], sizes = [1, 64, 8], strides = [1, 1, 1]} : vector<4x64x8xbf16> to vector<1x64x8xbf16>
    %85 = vector.shape_cast %84 : vector<1x64x8xbf16> to vector<64x8xbf16>
    %c0_17 = arith.constant 0 : index
    %c8 = arith.constant 8 : index
    %86 = vector.load %arg8[%c0_17, %c8] : memref<64x32xbf16, #tpu.memory_space<vmem>>, vector<64x8xbf16>
    tpu.vector_store %arg8[%c0_17, %c8], %85 {strides = array<i32>} : memref<64x32xbf16, #tpu.memory_space<vmem>>, vector<64x8xbf16>,
    %87 = vector.extract_strided_slice %80 {offsets = [2, 0, 0], sizes = [1, 64, 8], strides = [1, 1, 1]} : vector<4x64x8xbf16> to vector<1x64x8xbf16>
    %88 = vector.shape_cast %87 : vector<1x64x8xbf16> to vector<64x8xbf16>
    %c0_18 = arith.constant 0 : index
    %c16 = arith.constant 16 : index
    %89 = vector.load %arg8[%c0_18, %c16] : memref<64x32xbf16, #tpu.memory_space<vmem>>, vector<64x8xbf16>
    tpu.vector_store %arg8[%c0_18, %c16], %88 {strides = array<i32>} : memref<64x32xbf16, #tpu.memory_space<vmem>>, vector<64x8xbf16>,
    %90 = vector.extract_strided_slice %80 {offsets = [3, 0, 0], sizes = [1, 64, 8], strides = [1, 1, 1]} : vector<4x64x8xbf16> to vector<1x64x8xbf16>
    %91 = vector.shape_cast %90 : vector<1x64x8xbf16> to vector<64x8xbf16>
    %c0_19 = arith.constant 0 : index
    %c24 = arith.constant 24 : index
    %92 = vector.load %arg8[%c0_19, %c24] : memref<64x32xbf16, #tpu.memory_space<vmem>>, vector<64x8xbf16>
    tpu.vector_store %arg8[%c0_19, %c24], %91 {strides = array<i32>} : memref<64x32xbf16, #tpu.memory_space<vmem>>, vector<64x8xbf16>,
    %c0_20 = arith.constant 0 : index
    %c0_21 = arith.constant 0 : index
    %93 = vector.load %arg8[%c0_20, %c0_21] : memref<64x32xbf16, #tpu.memory_space<vmem>>, vector<64x32xbf16>
    %c0_22 = arith.constant 0 : index
    %c0_23 = arith.constant 0 : index
    %94 = vector.load %arg5[%c0_22, %c0_23] : memref<32x32xbf16, #tpu.memory_space<vmem>>, vector<32x32xbf16>
    %cst_24 = arith.constant dense<0.000000e+00> : vector<64x32xf32>
    %95 = tpu.matmul %93, %94, %cst_24 {dimension_numbers = #tpu.dot_dimension_numbers<[1], [0], [0], [1], [0, 0, 1, 1], [], []>} : vector<64x32xbf16>, vector<32x32xbf16>, vector<64x32xf32> -> vector<64x32xf32>
    %c0_25 = arith.constant 0 : index
    %c0_26 = arith.constant 0 : index
    %96 = vector.load %arg6[%c0_25, %c0_26] : memref<1x32xf32, #tpu.memory_space<vmem>>, vector<1x32xf32>
    %97 = vector.shape_cast %96 : vector<1x32xf32> to vector<32xf32>
    %98 = vector.shape_cast %97 : vector<32xf32> to vector<1x32xf32>
    %99 = vector.broadcast %98 : vector<1x32xf32> to vector<64x32xf32>
    %100 = arith.addf %95, %99 : vector<64x32xf32>
    %101 = vector.shape_cast %100 : vector<64x32xf32> to vector<4x16x32xf32>
    %c0_27 = arith.constant 0 : index
    %c0_28 = arith.constant 0 : index
    %c0_29 = arith.constant 0 : index
    %102 = vector.load %arg7[%c0_27, %c0_28, %c0_29] : memref<4x16x32xf32, #tpu.memory_space<vmem>>, vector<4x16x32xf32>
    tpu.vector_store %arg7[%c0_27, %c0_28, %c0_29], %101 {strides = array<i32>} : memref<4x16x32xf32, #tpu.memory_space<vmem>>, vector<4x16x32xf32>,
    return
  }
  func.func @transform_0(%arg0: i32) -> (i32, i32, i32) {
    %c0_i32 = arith.constant 0 : i32
    %c0_i32_0 = arith.constant 0 : i32
    %c0_i32_1 = arith.constant 0 : i32
    return %arg0, %c0_i32, %c0_i32_0 : i32, i32, i32
  }
  func.func @transform_1(%arg0: i32) -> (i32, i32) {
    %c0_i32 = arith.constant 0 : i32
    %c0_i32_0 = arith.constant 0 : i32
    %c0_i32_1 = arith.constant 0 : i32
    return %c0_i32, %c0_i32_0 : i32, i32
  }
  func.func @transform_2(%arg0: i32) -> (i32, i32) {
    %c0_i32 = arith.constant 0 : i32
    %c0_i32_0 = arith.constant 0 : i32
    %c0_i32_1 = arith.constant 0 : i32
    return %c0_i32, %c0_i32_0 : i32, i32
  }
  func.func @transform_3(%arg0: i32) -> (i32, i32, i32, i32) {
    %c0_i32 = arith.constant 0 : i32
    %c0_i32_0 = arith.constant 0 : i32
    %c0_i32_1 = arith.constant 0 : i32
    %c0_i32_2 = arith.constant 0 : i32
    %c0_i32_3 = arith.constant 0 : i32
    return %c0_i32, %c0_i32_0, %c0_i32_1, %c0_i32_2 : i32, i32, i32, i32
  }
  func.func @transform_4(%arg0: i32) -> (i32, i32) {
    %c0_i32 = arith.constant 0 : i32
    %c0_i32_0 = arith.constant 0 : i32
    %c0_i32_1 = arith.constant 0 : i32
    return %c0_i32, %c0_i32_0 : i32, i32
  }
  func.func @transform_5(%arg0: i32) -> (i32, i32) {
    %c0_i32 = arith.constant 0 : i32
    %c0_i32_0 = arith.constant 0 : i32
    %c0_i32_1 = arith.constant 0 : i32
    return %c0_i32, %c0_i32_0 : i32, i32
  }
  func.func @transform_6(%arg0: i32) -> (i32, i32, i32) {
    %c0_i32 = arith.constant 0 : i32
    %c0_i32_0 = arith.constant 0 : i32
    %c0_i32_1 = arith.constant 0 : i32
    return %arg0, %c0_i32, %c0_i32_0 : i32, i32, i32
  }
}

module attributes {stable_mosaic.version = 11 : i64} {
  func.func @_wmsa_kernel(%arg0: i32, %arg1: memref<4x16x32xf32, #tpu.memory_space<vmem>>, %arg2: memref<32x96xbf16, #tpu.memory_space<vmem>>, %arg3: memref<1x96xf32, #tpu.memory_space<vmem>>, %arg4: memref<4x4x16x16xbf16, #tpu.memory_space<vmem>>, %arg5: memref<32x32xbf16, #tpu.memory_space<vmem>>, %arg6: memref<1x32xf32, #tpu.memory_space<vmem>>, %arg7: memref<4x16x32xf32, #tpu.memory_space<vmem>>, %arg8: memref<64x32xbf16, #tpu.memory_space<vmem>>) attributes {dimension_semantics = [#tpu.dimension_semantics<parallel>], iteration_bounds = array<i64: 2>, scalar_prefetch = 0 : i64, scratch_operands = 1 : i64, tpu.core_type = #tpu.core_type<tc>, window_params = [{transform_indices = @transform_0, window_bounds = array<i64: 4, 16, 32>}, {pipeline_mode = #tpu.pipeline_mode<synchronous>, transform_indices = @transform_1, window_bounds = array<i64: 32, 96>}, {pipeline_mode = #tpu.pipeline_mode<synchronous>, transform_indices = @transform_2, window_bounds = array<i64: 1, 96>}, {pipeline_mode = #tpu.pipeline_mode<synchronous>, transform_indices = @transform_3, window_bounds = array<i64: 4, 4, 16, 16>}, {pipeline_mode = #tpu.pipeline_mode<synchronous>, transform_indices = @transform_4, window_bounds = array<i64: 32, 32>}, {pipeline_mode = #tpu.pipeline_mode<synchronous>, transform_indices = @transform_5, window_bounds = array<i64: 1, 32>}, {transform_indices = @transform_6, window_bounds = array<i64: 4, 16, 32>}]} {
    %c0 = arith.constant 0 : index
    %c0_0 = arith.constant 0 : index
    %c0_1 = arith.constant 0 : index
    %0 = vector.load %arg1[%c0, %c0_0, %c0_1] : memref<4x16x32xf32, #tpu.memory_space<vmem>>, vector<4x16x32xf32>
    %1 = vector.shape_cast %0 : vector<4x16x32xf32> to vector<64x32xf32>
    %2 = arith.truncf %1 : vector<64x32xf32> to vector<64x32xbf16>
    %c0_2 = arith.constant 0 : index
    %c0_3 = arith.constant 0 : index
    %3 = vector.load %arg2[%c0_2, %c0_3] : memref<32x96xbf16, #tpu.memory_space<vmem>>, vector<32x96xbf16>
    %cst = arith.constant dense<0.000000e+00> : vector<64x96xf32>
    %4 = tpu.matmul %2, %3, %cst {dimension_numbers = #tpu.dot_dimension_numbers<[1], [0], [0], [1], [0, 0, 1, 1], [], []>} : vector<64x32xbf16>, vector<32x96xbf16>, vector<64x96xf32> -> vector<64x96xf32>
    %c0_4 = arith.constant 0 : index
    %c0_5 = arith.constant 0 : index
    %5 = vector.load %arg3[%c0_4, %c0_5] : memref<1x96xf32, #tpu.memory_space<vmem>>, vector<1x96xf32>
    %6 = vector.shape_cast %5 : vector<1x96xf32> to vector<96xf32>
    %7 = vector.shape_cast %6 : vector<96xf32> to vector<1x96xf32>
    %8 = vector.broadcast %7 : vector<1x96xf32> to vector<64x96xf32>
    %9 = arith.addf %4, %8 : vector<64x96xf32>
    %10 = vector.extract_strided_slice %9 {offsets = [0, 0], sizes = [64, 32], strides = [1, 1]} : vector<64x96xf32> to vector<64x32xf32>
    %cst_6 = arith.constant 0.353553385 : f32
    %11 = vector.broadcast %cst_6 : f32 to vector<64x32xf32>
    %12 = arith.mulf %10, %11 : vector<64x32xf32>
    %13 = arith.truncf %12 : vector<64x32xf32> to vector<64x32xbf16>
    %14 = vector.extract_strided_slice %9 {offsets = [0, 32], sizes = [64, 32], strides = [1, 1]} : vector<64x96xf32> to vector<64x32xf32>
    %15 = arith.truncf %14 : vector<64x32xf32> to vector<64x32xbf16>
    %16 = vector.extract_strided_slice %9 {offsets = [0, 64], sizes = [64, 32], strides = [1, 1]} : vector<64x96xf32> to vector<64x32xf32>
    %17 = arith.truncf %16 : vector<64x32xf32> to vector<64x32xbf16>
    %18 = vector.extract_strided_slice %13 {offsets = [0, 0], sizes = [64, 8], strides = [1, 1]} : vector<64x32xbf16> to vector<64x8xbf16>
    %19 = vector.shape_cast %18 : vector<64x8xbf16> to vector<4x16x8xbf16>
    %20 = vector.extract_strided_slice %13 {offsets = [0, 8], sizes = [64, 8], strides = [1, 1]} : vector<64x32xbf16> to vector<64x8xbf16>
    %21 = vector.shape_cast %20 : vector<64x8xbf16> to vector<4x16x8xbf16>
    %22 = vector.extract_strided_slice %13 {offsets = [0, 16], sizes = [64, 8], strides = [1, 1]} : vector<64x32xbf16> to vector<64x8xbf16>
    %23 = vector.shape_cast %22 : vector<64x8xbf16> to vector<4x16x8xbf16>
    %24 = vector.extract_strided_slice %13 {offsets = [0, 24], sizes = [64, 8], strides = [1, 1]} : vector<64x32xbf16> to vector<64x8xbf16>
    %25 = vector.shape_cast %24 : vector<64x8xbf16> to vector<4x16x8xbf16>
    %26 = vector.shape_cast %19 : vector<4x16x8xbf16> to vector<1x4x16x8xbf16>
    %27 = vector.shape_cast %21 : vector<4x16x8xbf16> to vector<1x4x16x8xbf16>
    %28 = vector.shape_cast %23 : vector<4x16x8xbf16> to vector<1x4x16x8xbf16>
    %29 = vector.shape_cast %25 : vector<4x16x8xbf16> to vector<1x4x16x8xbf16>
    %30 = tpu.concatenate %26, %27, %28, %29 in 0 : vector<1x4x16x8xbf16>, vector<1x4x16x8xbf16>, vector<1x4x16x8xbf16>, vector<1x4x16x8xbf16> -> vector<4x4x16x8xbf16>
    %31 = vector.shape_cast %30 : vector<4x4x16x8xbf16> to vector<16x16x8xbf16>
    %32 = vector.extract_strided_slice %15 {offsets = [0, 0], sizes = [64, 8], strides = [1, 1]} : vector<64x32xbf16> to vector<64x8xbf16>
    %33 = vector.shape_cast %32 : vector<64x8xbf16> to vector<4x16x8xbf16>
    %34 = vector.extract_strided_slice %15 {offsets = [0, 8], sizes = [64, 8], strides = [1, 1]} : vector<64x32xbf16> to vector<64x8xbf16>
    %35 = vector.shape_cast %34 : vector<64x8xbf16> to vector<4x16x8xbf16>
    %36 = vector.extract_strided_slice %15 {offsets = [0, 16], sizes = [64, 8], strides = [1, 1]} : vector<64x32xbf16> to vector<64x8xbf16>
    %37 = vector.shape_cast %36 : vector<64x8xbf16> to vector<4x16x8xbf16>
    %38 = vector.extract_strided_slice %15 {offsets = [0, 24], sizes = [64, 8], strides = [1, 1]} : vector<64x32xbf16> to vector<64x8xbf16>
    %39 = vector.shape_cast %38 : vector<64x8xbf16> to vector<4x16x8xbf16>
    %40 = vector.shape_cast %33 : vector<4x16x8xbf16> to vector<1x4x16x8xbf16>
    %41 = vector.shape_cast %35 : vector<4x16x8xbf16> to vector<1x4x16x8xbf16>
    %42 = vector.shape_cast %37 : vector<4x16x8xbf16> to vector<1x4x16x8xbf16>
    %43 = vector.shape_cast %39 : vector<4x16x8xbf16> to vector<1x4x16x8xbf16>
    %44 = tpu.concatenate %40, %41, %42, %43 in 0 : vector<1x4x16x8xbf16>, vector<1x4x16x8xbf16>, vector<1x4x16x8xbf16>, vector<1x4x16x8xbf16> -> vector<4x4x16x8xbf16>
    %45 = vector.shape_cast %44 : vector<4x4x16x8xbf16> to vector<16x16x8xbf16>
    %46 = vector.extract_strided_slice %17 {offsets = [0, 0], sizes = [64, 8], strides = [1, 1]} : vector<64x32xbf16> to vector<64x8xbf16>
    %47 = vector.shape_cast %46 : vector<64x8xbf16> to vector<4x16x8xbf16>
    %48 = vector.extract_strided_slice %17 {offsets = [0, 8], sizes = [64, 8], strides = [1, 1]} : vector<64x32xbf16> to vector<64x8xbf16>
    %49 = vector.shape_cast %48 : vector<64x8xbf16> to vector<4x16x8xbf16>
    %50 = vector.extract_strided_slice %17 {offsets = [0, 16], sizes = [64, 8], strides = [1, 1]} : vector<64x32xbf16> to vector<64x8xbf16>
    %51 = vector.shape_cast %50 : vector<64x8xbf16> to vector<4x16x8xbf16>
    %52 = vector.extract_strided_slice %17 {offsets = [0, 24], sizes = [64, 8], strides = [1, 1]} : vector<64x32xbf16> to vector<64x8xbf16>
    %53 = vector.shape_cast %52 : vector<64x8xbf16> to vector<4x16x8xbf16>
    %54 = vector.shape_cast %47 : vector<4x16x8xbf16> to vector<1x4x16x8xbf16>
    %55 = vector.shape_cast %49 : vector<4x16x8xbf16> to vector<1x4x16x8xbf16>
    %56 = vector.shape_cast %51 : vector<4x16x8xbf16> to vector<1x4x16x8xbf16>
    %57 = vector.shape_cast %53 : vector<4x16x8xbf16> to vector<1x4x16x8xbf16>
    %58 = tpu.concatenate %54, %55, %56, %57 in 0 : vector<1x4x16x8xbf16>, vector<1x4x16x8xbf16>, vector<1x4x16x8xbf16>, vector<1x4x16x8xbf16> -> vector<4x4x16x8xbf16>
    %59 = vector.shape_cast %58 : vector<4x4x16x8xbf16> to vector<16x16x8xbf16>
    "tpu.trace_start"() <{level = 10 : i32, message = "bnd,bmd->bnm"}> : () -> ()
    %cst_7 = arith.constant dense<0.000000e+00> : vector<16x16x16xf32>
    %60 = tpu.matmul %31, %45, %cst_7 {dimension_numbers = #tpu.dot_dimension_numbers<[2], [2], [1], [1], [0, 0, 0, 1, 1, 1], [0], [0]>} : vector<16x16x8xbf16>, vector<16x16x8xbf16>, vector<16x16x16xf32> -> vector<16x16x16xf32>
    "tpu.trace_stop"() : () -> ()
    %c0_8 = arith.constant 0 : index
    %c0_9 = arith.constant 0 : index
    %c0_10 = arith.constant 0 : index
    %c0_11 = arith.constant 0 : index
    %61 = vector.load %arg4[%c0_8, %c0_9, %c0_10, %c0_11] : memref<4x4x16x16xbf16, #tpu.memory_space<vmem>>, vector<4x4x16x16xbf16>
    %62 = arith.extf %61 : vector<4x4x16x16xbf16> to vector<4x4x16x16xf32>
    %63 = vector.shape_cast %60 : vector<16x16x16xf32> to vector<4x1x4x16x16xf32>
    %64 = vector.shape_cast %62 : vector<4x4x16x16xf32> to vector<4x1x4x16x16xf32>
    %65 = arith.addf %63, %64 : vector<4x1x4x16x16xf32>
    %66 = vector.shape_cast %65 : vector<4x1x4x16x16xf32> to vector<16x16x16xf32>
    %cst_12 = arith.constant dense<0xFF800000> : vector<16x16xf32>
    %67 = vector.multi_reduction <maximumf>, %66, %cst_12 [2] : vector<16x16x16xf32> to vector<16x16xf32>
    %68 = vector.shape_cast %67 : vector<16x16xf32> to vector<16x16x1xf32>
    %69 = vector.broadcast %68 : vector<16x16x1xf32> to vector<16x16x16xf32>
    %70 = arith.subf %66, %69 : vector<16x16x16xf32>
    %71 = math.exp %70 : vector<16x16x16xf32>
    %cst_13 = arith.constant dense<0.000000e+00> : vector<16x16xf32>
    %72 = vector.multi_reduction <add>, %71, %cst_13 [2] : vector<16x16x16xf32> to vector<16x16xf32>
    %73 = vector.shape_cast %72 : vector<16x16xf32> to vector<16x16x1xf32>
    %74 = tpu.reciprocal %73 {approx = true} : vector<16x16x1xf32> -> vector<16x16x1xf32>
    %75 = vector.broadcast %74 : vector<16x16x1xf32> to vector<16x16x16xf32>
    %76 = arith.mulf %71, %75 : vector<16x16x16xf32>
    %77 = arith.truncf %76 : vector<16x16x16xf32> to vector<16x16x16xbf16>
    "tpu.trace_start"() <{level = 10 : i32, message = "bnm,bmd->bnd"}> : () -> ()
    %cst_14 = arith.constant dense<0.000000e+00> : vector<16x16x8xf32>
    %78 = tpu.matmul %77, %59, %cst_14 {dimension_numbers = #tpu.dot_dimension_numbers<[2], [1], [1], [2], [0, 0, 0, 1, 1, 2], [0], [0]>} : vector<16x16x16xbf16>, vector<16x16x8xbf16>, vector<16x16x8xf32> -> vector<16x16x8xf32>
    "tpu.trace_stop"() : () -> ()
    %79 = arith.truncf %78 : vector<16x16x8xf32> to vector<16x16x8xbf16>
    %80 = vector.shape_cast %79 : vector<16x16x8xbf16> to vector<4x64x8xbf16>
    %81 = vector.extract_strided_slice %80 {offsets = [0, 0, 0], sizes = [1, 64, 8], strides = [1, 1, 1]} : vector<4x64x8xbf16> to vector<1x64x8xbf16>
    %82 = vector.shape_cast %81 : vector<1x64x8xbf16> to vector<64x8xbf16>
    %c0_15 = arith.constant 0 : index
    %c0_16 = arith.constant 0 : index
    %83 = vector.load %arg8[%c0_15, %c0_16] : memref<64x32xbf16, #tpu.memory_space<vmem>>, vector<64x8xbf16>
    tpu.vector_store %arg8[%c0_15, %c0_16], %82 {strides = array<i32>} : memref<64x32xbf16, #tpu.memory_space<vmem>>, vector<64x8xbf16>,
    %84 = vector.extract_strided_slice %80 {offsets = [1, 0, 0], sizes = [1, 64, 8], strides = [1, 1, 1]} : vector<4x64x8xbf16> to vector<1x64x8xbf16>
    %85 = vector.shape_cast %84 : vector<1x64x8xbf16> to vector<64x8xbf16>
    %c0_17 = arith.constant 0 : index
    %c8 = arith.constant 8 : index
    %86 = vector.load %arg8[%c0_17, %c8] : memref<64x32xbf16, #tpu.memory_space<vmem>>, vector<64x8xbf16>
    tpu.vector_store %arg8[%c0_17, %c8], %85 {strides = array<i32>} : memref<64x32xbf16, #tpu.memory_space<vmem>>, vector<64x8xbf16>,
    %87 = vector.extract_strided_slice %80 {offsets = [2, 0, 0], sizes = [1, 64, 8], strides = [1, 1, 1]} : vector<4x64x8xbf16> to vector<1x64x8xbf16>
    %88 = vector.shape_cast %87 : vector<1x64x8xbf16> to vector<64x8xbf16>
    %c0_18 = arith.constant 0 : index
    %c16 = arith.constant 16 : index
    %89 = vector.load %arg8[%c0_18, %c16] : memref<64x32xbf16, #tpu.memory_space<vmem>>, vector<64x8xbf16>
    tpu.vector_store %arg8[%c0_18, %c16], %88 {strides = array<i32>} : memref<64x32xbf16, #tpu.memory_space<vmem>>, vector<64x8xbf16>,
    %90 = vector.extract_strided_slice %80 {offsets = [3, 0, 0], sizes = [1, 64, 8], strides = [1, 1, 1]} : vector<4x64x8xbf16> to vector<1x64x8xbf16>
    %91 = vector.shape_cast %90 : vector<1x64x8xbf16> to vector<64x8xbf16>
    %c0_19 = arith.constant 0 : index
    %c24 = arith.constant 24 : index
    %92 = vector.load %arg8[%c0_19, %c24] : memref<64x32xbf16, #tpu.memory_space<vmem>>, vector<64x8xbf16>
    tpu.vector_store %arg8[%c0_19, %c24], %91 {strides = array<i32>} : memref<64x32xbf16, #tpu.memory_space<vmem>>, vector<64x8xbf16>,
    %c0_20 = arith.constant 0 : index
    %c0_21 = arith.constant 0 : index
    %93 = vector.load %arg8[%c0_20, %c0_21] : memref<64x32xbf16, #tpu.memory_space<vmem>>, vector<64x32xbf16>
    %c0_22 = arith.constant 0 : index
    %c0_23 = arith.constant 0 : index
    %94 = vector.load %arg5[%c0_22, %c0_23] : memref<32x32xbf16, #tpu.memory_space<vmem>>, vector<32x32xbf16>
    %cst_24 = arith.constant dense<0.000000e+00> : vector<64x32xf32>
    %95 = tpu.matmul %93, %94, %cst_24 {dimension_numbers = #tpu.dot_dimension_numbers<[1], [0], [0], [1], [0, 0, 1, 1], [], []>} : vector<64x32xbf16>, vector<32x32xbf16>, vector<64x32xf32> -> vector<64x32xf32>
    %c0_25 = arith.constant 0 : index
    %c0_26 = arith.constant 0 : index
    %96 = vector.load %arg6[%c0_25, %c0_26] : memref<1x32xf32, #tpu.memory_space<vmem>>, vector<1x32xf32>
    %97 = vector.shape_cast %96 : vector<1x32xf32> to vector<32xf32>
    %98 = vector.shape_cast %97 : vector<32xf32> to vector<1x32xf32>
    %99 = vector.broadcast %98 : vector<1x32xf32> to vector<64x32xf32>
    %100 = arith.addf %95, %99 : vector<64x32xf32>
    %101 = vector.shape_cast %100 : vector<64x32xf32> to vector<4x16x32xf32>
    %c0_27 = arith.constant 0 : index
    %c0_28 = arith.constant 0 : index
    %c0_29 = arith.constant 0 : index
    %102 = vector.load %arg7[%c0_27, %c0_28, %c0_29] : memref<4x16x32xf32, #tpu.memory_space<vmem>>, vector<4x16x32xf32>
    tpu.vector_store %arg7[%c0_27, %c0_28, %c0_29], %101 {strides = array<i32>} : memref<4x16x32xf32, #tpu.memory_space<vmem>>, vector<4x16x32xf32>,
    return
  }
  func.func @transform_0(%arg0: i32) -> (i32, i32, i32) {
    %c0_i32 = arith.constant 0 : i32
    %c0_i32_0 = arith.constant 0 : i32
    %c0_i32_1 = arith.constant 0 : i32
    return %arg0, %c0_i32, %c0_i32_0 : i32, i32, i32
  }
  func.func @transform_1(%arg0: i32) -> (i32, i32) {
    %c0_i32 = arith.constant 0 : i32
    %c0_i32_0 = arith.constant 0 : i32
    %c0_i32_1 = arith.constant 0 : i32
    return %c0_i32, %c0_i32_0 : i32, i32
  }
  func.func @transform_2(%arg0: i32) -> (i32, i32) {
    %c0_i32 = arith.constant 0 : i32
    %c0_i32_0 = arith.constant 0 : i32
    %c0_i32_1 = arith.constant 0 : i32
    return %c0_i32, %c0_i32_0 : i32, i32
  }
  func.func @transform_3(%arg0: i32) -> (i32, i32, i32, i32) {
    %c0_i32 = arith.constant 0 : i32
    %c0_i32_0 = arith.constant 0 : i32
    %c0_i32_1 = arith.constant 0 : i32
    %c0_i32_2 = arith.constant 0 : i32
    %c0_i32_3 = arith.constant 0 : i32
    return %c0_i32, %c0_i32_0, %c0_i32_1, %c0_i32_2 : i32, i32, i32, i32
  }
  func.func @transform_4(%arg0: i32) -> (i32, i32) {
    %c0_i32 = arith.constant 0 : i32
    %c0_i32_0 = arith.constant 0 : i32
    %c0_i32_1 = arith.constant 0 : i32
    return %c0_i32, %c0_i32_0 : i32, i32
  }
  func.func @transform_5(%arg0: i32) -> (i32, i32) {
    %c0_i32 = arith.constant 0 : i32
    %c0_i32_0 = arith.constant 0 : i32
    %c0_i32_1 = arith.constant 0 : i32
    return %c0_i32, %c0_i32_0 : i32, i32
  }
  func.func @transform_6(%arg0: i32) -> (i32, i32, i32) {
    %c0_i32 = arith.constant 0 : i32
    %c0_i32_0 = arith.constant 0 : i32
    %c0_i32_1 = arith.constant 0 : i32
    return %arg0, %c0_i32, %c0_i32_0 : i32, i32, i32
  }
}

</mosaic_0001>

<bundles_post_ra>
// kernel: tpu_custom_call.1
= control target key start
LH: loop header
LB: loop body
LE: loop exit
PB: predicated region body
PF: predicated region fallthrough
CT: control target
= control target key end

     0   :  { %11 = vsyncpa [#allocation4], 0  ;;  %s4871_s0 = inlined_call_operand.hbm [shape: f32[8,16,32], index: 0, kind: input, shape index: {}]   ;;  %s4872_s1 = inlined_call_operand.hbm [shape: bf16[32,96], index: 1, kind: input, shape index: {}]   ;;  %s4873_s2 = inlined_call_operand.vmem [shape: f32[1,96], index: 2, kind: input, shape index: {}]   ;;  %s4874_s3 = inlined_call_operand.hbm [shape: bf16[4,4,16,16], index: 3, kind: input, shape index: {}]   ;;  %s4875_s4 = inlined_call_operand.hbm [shape: bf16[32,32], index: 4, kind: input, shape index: {}]   ;;  %s4876_s5 = inlined_call_operand.vmem [shape: f32[1,32], index: 5, kind: input, shape index: {}]   ;;  %s4877_s6 = inlined_call_operand.hbm [shape: f32[8,16,32], index: 6, kind: output, shape index: {}]  }
   0x1   :  { %13 = vsyncpa [#allocation4 + $0x1], 0 }
   0x2   :  { %14 = vsyncpa [#allocation7], 0 }
   0x3   :  { %15 = vsyncpa [#allocation10], 0 }
   0x4   :  { %16 = vsyncpa [#allocation5], 0 }
   0x5   :  { %18 = vsyncpa [#allocation5 + $0x1], 0  ;;  %s3948_s21 = smov 0   ;;  %s3950_s22 = smov 0  }
   0x6   :  { %s3952_s23 = smov 0   ;;  %s3954_s24 = smov 0  }
   0x7 LB: > { %s3969_s25 = sadd.s32 4294967295, %s3891_s24   ;;  %s2970_s26 = sadd.s32 4294967294, %s3891_s24   ;;  %s3891_s24 = sphi %s3954_s24, %s4901_s24   ;;  %s3887_s23 = sphi %s3952_s23, %s4900_s23   ;;  %s3883_s22 = sphi %s3950_s22, %s4899_s22   ;;  %s3879_s21 = sphi %s3948_s21, %s4898_s21  }
   0x8   : > { %p44_p0 = scmp.ne.s32.totalorder %s3883_s22, %s3879_s21  ;;  %p4878_p1 = scmp.eq.s32.totalorder %s3969_s25, 0 }
   0x9   : > { %p179_p3 = scmp.eq.s32.totalorder %s2970_s26, 1  ;;  %p2971_p5 = scmp.ge.s32.totalorder %s3891_s24, 1 }
   0xa   : > { %p3978_p4 = por %p4878_p1, %p44_p0  ;;  %p186_p7 = scmp.lt.s32.totalorder %s3891_s24, 3 }
   0xb   : > { %p3983_p6 = por %p179_p3, %p44_p0  ;;  %s3893_s30 = smov [#allocation6]  }
   0xc   : > { %s4882_s27 = scalar_select %p3978_p4, 1, 0 }
   0xd   : > { %s4883_s28 = scalar_select %p3983_p6, 1, 0 }
   0xe   : > { %p3988_p8 = pnand %p2971_p5, %p186_p7  ;;  %s198_s7 = sshll.u32 %s3893_s30, 4  ;;  %s199_s7 = int_to_ptr.vmem [resolvable:$true] %s198_s7 }
   0xf   : > { %s3894_s9 = smov [#allocation8]   ;;  %s3895_s11 = smov [#allocation9]  }
  0x10   : > { %s4884_s29 = scalar_select %p3988_p8, 1, 0 }
  0x11   : > { %p3501_p9 = pneg %p3988_p8  ;;  %s214_s10 = sshll.u32 %s3894_s9, 4  ;;  %s215_s10 = int_to_ptr.vmem [resolvable:$true] %s214_s10 }
  0x12   : > { %s227_s12 = sshll.u32 %s3895_s11, 4  ;;  %s3724_s13 = scalar_lea.vmem %s199_s7, 256  ;;  %s228_s12 = int_to_ptr.vmem [resolvable:$true] %s227_s12 }
  0x13   : > { %p3997_p11 = pnand %p3501_p9, %p4878_p1  ;;  %p3725_p13 = scmp.ne.s32.totalorder %s199_s7, %s3724_s13 }
  0x14   : > { %p3732_p5 = scmp.lt.s32.totalorder %s199_s7, %s199_s7  ;;  %p3733_p7 = scmp.lt.s32.totalorder %s3724_s13, %s3724_s13 }
  0x15   : > { %p3715_p12 = pneg %p3997_p11 }
  0x16   : > { %p3734_p9 = por %p3733_p7, %p3732_p5 }
  0x17   : > { %p3727_p0 = pnand %p3725_p13, %p3715_p12 }
  0x19   : > { %p3728_p3 = pneg %p3727_p0 }
  0x1b   : > { %p3735_p10 = pnand %p3734_p9, %p3728_p3 }
  0x1d   : > { %3738 = shalt.err (!%p3735_p10)
}
  0x1e   : > { %s3896_s14 = smov 64   ;;  %s3897_s15 = smov 4  }
  0x1f   : > { %3504 = dma.hbm_to_vmem [thread:$0]  (!%p3997_p11), %s4872_s1, 256, %s199_s7, [#allocation7], %s3896_s14, %s3896_s14, %s3897_s15  }
  0x20   : > { %s3750_s18 = scalar_lea.vmem %s215_s10, 2048  ;;  %p3758_p2 = scmp.lt.s32.totalorder %s215_s10, %s215_s10 }
  0x21   : > { %p3751_p1 = scmp.ne.s32.totalorder %s215_s10, %s3750_s18  ;;  %p3759_p6 = scmp.lt.s32.totalorder %s3750_s18, %s3750_s18 }
  0x23   : > { %p3753_p13 = pnand %p3751_p1, %p3715_p12  ;;  %p3760_p5 = por %p3759_p6, %p3758_p2 }
  0x25   : > { %p3754_p0 = pneg %p3753_p13 }
  0x27   : > { %p3761_p3 = pnand %p3760_p5, %p3754_p0 }
  0x29   : > { %3764 = shalt.err (!%p3761_p3)
}
  0x2a   : > { %3507 = dma.hbm_to_vmem [thread:$0]  (!%p3997_p11), %s4874_s3, 2048, %s215_s10, [#allocation7], %s3896_s14, %s3896_s14, %s3897_s15  }
  0x2b   : > { %s3776_s26 = scalar_lea.vmem %s228_s12, 256  ;;  %p3784_p9 = scmp.lt.s32.totalorder %s228_s12, %s228_s12 }
  0x2c   : > { %p3777_p10 = scmp.ne.s32.totalorder %s228_s12, %s3776_s26  ;;  %p3785_p13 = scmp.lt.s32.totalorder %s3776_s26, %s3776_s26 }
  0x2e   : > { %p3779_p7 = pnand %p3777_p10, %p3715_p12  ;;  %p3786_p4 = por %p3785_p13, %p3784_p9 }
  0x30   : > { %p3780_p1 = pneg %p3779_p7 }
  0x32   : > { %p3787_p2 = pnand %p3786_p4, %p3780_p1 }
  0x34   : > { %3790 = shalt.err (!%p3787_p2)
}
  0x35   : > { %3510 = dma.hbm_to_vmem [thread:$0]  (!%p3997_p11), %s4875_s4, 256, %s228_s12, [#allocation10], %s3896_s14, %s3896_s14, %s3897_s15  }
  0x36   : > { %s4028_s9 = sadd.s32 1, %s3891_s24   ;;  %s31_s8 = sadd.s32 1, %s3887_s23 }
  0x37   : > { %s28_s10 = ssub.s32 %s3891_s24, %s4028_s9  ;;  %p38_p6 = scmp.ne.s32.totalorder %s3887_s23, %s3883_s22 }
  0x38   : > { %p29_p4 = scmp.eq.s32.totalorder %s28_s10, 0  ;;  %p39_p12 = scmp.eq.s32.totalorder %s3891_s24, 0 }
  0x39   : > { %p3522_p0 = scmp.lt.s32.totalorder %s3891_s24, 2  ;;  %p4886_p3 = scmp.eq.s32.totalorder %s3969_s25, 1 }
  0x3a   : > { %s4038_s11 = scalar_select %p29_p4, %s3887_s23, %s31_s8  }
  0x3b   : > { %p40_p5 = por %p39_p12, %p38_p6  ;;  %p4042_p10 = por %p4886_p3, %p38_p6 }
  0x3c   : > { %s244_s16 = sand.u32 1, %s3887_s23   ;;  %s3075_s17 = sshll.u32 %s3891_s24, 10 }
  0x3d   : > { %s4887_s13 = scalar_select %p4042_p10, 1, 0 }
  0x3e   : > { %s2976_s12 = sshll.u32 %s244_s16, 6  ;;  %s4051_s18 = scalar_lea.hbm %s4871_s0, %s3075_s17 }
  0x3f   : > { %s248_s19 = scalar_lea.vmem [#allocation3], %s2976_s12  ;;  %p4053_p11 = pnand %p3522_p0, %p40_p5 }
  0x40   : > { %s256_s20 = sshll.u32 %s248_s19, 4  ;;  %s4059_s30 = scalar_lea.sflag [#allocation4], %s244_s16  ;;  %s4057_s20 = int_to_ptr.vmem [resolvable:$true] %s256_s20 }
  0x41   : > { %s3791_s7 = scalar_lea.hbm %s4051_s18, 1024  ;;  %p3793_p1 = pneg %p4053_p11 }
  0x42   : > { %p3792_p7 = scmp.ne.s32.totalorder %s4051_s18, %s3791_s7  ;;  %s3796_s17 = scalar_lea.hbm %s4871_s0, 2048 }
  0x43   : > { %p3797_p2 = scmp.lt.s32.totalorder %s4051_s18, %s4871_s0  ;;  %p3798_p4 = scmp.lt.s32.totalorder %s3796_s17, %s3791_s7 }
  0x44   : > { %p3794_p9 = pnand %p3793_p1, %p3792_p7 }
  0x45   : > { %p3799_p6 = por %p3798_p4, %p3797_p2 }
  0x46   : > { %p3795_p13 = pneg %p3794_p9 }
  0x48   : > { %p3800_p12 = pnand %p3799_p6, %p3795_p13 }
  0x4a   : > { %3803 = shalt.err (!%p3800_p12)
}
  0x4b   : > { %s3804_s16 = scalar_lea.vmem %s4057_s20, 1024  ;;  %s3898_s15 = smov [#allocation3]  }
  0x4c   : > { %p3805_p0 = scmp.ne.s32.totalorder %s4057_s20, %s3804_s16  ;;  %s3809_s19 = sshll.u32 %s3898_s15, 4  ;;  %s3810_s19 = int_to_ptr.vmem [resolvable:$false] %s3809_s19 }
  0x4d   : > { %s3811_s10 = scalar_lea.vmem %s3810_s19, 2048  ;;  %p3812_p7 = scmp.lt.s32.totalorder %s4057_s20, %s3810_s19 }
  0x4e   : > { %p3807_p5 = pnand %p3805_p0, %p3793_p1  ;;  %p3813_p9 = scmp.lt.s32.totalorder %s3811_s10, %s3804_s16 }
  0x50   : > { %p3808_p3 = pneg %p3807_p5  ;;  %p3814_p10 = por %p3813_p9, %p3812_p7 }
  0x52   : > { %p3815_p8 = pnand %p3814_p10, %p3808_p3 }
  0x54   : > { %3818 = shalt.err (!%p3815_p8)
}
  0x55   : > { %s3899_s7 = smov 128   ;;  %s3900_s8 = smov 8  }
  0x56   : > { %3514 = dma.hbm_to_vmem [thread:$0]  (!%p4053_p11), %s4051_s18, 1024, %s4057_s20, %s4059_s30, %s3899_s7, %s3899_s7, %s3900_s8  }
  0x57   : > { %p4889_p1 = scmp.ne.s32.totalorder %s4884_s29, 0 }
  0x58   : > { %s4083_s17 = sand.u32 (!%p4889_p1), 1, %s3883_s22   ;;  %p4890_p8 = scmp.ne.s32.totalorder (!%p4889_p1), %s4882_s27, 0 }
  0x59   : > { %268 = sbr.rel (%p4889_p1) target bundleno = 1654 (0x676), region = 44  ;;  %s2981_s12 = sshll.u32 (!%p4889_p1), %s4083_s17, 6 }
  0x5a   : > { %s271_s14 = scalar_lea.sflag (!%p4889_p1), [#allocation4], %s4083_s17  ;;  %s274_s16 = scalar_lea.vmem (!%p4889_p1), [#allocation3], %s2981_s12 }
  0x5e   : > { %3862 = dma.done.wait (%p4890_p8), %s271_s14, 1024  }
  0x5f   : > { %3864 = vsyncadd (%p4890_p8), %s271_s14, 4294966272  ;;  %p4891_p10 = scmp.eq.s32.totalorder %s3969_s25, 0 }
  0x61   : > { %3866 = dma.done.wait (%p4891_p10), [#allocation7], 2304   ;;  %p4892_p11 = pmov %p4891_p10 }
  0x62   : > { %p4893_p13 = pmov %p4891_p10 }
  0x63   : > { %3868 = vsyncadd (%p4892_p11), [#allocation7], 4294964992 }
  0x64   : > { %3870 = dma.done.wait (%p4893_p13), [#allocation10], 256   ;;  %p4894_p2 = pmov %p4891_p10 }
  0x65   : > { %v3577_v0 = vld [vmem:[#allocation6 + $0x8] sm:$0xff]   ;;  %v3578_v1 = vld [vmem:[#allocation6] sm:$0xff]   ;;  %vm353_vm0 = vcmask 261120   ;;  %v320_v7 = vld [vmem:[%s274_s16 + $0x10] sm:$0xff]  ;;  %s3901_s18 = smov 120   ;;  %v3902_v47 = vmov 0.0  }
  0x66   : > { %3872 = vsyncadd (%p4894_p2), [#allocation10], 4294967040  ;;  %3265 = vmatprep.subr.bf16.mxu0 %v3577_v0  ;;  %3481 = vmatprep.subr.bf16.mxu1 %v3577_v0  ;;  %v318_v2 = vld [vmem:[%s274_s16] sm:$0xff]  ;;  %v319_v3 = vld [vmem:[%s274_s16 + $0x8] sm:$0xff]  ;;  %s3903_s20 = smov 112   ;;  %vm3904_vm1 = vmmov 0  }
  0x67   : > { %v322_v4 = vld [vmem:[%s274_s16 + $0x20] sm:$0xff]  ;;  %3266 = vmatpush3.bf16.msra.mxu0 %v3577_v0  ;;  %3483 = vmatpush3.bf16.msra.mxu1 %v3577_v0  ;;  %v326_v5 = vpack.c.bf16 %v319_v3, %v318_v2  ;;  %v323_v6 = vld [vmem:[%s274_s16 + $0x28] sm:$0xff]  ;;  %v321_v8 = vld [vmem:[%s274_s16 + $0x18] sm:$0xff]  ;;  %s3905_s26 = smov 104   ;;  %s3906_s30 = smov 96   ;;  %vm505_vm2 = vcmask 64512  }
  0x68   : > { %3267 = vmatprep.subr.bf16.mxu0 %v3578_v1  ;;  %3482 = vmatprep.subr.bf16.mxu1 %v3578_v1  ;;  %v328_v9 = vpack.c.bf16 %v323_v6, %v322_v4  ;;  %v324_v10 = vld [vmem:[%s274_s16 + $0x30] sm:$0xff]  ;;  %v325_v11 = vld [vmem:[%s274_s16 + $0x38] sm:$0xff]  ;;  %v327_v12 = vpack.c.bf16 %v321_v8, %v320_v7  ;;  %v2986_v15 = vld [vmem:[%s4873_s2] ss:$0 sm:$0xff]  ;;  %s3907_s15 = smov 64   ;;  %vm1384_vm3 = vcmask 130048  }
  0x69   : > { %3269 = vmatprep.mubr.msk.bf16.mxu0 %vm353_vm0, %v326_v5  ;;  %v329_v13 = vpack.c.bf16 %v325_v11, %v324_v10  ;;  %vm2549_vm4 = vcmask 60416   ;;  %s3908_s19 = smov 8   ;;  %s3909_s10 = smov 16   ;;  %vm2602_vm5 = vcmask 126016   ;;  %vm2655_vm6 = vcmask 191616  }
  0x6a   : > { %3273 = vmatprep.mubr.msk.bf16.mxu1 %vm353_vm0, %v328_v9  ;;  %s3910_s7 = smov 24   ;;  %vm2708_vm7 = vcmask 257216   ;;  %s314_s16 = scalar_lea.vmem [#allocation11], %s2981_s12 }
  0x6b   : > { %3268 = vmatpush3.bf16.msra.mxu0 %v3578_v1  ;;  %3484 = vmatpush3.bf16.msra.mxu1 %v3578_v1  ;;  %s3109_s12 = sshll.u32 %s3969_s25, 10  ;;  %s2868_s27 = sshll.u32 %s314_s16, 4  ;;  %s4826_s27 = int_to_ptr.vmem [resolvable:$true] %s2868_s27 }
  0x6c   : > { %3277 = vmatprep.subr.bf16.mxu1 %v3902_v47  ;;  %3289 = vmatprep.subr.bf16.mxu0 %v3902_v47  ;;  %s2854_s25 = scalar_lea.sflag [#allocation5], %s4083_s17  ;;  %p4895_p6 = scmp.ne.s32.totalorder %s4887_s13, 0 }
  0x6e   : > { %3270 = vmatmul.mubr.msk.bf16.vlgmr.msra.gmra.mxu0 %vm353_vm0, %v327_v12  ;;  %3274 = vmatmul.mubr.msk.bf16.vlgmr.msra.gmra.mxu1 %vm353_vm0, %v329_v13 }
  0x6f   : > { %3279 = vmatprep.mubr.msk.bf16.mxu1 %vm3904_vm1, %v3902_v47  ;;  %3291 = vmatprep.mubr.msk.bf16.mxu0 %vm3904_vm1, %v3902_v47 }
 0x12e   : > { %v3271_v14 = vpop.f32.mrf.mxu0  ;;  %v3275_v16 = vpop.f32.mrf.mxu1 }
 0x12f   : > { %v425_v17 = vadd.f32 %v3275_v16, %v2986_v15  ;;  %v409_v20 = vadd.f32 %v3271_v14, %v2986_v15 }
 0x130   : > { %v400_v18 = vpop.f32.mrf.mxu0  ;;  %v416_v19 = vpop.f32.mrf.mxu1 }
 0x131   : > { %v437_v23 = vmul.f32 0.35355338, %v425_v17  ;;  %v401_v24 = vadd.f32 %v2986_v15, %v400_v18  ;;  %v417_v27 = vadd.f32 %v2986_v15, %v416_v19  ;;  %v433_v30 = vmul.f32 0.35355338, %v409_v20 }
 0x132   : > { %v3272_v21 = vpop.f32.mrf.mxu0  ;;  %v3276_v22 = vpop.f32.mrf.mxu1 }
 0x133   : > { %v412_v25 = vadd.f32 %v3272_v21, %v2986_v15  ;;  %v428_v26 = vadd.f32 %v3276_v22, %v2986_v15  ;;  %v435_v33 = vmul.f32 0.35355338, %v417_v27  ;;  %v431_v36 = vmul.f32 0.35355338, %v401_v24 }
 0x134   : > { %v403_v28 = vpop.f32.mrf.mxu0  ;;  %v419_v29 = vpop.f32.mrf.mxu1 }
 0x135   : > { %v434_v31 = vmul.f32 0.35355338, %v412_v25  ;;  %v438_v32 = vmul.f32 0.35355338, %v428_v26  ;;  %v404_v34 = vadd.f32 %v2986_v15, %v403_v28  ;;  %v420_v35 = vadd.f32 %v2986_v15, %v419_v29 }
 0x136   : > { %v4124_v45 = vpack.c.bf16 %v412_v25, %v409_v20  ;;  %v4126_v46 = vpack.c.bf16 %v428_v26, %v425_v17 }
 0x137   : > { %v4108_v37 = vpack.c.bf16 %v434_v31, %v433_v30  ;;  %v4110_v38 = vpack.c.bf16 %v438_v32, %v437_v23  ;;  %v432_v39 = vmul.f32 0.35355338, %v404_v34  ;;  %v4112_v40 = vpack.c.bf16 %v404_v34, %v401_v24 }
 0x138   : > { %v436_v41 = vmul.f32 0.35355338, %v420_v35  ;;  %v4114_v42 = vpack.c.bf16 %v420_v35, %v417_v27 }
 0x139   : > { %v4116_v43 = vpack.c.bf16 %v432_v39, %v431_v36  ;;  %479 = vrot.lane.b32.xlu0 %v4112_v40, %s3901_s18 }
 0x13a   : > { %v4118_v44 = vpack.c.bf16 %v436_v41, %v435_v33  ;;  %483 = vrot.lane.b32.xlu1 %v4114_v42, %s3901_s18 }
 0x13d   : > { %481 = vrot.lane.b32.xlu0 %v4124_v45, %s3901_s18 }
 0x13e   : > { %485 = vrot.lane.b32.xlu1 %v4126_v46, %s3901_s18 }
 0x141   : > { %487 = vrot.lane.b32.xlu0 %v4112_v40, %s3903_s20 }
 0x142   : > { %489 = vrot.lane.b32.xlu1 %v4124_v45, %s3903_s20 }
 0x145   : > { %491 = vrot.lane.b32.xlu0 %v4114_v42, %s3903_s20 }
 0x146   : > { %493 = vrot.lane.b32.xlu1 %v4126_v46, %s3903_s20 }
 0x149   : > { %495 = vrot.lane.b32.xlu0 %v4112_v40, %s3905_s26 }
 0x14a   : > { %497 = vrot.lane.b32.xlu1 %v4124_v45, %s3905_s26 }
 0x14d   : > { %503 = vrot.lane.b32.xlu0 %v4112_v40, %s3906_s30 }
 0x14e   : > { %499 = vrot.lane.b32.xlu1 %v4114_v42, %s3905_s26 }
 0x151   : > { %501 = vrot.lane.b32.xlu0 %v4126_v46, %s3905_s26 }
 0x152   : > { %553 = vrot.lane.b32.xlu1 %v4124_v45, %s3906_s30 }
 0x155   : > { %602 = vrot.lane.b32.xlu0 %v4114_v42, %s3906_s30 }
 0x156   : > { %651 = vrot.lane.b32.xlu1 %v4126_v46, %s3906_s30 }
 0x1ab   : > { %v4164_v49 = vpop.permute.xlu0 %479 }
 0x1ac   : > { %v4162_v48 = vpop.permute.xlu1 %483  ;;  %700 = vrot.lane.b32.xlu0 %v4164_v49, %s3906_s30 }
 0x1af   : > { %v482_v51 = vpop.permute.xlu0 %481 }
 0x1b0   : > { %v4168_v50 = vpop.permute.xlu1 %485  ;;  %749 = vrot.lane.b32.xlu1 %v482_v51, %s3906_s30  ;;  %451 = vrot.lane.b32.xlu0 %v4116_v43, %s3901_s18 }
 0x1b3   : > { %v4173_v53 = vpop.permute.xlu0 %487 }
 0x1b4   : > { %v490_v52 = vpop.permute.xlu1 %489  ;;  %798 = vrot.lane.b32.xlu1 %v4162_v48, %s3906_s30  ;;  %453 = vrot.lane.b32.xlu0 %v4108_v37, %s3901_s18 }
 0x1b7   : > { %v492_v55 = vpop.permute.xlu0 %491 }
 0x1b8   : > { %v494_v54 = vpop.permute.xlu1 %493  ;;  %847 = vrot.lane.b32.xlu1 %v4168_v50, %s3906_s30  ;;  %455 = vrot.lane.b32.xlu0 %v4118_v44, %s3901_s18 }
 0x1bb   : > { %v4185_v57 = vpop.permute.xlu0 %495 }
 0x1bc   : > { %v4183_v56 = vpop.permute.xlu1 %497  ;;  %896 = vrot.lane.b32.xlu1 %v4173_v53, %s3906_s30  ;;  %457 = vrot.lane.b32.xlu0 %v4110_v38, %s3901_s18 }
 0x1bf   : > { %v504_v58 = vpop.permute.xlu0 %503 }
 0x1c0   : > { %v4191_v59 = vpop.permute.xlu1 %499  ;;  %v510_v60 = vsel %vm505_vm2, %v504_v58, 0  ;;  %945 = vrot.lane.b32.xlu1 %v490_v52, %s3906_s30  ;;  %459 = vrot.lane.b32.xlu0 %v4116_v43, %s3903_s20 }
 0x1c1   : > { %3278 = vmatpush3.bf16.xpose.msra.mxu1 %v510_v60 }
 0x1c2   : > { %3283 = vmatprep.subr.bf16.mxu1 %v3902_v47 }
 0x1c3   : > { %v4198_v61 = vpop.permute.xlu0 %501 }
 0x1c4   : > { %994 = vrot.lane.b32.xlu1 %v492_v55, %s3906_s30  ;;  %461 = vrot.lane.b32.xlu0 %v4108_v37, %s3903_s20  ;;  %v554_v62 = vpop.permute.xlu1 %553 }
 0x1c5   : > { %v559_v1 = vsel %vm505_vm2, %v554_v62, 0 }
 0x1c7   : > { %v603_v63 = vpop.permute.xlu0 %602 }
 0x1c8   : > { %v608_v0 = vsel %vm505_vm2, %v603_v63, 0  ;;  %1043 = vrot.lane.b32.xlu1 %v494_v54, %s3906_s30  ;;  %463 = vrot.lane.b32.xlu0 %v4118_v44, %s3903_s20  ;;  %v652_v2 = vpop.permute.xlu1 %651 }
 0x1c9   : > { %3280 = vmatmul.mubr.msk.bf16.vlgmr.msra.gmra.mxu1 %vm505_vm2, %v4116_v43  ;;  %3290 = vmatpush3.bf16.xpose.msra.mxu0 %v608_v0  ;;  %v657_v3 = vsel %vm505_vm2, %v652_v2, 0 }
 0x1ca   : > { %3284 = vmatpush3.bf16.xpose.msra.mxu1 %v559_v1  ;;  %3285 = vmatprep.mubr.msk.bf16.mxu1 %vm3904_vm1, %v3902_v47 }
 0x1cb   : > { %3295 = vmatprep.subr.bf16.mxu1 %v3902_v47  ;;  %3301 = vmatprep.subr.bf16.mxu0 %v3902_v47 }
 0x1cc   : > { %1092 = vrot.lane.b32.xlu1 %v4185_v57, %s3906_s30  ;;  %465 = vrot.lane.b32.xlu0 %v4110_v38, %s3903_s20  ;;  %s4823_s20 = scalar_lea.hbm %s4877_s6, %s3109_s12 }
 0x1d0   : > { %1141 = vrot.lane.b32.xlu1 %v4183_v56, %s3906_s30  ;;  %3292 = vmatmul.mubr.msk.bf16.vlgmr.msra.gmra.mxu0 %vm505_vm2, %v4118_v44 }
 0x1d1   : > { %467 = vrot.lane.b32.xlu0 %v4116_v43, %s3905_s26  ;;  %3286 = vmatmul.mubr.msk.bf16.vlgmr.msra.gmra.mxu1 %vm505_vm2, %v4108_v37 }
 0x1d2   : > { %3296 = vmatpush3.bf16.xpose.msra.mxu1 %v657_v3  ;;  %3297 = vmatprep.mubr.msk.bf16.mxu1 %vm3904_vm1, %v3902_v47 }
 0x1d3   : > { %3307 = vmatprep.subr.bf16.mxu1 %v3902_v47  ;;  %3303 = vmatprep.mubr.msk.bf16.mxu0 %vm3904_vm1, %v3902_v47 }
 0x1d4   : > { %1190 = vrot.lane.b32.xlu1 %v4191_v59, %s3906_s30 }
 0x1d5   : > { %469 = vrot.lane.b32.xlu0 %v4108_v37, %s3905_s26 }
 0x1d8   : > { %1239 = vrot.lane.b32.xlu1 %v4198_v61, %s3906_s30  ;;  %s3911_s30 = smov [#allocation11]  }
 0x1d9   : > { %471 = vrot.lane.b32.xlu0 %v4118_v44, %s3905_s26  ;;  %3298 = vmatmul.mubr.msk.bf16.vlgmr.msra.gmra.mxu1 %vm505_vm2, %v4110_v38 }
 0x1da   : > { %3309 = vmatprep.mubr.msk.bf16.mxu1 %vm3904_vm1, %v3902_v47 }
 0x1dc   : > { %473 = vrot.lane.b32.xlu1 %v4110_v38, %s3905_s26  ;;  %s3819_s26 = scalar_lea.vmem %s4826_s27, 1024 }
 0x1dd   : > { %1800 = vrot.lane.b32.xlu0 %v4124_v45, %s3907_s15  ;;  %p3820_p4 = scmp.ne.s32.totalorder %s4826_s27, %s3819_s26 }
 0x1df   : > { %p3821_p12 = pnand %p3820_p4, %p4895_p6 }
 0x1e0   : > { %1753 = vrot.lane.b32.xlu1 %v4112_v40, %s3907_s15 }
 0x1e1   : > { %1894 = vrot.lane.b32.xlu0 %v4126_v46, %s3907_s15  ;;  %v3175_v46 = vld [vmem:[#allocation8 + $0x10] sm:$0xff]   ;;  %p3822_p0 = pneg %p3821_p12 }
 0x1e2   : > { %v3121_v62 = vunpack.c.h.bf16 %v3175_v46 }
 0x1e4   : > { %1847 = vrot.lane.b32.xlu1 %v4114_v42, %s3907_s15  ;;  %v3111_v42 = vld [vmem:[#allocation8] sm:$0xff]  }
 0x1e5   : > { %1988 = vrot.lane.b32.xlu0 %v482_v51, %s3907_s15  ;;  %v3112_v43 = vunpack.c.l.bf16 %v3111_v42  ;;  %v3120_v51 = vunpack.c.l.bf16 %v3175_v46 }
 0x1e8   : > { %2270 = vrot.lane.b32.xlu1 %v494_v54, %s3907_s15  ;;  %v3174_v54 = vld [vmem:[#allocation8 + $0x8] sm:$0xff]  }
 0x1e9   : > { %2082 = vrot.lane.b32.xlu0 %v4168_v50, %s3907_s15  ;;  %v3116_v1 = vunpack.c.l.bf16 %v3174_v54 }
 0x1ec   : > { %1941 = vrot.lane.b32.xlu1 %v4164_v49, %s3907_s15 }
 0x1ed   : > { %2176 = vrot.lane.b32.xlu0 %v490_v52, %s3907_s15  ;;  %v3113_v52 = vunpack.c.h.bf16 %v3111_v42 }
 0x1f0   : > { %2035 = vrot.lane.b32.xlu1 %v4162_v48, %s3907_s15 }
 0x1f4   : > { %2129 = vrot.lane.b32.xlu1 %v4173_v53, %s3907_s15 }
 0x1f8   : > { %2223 = vrot.lane.b32.xlu1 %v492_v55, %s3907_s15 }
 0x21e   : > { %v701_v4 = vpop.permute.xlu0 %700 }
 0x21f   : > { %v706_v5 = vsel %vm505_vm2, %v701_v4, 0  ;;  %v3176_v4 = vld [vmem:[#allocation8 + $0x18] sm:$0xff]  }
 0x220   : > { %3302 = vmatpush3.bf16.xpose.msra.mxu0 %v706_v5 }
 0x221   : > { %3313 = vmatprep.subr.bf16.mxu0 %v3902_v47 }
 0x222   : > { %v750_v6 = vpop.permute.xlu1 %749  ;;  %v452_v7 = vpop.permute.xlu0 %451 }
 0x223   : > { %v755_v8 = vsel %vm505_vm2, %v750_v6, 0 }
 0x224   : > { %3308 = vmatpush3.bf16.xpose.msra.mxu1 %v755_v8 }
 0x225   : > { %3319 = vmatprep.subr.bf16.mxu1 %v3902_v47 }
 0x226   : > { %v799_v9 = vpop.permute.xlu1 %798  ;;  %v454_v10 = vpop.permute.xlu0 %453 }
 0x227   : > { %v804_v11 = vsel %vm505_vm2, %v799_v9, 0  ;;  %3304 = vmatmul.mubr.msk.bf16.vlgmr.msra.gmra.mxu0 %vm505_vm2, %v452_v7  ;;  %v3124_v9 = vunpack.c.l.bf16 %v3176_v4 }
 0x228   : > { %3314 = vmatpush3.bf16.xpose.msra.mxu0 %v804_v11  ;;  %3315 = vmatprep.mubr.msk.bf16.mxu0 %vm3904_vm1, %v3902_v47  ;;  %v3117_v11 = vunpack.c.h.bf16 %v3174_v54 }
 0x229   : > { %3325 = vmatprep.subr.bf16.mxu0 %v3902_v47 }
 0x22a   : > { %v848_v12 = vpop.permute.xlu1 %847  ;;  %v456_v13 = vpop.permute.xlu0 %455 }
 0x22b   : > { %v853_v14 = vsel %vm505_vm2, %v848_v12, 0  ;;  %3310 = vmatmul.mubr.msk.bf16.vlgmr.msra.gmra.mxu1 %vm505_vm2, %v454_v10 }
 0x22c   : > { %3320 = vmatpush3.bf16.xpose.msra.mxu1 %v853_v14  ;;  %3321 = vmatprep.mubr.msk.bf16.mxu1 %vm3904_vm1, %v3902_v47 }
 0x22d   : > { %3331 = vmatprep.subr.bf16.mxu1 %v3902_v47 }
 0x22e   : > { %v897_v15 = vpop.permute.xlu1 %896  ;;  %v458_v16 = vpop.permute.xlu0 %457 }
 0x22f   : > { %v902_v17 = vsel %vm505_vm2, %v897_v15, 0  ;;  %3316 = vmatmul.mubr.msk.bf16.vlgmr.msra.gmra.mxu0 %vm505_vm2, %v456_v13 }
 0x230   : > { %3326 = vmatpush3.bf16.xpose.msra.mxu0 %v902_v17  ;;  %3327 = vmatprep.mubr.msk.bf16.mxu0 %vm3904_vm1, %v3902_v47 }
 0x231   : > { %3337 = vmatprep.subr.bf16.mxu0 %v3902_v47 }
 0x232   : > { %v946_v18 = vpop.permute.xlu1 %945  ;;  %v460_v19 = vpop.permute.xlu0 %459 }
 0x233   : > { %v951_v20 = vsel %vm505_vm2, %v946_v18, 0  ;;  %3322 = vmatmul.mubr.msk.bf16.vlgmr.msra.gmra.mxu1 %vm505_vm2, %v458_v16 }
 0x234   : > { %3332 = vmatpush3.bf16.xpose.msra.mxu1 %v951_v20  ;;  %3333 = vmatprep.mubr.msk.bf16.mxu1 %vm3904_vm1, %v3902_v47  ;;  %v3125_v20 = vunpack.c.h.bf16 %v3176_v4  ;;  %v3182_v4 = vld [vmem:[#allocation8 + $0x48] sm:$0xff]  }
 0x235   : > { %3343 = vmatprep.subr.bf16.mxu1 %v3902_v47 }
 0x236   : > { %v995_v21 = vpop.permute.xlu1 %994  ;;  %v462_v22 = vpop.permute.xlu0 %461 }
 0x237   : > { %v1000_v23 = vsel %vm505_vm2, %v995_v21, 0  ;;  %3328 = vmatmul.mubr.msk.bf16.vlgmr.msra.gmra.mxu0 %vm505_vm2, %v460_v19 }
 0x238   : > { %3338 = vmatpush3.bf16.xpose.msra.mxu0 %v1000_v23  ;;  %3339 = vmatprep.mubr.msk.bf16.mxu0 %vm3904_vm1, %v3902_v47 }
 0x239   : > { %3349 = vmatprep.subr.bf16.mxu0 %v3902_v47 }
 0x23a   : > { %v1044_v24 = vpop.permute.xlu1 %1043  ;;  %v464_v25 = vpop.permute.xlu0 %463 }
 0x23b   : > { %v1049_v26 = vsel %vm505_vm2, %v1044_v24, 0  ;;  %3334 = vmatmul.mubr.msk.bf16.vlgmr.msra.gmra.mxu1 %vm505_vm2, %v462_v22 }
 0x23c   : > { %3344 = vmatpush3.bf16.xpose.msra.mxu1 %v1049_v26  ;;  %3345 = vmatprep.mubr.msk.bf16.mxu1 %vm3904_vm1, %v3902_v47 }
 0x23d   : > { %3355 = vmatprep.subr.bf16.mxu1 %v3902_v47 }
 0x23e   : > { %v1093_v27 = vpop.permute.xlu1 %1092  ;;  %v466_v28 = vpop.permute.xlu0 %465 }
 0x23f   : > { %v1098_v29 = vsel %vm505_vm2, %v1093_v27, 0  ;;  %3340 = vmatmul.mubr.msk.bf16.vlgmr.msra.gmra.mxu0 %vm505_vm2, %v464_v25  ;;  %v3178_v27 = vld [vmem:[#allocation8 + $0x28] sm:$0xff]  }
 0x240   : > { %3350 = vmatpush3.bf16.xpose.msra.mxu0 %v1098_v29  ;;  %3351 = vmatprep.mubr.msk.bf16.mxu0 %vm3904_vm1, %v3902_v47  ;;  %v3177_v29 = vld [vmem:[#allocation8 + $0x20] sm:$0xff]  }
 0x241   : > { %3361 = vmatprep.subr.bf16.mxu0 %v3902_v47 }
 0x242   : > { %v1142_v30 = vpop.permute.xlu1 %1141 }
 0x243   : > { %v1147_v31 = vsel %vm505_vm2, %v1142_v30, 0  ;;  %v468_v32 = vpop.permute.xlu0 %467  ;;  %3346 = vmatmul.mubr.msk.bf16.vlgmr.msra.gmra.mxu1 %vm505_vm2, %v466_v28  ;;  %v3132_v30 = vunpack.c.l.bf16 %v3178_v27 }
 0x244   : > { %3356 = vmatpush3.bf16.xpose.msra.mxu1 %v1147_v31  ;;  %3357 = vmatprep.mubr.msk.bf16.mxu1 %vm3904_vm1, %v3902_v47 }
 0x245   : > { %3367 = vmatprep.subr.bf16.mxu1 %v3902_v47 }
 0x246   : > { %v1191_v33 = vpop.permute.xlu1 %1190 }
 0x247   : > { %v1196_v34 = vsel %vm505_vm2, %v1191_v33, 0  ;;  %v470_v35 = vpop.permute.xlu0 %469  ;;  %3352 = vmatmul.mubr.msk.bf16.vlgmr.msra.gmra.mxu0 %vm505_vm2, %v468_v32  ;;  %v3128_v32 = vunpack.c.l.bf16 %v3177_v29 }
 0x248   : > { %3362 = vmatpush3.bf16.xpose.msra.mxu0 %v1196_v34  ;;  %3363 = vmatprep.mubr.msk.bf16.mxu0 %vm3904_vm1, %v3902_v47 }
 0x249   : > { %3373 = vmatprep.subr.bf16.mxu0 %v3902_v47 }
 0x24a   : > { %v1240_v36 = vpop.permute.xlu1 %1239 }
 0x24b   : > { %v1245_v37 = vsel %vm505_vm2, %v1240_v36, 0  ;;  %3358 = vmatmul.mubr.msk.bf16.vlgmr.msra.gmra.mxu1 %vm505_vm2, %v470_v35  ;;  %v472_v38 = vpop.permute.xlu0 %471  ;;  %v3133_v36 = vunpack.c.h.bf16 %v3178_v27 }
 0x24c   : > { %3368 = vmatpush3.bf16.xpose.msra.mxu1 %v1245_v37  ;;  %3369 = vmatprep.mubr.msk.bf16.mxu1 %vm3904_vm1, %v3902_v47 }
 0x24d   : > { %3379 = vmatprep.subr.bf16.mxu1 %v3902_v47 }
 0x24e   : > { %v474_v39 = vpop.permute.xlu1 %473 }
 0x24f   : > { %3364 = vmatmul.mubr.msk.bf16.vlgmr.msra.gmra.mxu0 %vm505_vm2, %v472_v38  ;;  %v1801_v41 = vpop.permute.xlu0 %1800 }
 0x250   : > { %3375 = vmatprep.mubr.msk.bf16.mxu0 %vm3904_vm1, %v3902_v47 }
 0x252   : > { %v1754_v40 = vpop.permute.xlu1 %1753 }
 0x253   : > { %3370 = vmatmul.mubr.msk.bf16.vlgmr.msra.gmra.mxu1 %vm505_vm2, %v474_v39  ;;  %3374 = vmatpush3.bf16.msra.mxu0 %v1754_v40  ;;  %v3180_v39 = vld [vmem:[#allocation8 + $0x38] sm:$0xff]  }
 0x254   : > { %3380 = vmatpush3.bf16.msra.mxu1 %v1801_v41  ;;  %3385 = vmatprep.subr.bf16.mxu0 %v3902_v47  ;;  %v3129_v41 = vunpack.c.h.bf16 %v3177_v29  ;;  %v3149_v29 = vunpack.c.h.bf16 %v3182_v4 }
 0x255   : > { %3381 = vmatprep.mubr.msk.bf16.mxu1 %vm3904_vm1, %v3902_v47  ;;  %3391 = vmatprep.subr.bf16.mxu1 %v3902_v47 }
 0x289   : > { %v546_v44 = vpop.f32.mrf.mxu1 }
 0x28a   : > { %v4328_v45 = vadd.f32 %v3112_v43, %v546_v44  ;;  %v3179_v44 = vld [vmem:[#allocation8 + $0x30] sm:$0xff]  }
 0x28b   : > { %v3281_v48 = vpop.f32.mrf.mxu1 }
 0x28c   : > { %v1385_v49 = vsel %vm1384_vm3, %v4328_v45, -inf }
 0x28d   : > { %1386 = vmax.xlane.f32.xlu0 %v1385_v49  ;;  %v549_v50 = vpop.f32.mrf.mxu1  ;;  %v3140_v49 = vunpack.c.l.bf16 %v3180_v39 }
 0x28e   : > { %v4334_v0 = vadd.f32 %v3113_v52, %v549_v50 }
 0x28f   : > { %v3282_v53 = vpop.f32.mrf.mxu1 }
 0x290   : > { %v644_v55 = vpop.f32.mrf.mxu0  ;;  %v1388_v14 = vsel %vm1384_vm3, %v4334_v0, -inf  ;;  %v3136_v53 = vunpack.c.l.bf16 %v3179_v44 }
 0x291   : > { %v595_v58 = vpop.f32.mrf.mxu1  ;;  %v4332_v60 = vadd.f32 %v3120_v51, %v644_v55 }
 0x292   : > { %v3293_v63 = vpop.f32.mrf.mxu0  ;;  %v4340_v10 = vadd.f32 %v3116_v1, %v595_v58  ;;  %v3141_v1 = vunpack.c.h.bf16 %v3180_v39  ;;  %v3183_v39 = vld [vmem:[#allocation8 + $0x50] sm:$0xff]  }
 0x293   : > { %v3287_v2 = vpop.f32.mrf.mxu1  ;;  %v1397_v3 = vsel %vm1384_vm3, %v4332_v60, -inf }
 0x294   : > { %1398 = vmax.xlane.f32.xlu1 %v1397_v3  ;;  %v647_v5 = vpop.f32.mrf.mxu0  ;;  %v1391_v19 = vsel %vm1384_vm3, %v4340_v10, -inf }
 0x295   : > { %v598_v6 = vpop.f32.mrf.mxu1  ;;  %v4338_v7 = vadd.f32 %v3121_v62, %v647_v5 }
 0x296   : > { %v3294_v8 = vpop.f32.mrf.mxu0  ;;  %v4348_v17 = vadd.f32 %v3117_v11, %v598_v6  ;;  %v3137_v6 = vunpack.c.h.bf16 %v3179_v44 }
 0x297   : > { %v3288_v12 = vpop.f32.mrf.mxu1  ;;  %v1400_v13 = vsel %vm1384_vm3, %v4338_v7, -inf }
 0x298   : > { %1401 = vmax.xlane.f32.xlu0 %v1400_v13  ;;  %1389 = vmax.xlane.f32.xlu1 %v1388_v14  ;;  %v1394_v25 = vsel %vm1384_vm3, %v4348_v17, -inf  ;;  %v3181_v12 = vld [vmem:[#allocation8 + $0x40] sm:$0xff]  }
 0x299   : > { %v693_v15 = vpop.f32.mrf.mxu1 }
 0x29a   : > { %v4346_v16 = vadd.f32 %v3124_v9, %v693_v15  ;;  %v3148_v15 = vunpack.c.l.bf16 %v3182_v4 }
 0x29b   : > { %v3299_v18 = vpop.f32.mrf.mxu1 }
 0x29c   : > { %1392 = vmax.xlane.f32.xlu0 %v1391_v19  ;;  %v1403_v21 = vsel %vm1384_vm3, %v4346_v16, -inf }
 0x29d   : > { %1404 = vmax.xlane.f32.xlu1 %v1403_v21  ;;  %v696_v22 = vpop.f32.mrf.mxu1 }
 0x29e   : > { %v4354_v23 = vadd.f32 %v3125_v20, %v696_v22  ;;  %v4384_v20 = vpop.permute.xlu1 %1847  ;;  %v3144_v22 = vunpack.c.l.bf16 %v3181_v12 }
 0x29f   : > { %v3300_v24 = vpop.f32.mrf.mxu1 }
 0x2a0   : > { %1395 = vmax.xlane.f32.xlu0 %v1394_v25  ;;  %v1406_v26 = vsel %vm1384_vm3, %v4354_v23, -inf }
 0x2a4   : > { %1407 = vmax.xlane.f32.xlu0 %v1406_v26 }
 0x2e7   : > { %v742_v28 = vpop.f32.mrf.mxu0 }
 0x2e8   : > { %v4362_v40 = vadd.f32 %v3128_v32, %v742_v28  ;;  %v3184_v32 = vld [vmem:[#allocation8 + $0x58] sm:$0xff]  }
 0x2e9   : > { %v3305_v31 = vpop.f32.mrf.mxu0 }
 0x2ea   : > { %v1409_v54 = vsel %vm1384_vm3, %v4362_v40, -inf }
 0x2eb   : > { %v745_v33 = vpop.f32.mrf.mxu0  ;;  %v791_v34 = vpop.f32.mrf.mxu1 }
 0x2ec   : > { %v4360_v35 = vadd.f32 %v3132_v30, %v791_v34  ;;  %v4368_v52 = vadd.f32 %v3129_v41, %v745_v33  ;;  %v3145_v34 = vunpack.c.h.bf16 %v3181_v12  ;;  %v3153_v12 = vunpack.c.h.bf16 %v3183_v39 }
 0x2ed   : > { %v3306_v37 = vpop.f32.mrf.mxu0  ;;  %v3311_v38 = vpop.f32.mrf.mxu1 }
 0x2ee   : > { %v1415_v42 = vsel %vm1384_vm3, %v4360_v35, -inf  ;;  %v1412_v8 = vsel %vm1384_vm3, %v4368_v52, -inf }
 0x2ef   : > { %v840_v43 = vpop.f32.mrf.mxu0  ;;  %1416 = vmax.xlane.f32.xlu1 %v1415_v42  ;;  %v794_v46 = vpop.f32.mrf.mxu1 }
 0x2f0   : > { %v4366_v48 = vadd.f32 %v3133_v36, %v794_v46  ;;  %v4376_v5 = vadd.f32 %v3136_v53, %v840_v43  ;;  %v4400_v42 = vpop.permute.xlu0 %1894  ;;  %v4402_v43 = vpop.permute.xlu1 %2270  ;;  %v3156_v46 = vunpack.c.l.bf16 %v3184_v32  ;;  %v3152_v53 = vunpack.c.l.bf16 %v3183_v39 }
 0x2f1   : > { %v3312_v50 = vpop.f32.mrf.mxu1  ;;  %v3317_v51 = vpop.f32.mrf.mxu0 }
 0x2f2   : > { %v1418_v55 = vsel %vm1384_vm3, %v4366_v48, -inf  ;;  %v1421_v24 = vsel %vm1384_vm3, %v4376_v5, -inf }
 0x2f3   : > { %v843_v58 = vpop.f32.mrf.mxu0  ;;  %1410 = vmax.xlane.f32.xlu1 %v1409_v54  ;;  %1419 = vmax.xlane.f32.xlu0 %v1418_v55  ;;  %v889_v62 = vpop.f32.mrf.mxu1 }
 0x2f4   : > { %v4374_v63 = vadd.f32 %v3140_v49, %v889_v62  ;;  %v4386_v21 = vadd.f32 %v3137_v6, %v843_v58  ;;  %v3186_v6 = vld [vmem:[#allocation8 + $0x68] sm:$0xff]  }
 0x2f5   : > { %v3318_v2 = vpop.f32.mrf.mxu0  ;;  %v3323_v3 = vpop.f32.mrf.mxu1 }
 0x2f6   : > { %v1427_v9 = vsel %vm1384_vm3, %v4374_v63, -inf  ;;  %v1424_v36 = vsel %vm1384_vm3, %v4386_v21, -inf  ;;  %v3157_v2 = vunpack.c.h.bf16 %v3184_v32 }
 0x2f7   : > { %v938_v11 = vpop.f32.mrf.mxu0  ;;  %1413 = vmax.xlane.f32.xlu0 %v1412_v8  ;;  %1428 = vmax.xlane.f32.xlu1 %v1427_v9  ;;  %v892_v13 = vpop.f32.mrf.mxu1 }
 0x2f8   : > { %v4382_v14 = vadd.f32 %v3141_v1, %v892_v13  ;;  %v4394_v33 = vadd.f32 %v3144_v22, %v938_v11  ;;  %v4414_v8 = vpop.permute.xlu0 %1988  ;;  %v4416_v9 = vpop.permute.xlu1 %1941 }
 0x2f9   : > { %v3324_v18 = vpop.f32.mrf.mxu1  ;;  %v3329_v19 = vpop.f32.mrf.mxu0 }
 0x2fa   : > { %v1430_v25 = vsel %vm1384_vm3, %v4382_v14, -inf  ;;  %v1433_v54 = vsel %vm1384_vm3, %v4394_v33, -inf  ;;  %v3185_v19 = vld [vmem:[#allocation8 + $0x60] sm:$0xff]  }
 0x2fb   : > { %v941_v26 = vpop.f32.mrf.mxu0  ;;  %1422 = vmax.xlane.f32.xlu1 %v1421_v24  ;;  %1431 = vmax.xlane.f32.xlu0 %v1430_v25  ;;  %v987_v27 = vpop.f32.mrf.mxu1  ;;  %v3164_v25 = vunpack.c.l.bf16 %v3186_v6 }
 0x2fc   : > { %v4392_v28 = vadd.f32 %v3148_v15, %v987_v27  ;;  %v4406_v51 = vadd.f32 %v3145_v34, %v941_v26 }
 0x2fd   : > { %v3330_v30 = vpop.f32.mrf.mxu0  ;;  %v3335_v31 = vpop.f32.mrf.mxu1 }
 0x2fe   : > { %v1439_v37 = vsel %vm1384_vm3, %v4392_v28, -inf  ;;  %v1436_v13 = vsel %vm1384_vm3, %v4406_v51, -inf  ;;  %v3160_v30 = vunpack.c.l.bf16 %v3185_v19 }
 0x2ff   : > { %v1036_v38 = vpop.f32.mrf.mxu0  ;;  %1425 = vmax.xlane.f32.xlu0 %v1424_v36  ;;  %1440 = vmax.xlane.f32.xlu1 %v1439_v37  ;;  %v990_v41 = vpop.f32.mrf.mxu1 }
 0x300   : > { %v4404_v44 = vadd.f32 %v3149_v29, %v990_v41  ;;  %v4418_v11 = vadd.f32 %v3152_v53, %v1036_v38  ;;  %v4432_v37 = vpop.permute.xlu0 %2082  ;;  %v4434_v38 = vpop.permute.xlu1 %2035  ;;  %v3165_v41 = vunpack.c.h.bf16 %v3186_v6 }
 0x301   : > { %v3336_v49 = vpop.f32.mrf.mxu1  ;;  %v3341_v50 = vpop.f32.mrf.mxu0 }
 0x302   : > { %v1442_v55 = vsel %vm1384_vm3, %v4404_v44, -inf  ;;  %v1445_v31 = vsel %vm1384_vm3, %v4418_v11, -inf  ;;  %v3188_v50 = vld [vmem:[#allocation8 + $0x78] sm:$0xff]  }
 0x303   : > { %v1039_v58 = vpop.f32.mrf.mxu0  ;;  %1434 = vmax.xlane.f32.xlu1 %v1433_v54  ;;  %1443 = vmax.xlane.f32.xlu0 %v1442_v55  ;;  %v1085_v62 = vpop.f32.mrf.mxu1  ;;  %v3161_v54 = vunpack.c.h.bf16 %v3185_v19  ;;  %v3172_v6 = vunpack.c.l.bf16 %v3188_v50 }
 0x304   : > { %v4412_v1 = vadd.f32 %v3156_v46, %v1085_v62  ;;  %v4426_v29 = vadd.f32 %v3153_v12, %v1039_v58 }
 0x305   : > { %v3342_v3 = vpop.f32.mrf.mxu0  ;;  %v3347_v4 = vpop.f32.mrf.mxu1 }
 0x306   : > { %v1451_v15 = vsel %vm1384_vm3, %v4412_v1, -inf  ;;  %v1448_v55 = vsel %vm1384_vm3, %v4426_v29, -inf }
 0x307   : > { %v1134_v18 = vpop.f32.mrf.mxu0  ;;  %1437 = vmax.xlane.f32.xlu0 %v1436_v13  ;;  %1452 = vmax.xlane.f32.xlu1 %v1451_v15  ;;  %v1088_v22 = vpop.f32.mrf.mxu1 }
 0x308   : > { %v4424_v24 = vadd.f32 %v3157_v2, %v1088_v22  ;;  %v4438_v53 = vadd.f32 %v3160_v30, %v1134_v18  ;;  %v3187_v2 = vld [vmem:[#allocation8 + $0x70] sm:$0xff]   ;;  %v4446_v15 = vpop.permute.xlu0 %2176  ;;  %v4448_v18 = vpop.permute.xlu1 %2129 }
 0x309   : > { %v3348_v26 = vpop.f32.mrf.mxu1  ;;  %v3353_v27 = vpop.f32.mrf.mxu0  ;;  %v3168_v22 = vunpack.c.l.bf16 %v3187_v2 }
 0x30a   : > { %v1454_v32 = vsel %vm1384_vm3, %v4424_v24, -inf }
 0x30b   : > { %v1137_v34 = vpop.f32.mrf.mxu0  ;;  %1446 = vmax.xlane.f32.xlu1 %v1445_v31  ;;  %1455 = vmax.xlane.f32.xlu0 %v1454_v32  ;;  %v1183_v36 = vpop.f32.mrf.mxu1  ;;  %v3173_v32 = vunpack.c.h.bf16 %v3188_v50 }
 0x30c   : > { %v4436_v39 = vadd.f32 %v3164_v25, %v1183_v36  ;;  %v4450_v19 = vadd.f32 %v3161_v54, %v1137_v34  ;;  %v1457_v25 = vsel %vm1384_vm3, %v4438_v53, -inf  ;;  %v3169_v34 = vunpack.c.h.bf16 %v3187_v2  ;;  %v4467_v50 = vpop.permute.xlu1 %2223 }
 0x30d   : > { %v3354_v46 = vpop.f32.mrf.mxu0  ;;  %v3359_v49 = vpop.f32.mrf.mxu1 }
 0x30e   : > { %v1463_v58 = vsel %vm1384_vm3, %v4436_v39, -inf  ;;  %v1460_v54 = vsel %vm1384_vm3, %v4450_v19, -inf }
 0x30f   : > { %v1232_v62 = vpop.f32.mrf.mxu0  ;;  %1449 = vmax.xlane.f32.xlu0 %v1448_v55  ;;  %1464 = vmax.xlane.f32.xlu1 %v1463_v58  ;;  %v1186_v3 = vpop.f32.mrf.mxu1 }
 0x310   : > { %v4444_v4 = vadd.f32 %v3165_v41, %v1186_v3  ;;  %v4458_v46 = vadd.f32 %v3168_v22, %v1232_v62 }
 0x311   : > { %v3360_v12 = vpop.f32.mrf.mxu1  ;;  %v3365_v13 = vpop.f32.mrf.mxu0 }
 0x312   : > { %v1466_v26 = vsel %vm1384_vm3, %v4444_v4, -inf  ;;  %v1469_v2 = vsel %vm1384_vm3, %v4458_v46, -inf }
 0x313   : > { %v1235_v27 = vpop.f32.mrf.mxu0  ;;  %1458 = vmax.xlane.f32.xlu1 %v1457_v25  ;;  %1467 = vmax.xlane.f32.xlu0 %v1466_v26  ;;  %v1281_v30 = vpop.f32.mrf.mxu1 }
 0x314   : > { %v4456_v31 = vadd.f32 %v3172_v6, %v1281_v30  ;;  %v4469_v13 = vadd.f32 %v3169_v34, %v1235_v27 }
 0x315   : > { %v3366_v36 = vpop.f32.mrf.mxu0  ;;  %v3371_v41 = vpop.f32.mrf.mxu1 }
 0x316   : > { %v1387_v49 = vpop.xlane.xlu0 %1386  ;;  %v1475_v55 = vsel %vm1384_vm3, %v4456_v31, -inf  ;;  %v1472_v26 = vsel %vm1384_vm3, %v4469_v13, -inf }
 0x317   : > { %v1481_v58 = vsub.f32 %v4328_v45, %v1387_v49  ;;  %1461 = vmax.xlane.f32.xlu0 %v1460_v54  ;;  %1476 = vmax.xlane.f32.xlu1 %v1475_v55  ;;  %v1284_v3 = vpop.f32.mrf.mxu1 }
 0x318   : > { %v4465_v6 = vadd.f32 %v3173_v32, %v1284_v3 }
 0x319   : > { %v1513_v12 = vmul.f32 1.442695, %v1481_v58  ;;  %v3372_v62 = vpop.f32.mrf.mxu1 }
 0x31a   : > { %v1478_v22 = vsel %vm1384_vm3, %v4465_v6, -inf }
 0x31b   : > { %3585 = vpow2.f32 %v1513_v12  ;;  %1470 = vmax.xlane.f32.xlu1 %v1469_v2  ;;  %1479 = vmax.xlane.f32.xlu0 %v1478_v22 }
 0x31d   : > { %v1399_v45 = vpop.xlane.xlu1 %1398 }
 0x31e   : > { %v1485_v25 = vsub.f32 %v4332_v60, %v1399_v45 }
 0x31f   : > { %1473 = vmax.xlane.f32.xlu0 %v1472_v26 }
 0x320   : > { %v1521_v30 = vmul.f32 1.442695, %v1485_v25 }
 0x321   : > { %v1402_v34 = vpop.xlane.xlu0 %1401  ;;  %v1390_v60 = vpop.xlane.xlu1 %1389 }
 0x322   : > { %3587 = vpow2.f32 %v1521_v30  ;;  %v1482_v54 = vsub.f32 %v4334_v0, %v1390_v60  ;;  %v1486_v58 = vsub.f32 %v4338_v7, %v1402_v34 }
 0x324   : > { %v1515_v3 = vmul.f32 1.442695, %v1482_v54  ;;  %v1523_v12 = vmul.f32 1.442695, %v1486_v58 }
 0x325   : > { %v1393_v49 = vpop.xlane.xlu0 %1392 }
 0x326   : > { %3589 = vpow2.f32 %v1515_v3  ;;  %v1483_v0 = vsub.f32 %v4340_v10, %v1393_v49  ;;  %v1405_v25 = vpop.xlane.xlu1 %1404 }
 0x327   : > { %3591 = vpow2.f32 %v1523_v12 }
 0x328   : > { %v4478_v27 = vpop.eup %3585  ;;  %v1517_v26 = vmul.f32 1.442695, %v1483_v0 }
 0x329   : > { %v1577_v32 = vsel %vm1384_vm3, %v4478_v27, 0.0  ;;  %v1396_v55 = vpop.xlane.xlu0 %1395 }
 0x32a   : > { %1578 = vadd.xlane.f32.xlu1 %v1577_v32  ;;  %v1484_v62 = vsub.f32 %v4348_v17, %v1396_v55 }
 0x32c   : > { %v1519_v22 = vmul.f32 1.442695, %v1484_v62 }
 0x32d   : > { %v1408_v2 = vpop.xlane.xlu0 %1407 }
 0x32e   : > { %3593 = vpow2.f32 %v1519_v22 }
 0x32f   : > { %v4482_v36 = vpop.eup %3587 }
 0x330   : > { %v1589_v41 = vsel %vm1384_vm3, %v4482_v36, 0.0 }
 0x331   : > { %1590 = vadd.xlane.f32.xlu1 %v1589_v41 }
 0x333   : > { %v4495_v7 = vpop.eup %3589 }
 0x334   : > { %v1580_v30 = vsel %vm1384_vm3, %v4495_v7, 0.0  ;;  %v4500_v17 = vpop.eup %3591 }
 0x335   : > { %2317 = vrot.lane.b32.xlu0 %v4185_v57, %s3907_s15  ;;  %v1488_v57 = vsub.f32 %v4354_v23, %v1408_v2  ;;  %v1592_v23 = vsel %vm1384_vm3, %v4500_v17, 0.0 }
 0x337   : > { %v1527_v45 = vmul.f32 1.442695, %v1488_v57 }
 0x339   : > { %3595 = vpow2.f32 %v1527_v45 }
 0x33a   : > { %3597 = vpow2.f32 %v1517_v26 }
 0x33b   : > { %v4504_v41 = vpop.eup %3593 }
 0x33c   : > { %v1586_v10 = vsel %vm1384_vm3, %v4504_v41, 0.0 }
 0x342   : > { %2364 = vrot.lane.b32.xlu1 %v4183_v56, %s3907_s15  ;;  %v1487_v56 = vsub.f32 %v4346_v16, %v1405_v25 }
 0x344   : > { %v1525_v32 = vmul.f32 1.442695, %v1487_v56 }
 0x346   : > { %3599 = vpow2.f32 %v1525_v32  ;;  %v4508_v34 = vpop.eup %3595 }
 0x347   : > { %v1598_v16 = vsel %vm1384_vm3, %v4508_v34, 0.0  ;;  %v4512_v60 = vpop.eup %3597 }
 0x348   : > { %v1583_v49 = vsel %vm1384_vm3, %v4512_v60, 0.0 }
 0x353   : > { %v4516_v54 = vpop.eup %3599 }
 0x354   : > { %1581 = vadd.xlane.f32.xlu0 %v1580_v30  ;;  %v1595_v55 = vsel %vm1384_vm3, %v4516_v54, 0.0 }
 0x358   : > { %1593 = vadd.xlane.f32.xlu0 %v1592_v23 }
 0x35c   : > { %1587 = vadd.xlane.f32.xlu0 %v1586_v10 }
 0x360   : > { %1599 = vadd.xlane.f32.xlu0 %v1598_v16 }
 0x366   : > { %1584 = vadd.xlane.f32.xlu1 %v1583_v49 }
 0x36a   : > { %1596 = vadd.xlane.f32.xlu1 %v1595_v55 }
 0x378   : > { %v1417_v58 = vpop.xlane.xlu1 %1416 }
 0x379   : > { %v1491_v3 = vsub.f32 %v4360_v35, %v1417_v58 }
 0x37b   : > { %v1533_v12 = vmul.f32 1.442695, %v1491_v3 }
 0x37c   : > { %v1411_v62 = vpop.xlane.xlu1 %1410  ;;  %v1420_v2 = vpop.xlane.xlu0 %1419 }
 0x37d   : > { %3601 = vpow2.f32 %v1533_v12  ;;  %v1489_v22 = vsub.f32 %v4362_v40, %v1411_v62  ;;  %v1492_v57 = vsub.f32 %v4366_v48, %v1420_v2 }
 0x37f   : > { %v1529_v45 = vmul.f32 1.442695, %v1489_v22  ;;  %v1535_v0 = vmul.f32 1.442695, %v1492_v57 }
 0x380   : > { %v1414_v25 = vpop.xlane.xlu0 %1413  ;;  %v1429_v26 = vpop.xlane.xlu1 %1428 }
 0x381   : > { %3603 = vpow2.f32 %v1529_v45  ;;  %v1490_v56 = vsub.f32 %v4368_v52, %v1414_v25  ;;  %v1495_v30 = vsub.f32 %v4374_v63, %v1429_v26 }
 0x382   : > { %3605 = vpow2.f32 %v1535_v0 }
 0x383   : > { %v1531_v32 = vmul.f32 1.442695, %v1490_v56  ;;  %v1541_v35 = vmul.f32 1.442695, %v1495_v30 }
 0x384   : > { %v1423_v23 = vpop.xlane.xlu1 %1422  ;;  %v1432_v10 = vpop.xlane.xlu0 %1431 }
 0x385   : > { %3607 = vpow2.f32 %v1531_v32  ;;  %v1493_v16 = vsub.f32 %v4376_v5, %v1423_v23  ;;  %v1496_v40 = vsub.f32 %v4382_v14, %v1432_v10 }
 0x386   : > { %3609 = vpow2.f32 %v1541_v35 }
 0x387   : > { %v1537_v48 = vmul.f32 1.442695, %v1493_v16  ;;  %v1543_v49 = vmul.f32 1.442695, %v1496_v40 }
 0x388   : > { %v1426_v55 = vpop.xlane.xlu0 %1425  ;;  %v1441_v58 = vpop.xlane.xlu1 %1440 }
 0x389   : > { %3611 = vpow2.f32 %v1537_v48  ;;  %v1494_v52 = vsub.f32 %v4386_v21, %v1426_v55  ;;  %v1499_v63 = vsub.f32 %v4392_v28, %v1441_v58 }
 0x38a   : > { %v4529_v3 = vpop.eup %3601  ;;  %3613 = vpow2.f32 %v1543_v49 }
 0x38b   : > { %v1539_v12 = vmul.f32 1.442695, %v1494_v52  ;;  %v1549_v62 = vmul.f32 1.442695, %v1499_v63  ;;  %v1607_v5 = vsel %vm1384_vm3, %v4529_v3, 0.0 }
 0x38c   : > { %v1435_v2 = vpop.xlane.xlu1 %1434  ;;  %v1444_v14 = vpop.xlane.xlu0 %1443  ;;  %1608 = vadd.xlane.f32.xlu1 %v1607_v5 }
 0x38d   : > { %3615 = vpow2.f32 %v1539_v12  ;;  %v1497_v22 = vsub.f32 %v4394_v33, %v1435_v2  ;;  %v1500_v57 = vsub.f32 %v4404_v44, %v1444_v14 }
 0x38e   : > { %v4535_v45 = vpop.eup %3603  ;;  %3617 = vpow2.f32 %v1549_v62 }
 0x38f   : > { %v4537_v21 = vpop.eup %3605  ;;  %v1545_v28 = vmul.f32 1.442695, %v1497_v22  ;;  %v1551_v0 = vmul.f32 1.442695, %v1500_v57  ;;  %v1601_v25 = vsel %vm1384_vm3, %v4535_v45, 0.0 }
 0x390   : > { %v1438_v26 = vpop.xlane.xlu0 %1437  ;;  %v1453_v56 = vpop.xlane.xlu1 %1452  ;;  %1602 = vadd.xlane.f32.xlu1 %v1601_v25  ;;  %v1610_v30 = vsel %vm1384_vm3, %v4537_v21, 0.0 }
 0x391   : > { %3619 = vpow2.f32 %v1545_v28  ;;  %v1498_v33 = vsub.f32 %v4406_v51, %v1438_v26  ;;  %v1503_v44 = vsub.f32 %v4412_v1, %v1453_v56  ;;  %1611 = vadd.xlane.f32.xlu0 %v1610_v30 }
 0x392   : > { %v4545_v32 = vpop.eup %3607  ;;  %3621 = vpow2.f32 %v1551_v0 }
 0x393   : > { %v4547_v35 = vpop.eup %3609  ;;  %v1547_v23 = vmul.f32 1.442695, %v1498_v33  ;;  %v1557_v10 = vmul.f32 1.442695, %v1503_v44  ;;  %v1604_v16 = vsel %vm1384_vm3, %v4545_v32, 0.0 }
 0x394   : > { %v1447_v40 = vpop.xlane.xlu1 %1446  ;;  %v1456_v48 = vpop.xlane.xlu0 %1455  ;;  %v1619_v49 = vsel %vm1384_vm3, %v4547_v35, 0.0 }
 0x395   : > { %3623 = vpow2.f32 %v1547_v23  ;;  %v1501_v51 = vsub.f32 %v4418_v11, %v1447_v40  ;;  %v1504_v1 = vsub.f32 %v4424_v24, %v1456_v48  ;;  %1620 = vadd.xlane.f32.xlu1 %v1619_v49  ;;  %1605 = vadd.xlane.f32.xlu0 %v1604_v16 }
 0x396   : > { %v4555_v55 = vpop.eup %3611  ;;  %3625 = vpow2.f32 %v1557_v10 }
 0x397   : > { %v4557_v58 = vpop.eup %3613  ;;  %v1553_v52 = vmul.f32 1.442695, %v1501_v51  ;;  %v1559_v63 = vmul.f32 1.442695, %v1504_v1  ;;  %v1613_v12 = vsel %vm1384_vm3, %v4555_v55, 0.0 }
 0x398   : > { %v1450_v62 = vpop.xlane.xlu0 %1449  ;;  %v1465_v5 = vpop.xlane.xlu1 %1464  ;;  %v1622_v2 = vsel %vm1384_vm3, %v4557_v58, 0.0 }
 0x399   : > { %3627 = vpow2.f32 %v1553_v52  ;;  %v1502_v11 = vsub.f32 %v4426_v29, %v1450_v62  ;;  %v1507_v24 = vsub.f32 %v4436_v39, %v1465_v5  ;;  %1614 = vadd.xlane.f32.xlu1 %v1613_v12  ;;  %1623 = vadd.xlane.f32.xlu0 %v1622_v2 }
 0x39a   : > { %v4565_v14 = vpop.eup %3615  ;;  %3629 = vpow2.f32 %v1559_v63 }
 0x39b   : > { %v4567_v22 = vpop.eup %3617  ;;  %v1555_v57 = vmul.f32 1.442695, %v1502_v11  ;;  %v1565_v28 = vmul.f32 1.442695, %v1507_v24  ;;  %v1616_v0 = vsel %vm1384_vm3, %v4565_v14, 0.0 }
 0x39c   : > { %v1459_v25 = vpop.xlane.xlu1 %1458  ;;  %v1468_v26 = vpop.xlane.xlu0 %1467  ;;  %v1631_v56 = vsel %vm1384_vm3, %v4567_v22, 0.0 }
 0x39d   : > { %3631 = vpow2.f32 %v1555_v57  ;;  %v1505_v29 = vsub.f32 %v4438_v53, %v1459_v25  ;;  %v1508_v39 = vsub.f32 %v4444_v4, %v1468_v26  ;;  %1632 = vadd.xlane.f32.xlu1 %v1631_v56  ;;  %1617 = vadd.xlane.f32.xlu0 %v1616_v0 }
 0x39e   : > { %v4575_v30 = vpop.eup %3619  ;;  %3633 = vpow2.f32 %v1565_v28 }
 0x39f   : > { %v4577_v33 = vpop.eup %3621  ;;  %v1561_v44 = vmul.f32 1.442695, %v1505_v29  ;;  %v1567_v23 = vmul.f32 1.442695, %v1508_v39  ;;  %v1625_v10 = vsel %vm1384_vm3, %v4575_v30, 0.0 }
 0x3a0   : > { %v1462_v16 = vpop.xlane.xlu0 %1461  ;;  %v1477_v40 = vpop.xlane.xlu1 %1476  ;;  %v1634_v48 = vsel %vm1384_vm3, %v4577_v33, 0.0 }
 0x3a1   : > { %3635 = vpow2.f32 %v1561_v44  ;;  %v1506_v53 = vsub.f32 %v4450_v19, %v1462_v16  ;;  %1626 = vadd.xlane.f32.xlu1 %v1625_v10  ;;  %v1511_v4 = vsub.f32 %v4456_v31, %v1477_v40  ;;  %1635 = vadd.xlane.f32.xlu0 %v1634_v48 }
 0x3a2   : > { %v4585_v49 = vpop.eup %3623  ;;  %3637 = vpow2.f32 %v1567_v23 }
 0x3a3   : > { %v4587_v51 = vpop.eup %3625  ;;  %v1563_v1 = vmul.f32 1.442695, %v1506_v53  ;;  %v1573_v52 = vmul.f32 1.442695, %v1511_v4  ;;  %v1628_v63 = vsel %vm1384_vm3, %v4585_v49, 0.0 }
 0x3a4   : > { %v1643_v12 = vsel %vm1384_vm3, %v4587_v51, 0.0  ;;  %v1471_v62 = vpop.xlane.xlu1 %1470  ;;  %v1480_v5 = vpop.xlane.xlu0 %1479 }
 0x3a5   : > { %3639 = vpow2.f32 %v1563_v1  ;;  %1644 = vadd.xlane.f32.xlu1 %v1643_v12  ;;  %v1509_v19 = vsub.f32 %v4458_v46, %v1471_v62  ;;  %1629 = vadd.xlane.f32.xlu0 %v1628_v63  ;;  %v1512_v31 = vsub.f32 %v4465_v6, %v1480_v5 }
 0x3a6   : > { %v4595_v2 = vpop.eup %3627  ;;  %3641 = vpow2.f32 %v1573_v52 }
 0x3a7   : > { %v4597_v11 = vpop.eup %3629  ;;  %v1569_v24 = vmul.f32 1.442695, %v1509_v19  ;;  %v1575_v57 = vmul.f32 1.442695, %v1512_v31  ;;  %v1637_v28 = vsel %vm1384_vm3, %v4595_v2, 0.0 }
 0x3a8   : > { %v1646_v0 = vsel %vm1384_vm3, %v4597_v11, 0.0  ;;  %v1474_v25 = vpop.xlane.xlu0 %1473 }
 0x3a9   : > { %3643 = vpow2.f32 %v1569_v24  ;;  %1638 = vadd.xlane.f32.xlu1 %v1637_v28  ;;  %1647 = vadd.xlane.f32.xlu0 %v1646_v0  ;;  %v1510_v46 = vsub.f32 %v4469_v13, %v1474_v25 }
 0x3aa   : > { %v4604_v6 = vpop.eup %3631  ;;  %3645 = vpow2.f32 %v1575_v57 }
 0x3ab   : > { %v4606_v26 = vpop.eup %3633  ;;  %v1571_v56 = vmul.f32 1.442695, %v1510_v46  ;;  %v1640_v29 = vsel %vm1384_vm3, %v4604_v6, 0.0 }
 0x3ac   : > { %v1655_v39 = vsel %vm1384_vm3, %v4606_v26, 0.0  ;;  %v4644_v5 = vpop.permute.xlu0 %2317 }
 0x3ad   : > { %3647 = vpow2.f32 %v1571_v56  ;;  %1656 = vadd.xlane.f32.xlu1 %v1655_v39  ;;  %1641 = vadd.xlane.f32.xlu0 %v1640_v29 }
 0x3ae   : > { %v4612_v44 = vpop.eup %3635 }
 0x3af   : > { %v4614_v23 = vpop.eup %3637  ;;  %v1649_v13 = vsel %vm1384_vm3, %v4612_v44, 0.0 }
 0x3b0   : > { %v1658_v10 = vsel %vm1384_vm3, %v4614_v23, 0.0 }
 0x3b1   : > { %1650 = vadd.xlane.f32.xlu1 %v1649_v13  ;;  %1659 = vadd.xlane.f32.xlu0 %v1658_v10 }
 0x3b2   : > { %v4620_v16 = vpop.eup %3639 }
 0x3b3   : > { %v4622_v40 = vpop.eup %3641  ;;  %v1652_v48 = vsel %vm1384_vm3, %v4620_v16, 0.0  ;;  %v1579_v19 = vpop.xlane.xlu1 %1578 }
 0x3b4   : > { %v1667_v53 = vsel %vm1384_vm3, %v4622_v40, 0.0  ;;  %3649 = vrcp.f32 %v1579_v19 }
 0x3b5   : > { %1668 = vadd.xlane.f32.xlu1 %v1667_v53  ;;  %1653 = vadd.xlane.f32.xlu0 %v1652_v48 }
 0x3b6   : > { %v4628_v4 = vpop.eup %3643 }
 0x3b7   : > { %v4630_v1 = vpop.eup %3645  ;;  %v1661_v52 = vsel %vm1384_vm3, %v4628_v4, 0.0 }
 0x3b8   : > { %v1670_v63 = vsel %vm1384_vm3, %v4630_v1, 0.0 }
 0x3b9   : > { %1662 = vadd.xlane.f32.xlu1 %v1661_v52  ;;  %1671 = vadd.xlane.f32.xlu0 %v1670_v63 }
 0x3ba   : > { %v4636_v12 = vpop.eup %3647  ;;  %v1591_v24 = vpop.xlane.xlu1 %1590 }
 0x3bb   : > { %v1664_v62 = vsel %vm1384_vm3, %v4636_v12, 0.0 }
 0x3bd   : > { %1665 = vadd.xlane.f32.xlu0 %v1664_v62 }
 0x3be   : > { %v4646_v25 = vpop.permute.xlu1 %2364 }
 0x3c1   : > { %v3650_v28 = vpop.eup %3649 }
 0x3ca   : > { %2458 = vrot.lane.b32.xlu1 %v4198_v61, %s3907_s15  ;;  %v1705_v61 = vmul.f32 %v3650_v28, %v4478_v27 }
 0x3d3   : > { %2411 = vrot.lane.b32.xlu0 %v4191_v59, %s3907_s15  ;;  %s3823_s15 = sshll.u32 %s3911_s30, 4  ;;  %s3824_s15 = int_to_ptr.vmem [resolvable:$false] %s3823_s15 }
 0x3d4   : > { %p3826_p5 = scmp.lt.s32.totalorder %s4826_s27, %s3824_s15 }
 0x3dd   : > { %v1582_v31 = vpop.xlane.xlu0 %1581 }
 0x3de   : > { %3651 = vrcp.f32 %v1582_v31 }
 0x3e1   : > { %v1594_v57 = vpop.xlane.xlu0 %1593 }
 0x3e2   : > { %3653 = vrcp.f32 %v1594_v57 }
 0x3e3   : > { %3655 = vrcp.f32 %v1591_v24 }
 0x3e5   : > { %v1588_v46 = vpop.xlane.xlu0 %1587 }
 0x3e6   : > { %3657 = vrcp.f32 %v1588_v46 }
 0x3e9   : > { %v1600_v27 = vpop.xlane.xlu0 %1599 }
 0x3eb   : > { %v3652_v0 = vpop.eup %3651 }
 0x3ec   : > { %v1706_v56 = vmul.f32 %v3652_v0, %v4495_v7 }
 0x3ee   : > { %v1737_v59 = vpack.c.bf16 %v1706_v56, %v1705_v61 }
 0x3ef   : > { %v3654_v29 = vpop.eup %3653  ;;  %v1585_v39 = vpop.xlane.xlu1 %1584 }
 0x3f0   : > { %3659 = vrcp.f32 %v1585_v39  ;;  %3376 = vmatmul.mubr.msk.bf16.vlgmr.msra.gmra.mxu0 %vm1384_vm3, %v1737_v59  ;;  %v3656_v13 = vpop.eup %3655  ;;  %v1710_v10 = vmul.f32 %v3654_v29, %v4500_v17 }
 0x3f1   : > { %3386 = vmatpush3.bf16.msra.mxu0 %v4384_v20  ;;  %3387 = vmatprep.mubr.msk.bf16.mxu0 %vm3904_vm1, %v3902_v47  ;;  %v1709_v7 = vmul.f32 %v3656_v13, %v4482_v36 }
 0x3f2   : > { %3397 = vmatprep.subr.bf16.mxu0 %v3902_v47 }
 0x3f3   : > { %v1597_v48 = vpop.xlane.xlu1 %1596  ;;  %v1739_v53 = vpack.c.bf16 %v1710_v10, %v1709_v7  ;;  %v3658_v20 = vpop.eup %3657 }
 0x3f4   : > { %3661 = vrcp.f32 %v1597_v48  ;;  %v1708_v63 = vmul.f32 %v3658_v20, %v4504_v41 }
 0x3f5   : > { %3663 = vrcp.f32 %v1600_v27 }
 0x3f8   : > { %3388 = vmatmul.mubr.msk.bf16.vlgmr.msra.gmra.mxu0 %vm1384_vm3, %v1739_v53 }
 0x3f9   : > { %3398 = vmatpush3.bf16.msra.mxu0 %v4416_v9  ;;  %3399 = vmatprep.mubr.msk.bf16.mxu0 %vm3904_vm1, %v3902_v47 }
 0x3fa   : > { %3409 = vmatprep.subr.bf16.mxu0 %v3902_v47 }
 0x3fd   : > { %v3660_v52 = vpop.eup %3659 }
 0x3fe   : > { %v1707_v17 = vmul.f32 %v3660_v52, %v4512_v60 }
 0x400   : > { %v1738_v62 = vpack.c.bf16 %v1708_v63, %v1707_v17 }
 0x401   : > { %v3662_v19 = vpop.eup %3661 }
 0x402   : > { %3382 = vmatmul.mubr.msk.bf16.vlgmr.msra.gmra.mxu1 %vm1384_vm3, %v1738_v62  ;;  %v3664_v36 = vpop.eup %3663  ;;  %v1711_v9 = vmul.f32 %v3662_v19, %v4516_v54 }
 0x403   : > { %3392 = vmatpush3.bf16.msra.mxu1 %v4400_v42  ;;  %3393 = vmatprep.mubr.msk.bf16.mxu1 %vm3904_vm1, %v3902_v47  ;;  %v1712_v31 = vmul.f32 %v3664_v36, %v4508_v34 }
 0x404   : > { %3403 = vmatprep.subr.bf16.mxu1 %v3902_v47 }
 0x405   : > { %v1740_v24 = vpack.c.bf16 %v1712_v31, %v1711_v9 }
 0x40a   : > { %3394 = vmatmul.mubr.msk.bf16.vlgmr.msra.gmra.mxu1 %vm1384_vm3, %v1740_v24 }
 0x40b   : > { %3404 = vmatpush3.bf16.msra.mxu1 %v4414_v8  ;;  %3405 = vmatprep.mubr.msk.bf16.mxu1 %vm3904_vm1, %v3902_v47 }
 0x40c   : > { %3415 = vmatprep.subr.bf16.mxu1 %v3902_v47 }
 0x415   : > { %v1609_v42 = vpop.xlane.xlu1 %1608 }
 0x416   : > { %3665 = vrcp.f32 %v1609_v42 }
 0x419   : > { %v1603_v41 = vpop.xlane.xlu1 %1602 }
 0x41a   : > { %v1612_v60 = vpop.xlane.xlu0 %1611 }
 0x41b   : > { %3667 = vrcp.f32 %v1612_v60 }
 0x41c   : > { %3669 = vrcp.f32 %v1603_v41 }
 0x41e   : > { %v1621_v57 = vpop.xlane.xlu1 %1620  ;;  %v1606_v54 = vpop.xlane.xlu0 %1605 }
 0x41f   : > { %3671 = vrcp.f32 %v1606_v54 }
 0x420   : > { %3673 = vrcp.f32 %v1621_v57 }
 0x422   : > { %v1615_v34 = vpop.xlane.xlu1 %1614  ;;  %v1624_v28 = vpop.xlane.xlu0 %1623 }
 0x423   : > { %3675 = vrcp.f32 %v1624_v28  ;;  %v3666_v0 = vpop.eup %3665 }
 0x424   : > { %3677 = vrcp.f32 %v1615_v34  ;;  %v1715_v56 = vmul.f32 %v3666_v0, %v4529_v3 }
 0x426   : > { %v1633_v8 = vpop.xlane.xlu1 %1632  ;;  %v1618_v46 = vpop.xlane.xlu0 %1617 }
 0x427   : > { %3679 = vrcp.f32 %v1618_v46 }
 0x428   : > { %v3668_v61 = vpop.eup %3667  ;;  %3681 = vrcp.f32 %v1633_v8 }
 0x429   : > { %v1716_v59 = vmul.f32 %v3668_v61, %v4537_v21  ;;  %v3670_v13 = vpop.eup %3669 }
 0x42a   : > { %v1627_v29 = vpop.xlane.xlu1 %1626  ;;  %v1636_v39 = vpop.xlane.xlu0 %1635  ;;  %v1713_v53 = vmul.f32 %v3670_v13, %v4535_v45 }
 0x42b   : > { %v1742_v10 = vpack.c.bf16 %v1716_v59, %v1715_v56  ;;  %3683 = vrcp.f32 %v1636_v39 }
 0x42c   : > { %v3672_v27 = vpop.eup %3671  ;;  %3685 = vrcp.f32 %v1627_v29 }
 0x42d   : > { %3406 = vmatmul.mubr.msk.bf16.vlgmr.msra.gmra.mxu1 %vm1384_vm3, %v1742_v10  ;;  %v1714_v3 = vmul.f32 %v3672_v27, %v4545_v32  ;;  %v3674_v21 = vpop.eup %3673 }
 0x42e   : > { %3416 = vmatpush3.bf16.msra.mxu1 %v4432_v37  ;;  %v1645_v48 = vpop.xlane.xlu1 %1644  ;;  %v1630_v7 = vpop.xlane.xlu0 %1629  ;;  %3417 = vmatprep.mubr.msk.bf16.mxu1 %vm3904_vm1, %v3902_v47  ;;  %v1719_v63 = vmul.f32 %v3674_v21, %v4547_v35 }
 0x42f   : > { %3427 = vmatprep.subr.bf16.mxu1 %v3902_v47  ;;  %3687 = vrcp.f32 %v1630_v7  ;;  %v1741_v20 = vpack.c.bf16 %v1714_v3, %v1713_v53 }
 0x430   : > { %v3676_v52 = vpop.eup %3675  ;;  %3689 = vrcp.f32 %v1645_v48 }
 0x431   : > { %3400 = vmatmul.mubr.msk.bf16.vlgmr.msra.gmra.mxu0 %vm1384_vm3, %v1741_v20  ;;  %v1720_v45 = vmul.f32 %v3676_v52, %v4557_v58  ;;  %v3678_v62 = vpop.eup %3677 }
 0x432   : > { %v1639_v17 = vpop.xlane.xlu1 %1638  ;;  %v1648_v37 = vpop.xlane.xlu0 %1647  ;;  %3410 = vmatpush3.bf16.msra.mxu0 %v4434_v38  ;;  %3411 = vmatprep.mubr.msk.bf16.mxu0 %vm3904_vm1, %v3902_v47  ;;  %v1717_v35 = vmul.f32 %v3678_v62, %v4555_v55 }
 0x433   : > { %3691 = vrcp.f32 %v1648_v37  ;;  %v1744_v32 = vpack.c.bf16 %v1720_v45, %v1719_v63  ;;  %3421 = vmatprep.subr.bf16.mxu0 %v3902_v47 }
 0x434   : > { %v3680_v19 = vpop.eup %3679  ;;  %3693 = vrcp.f32 %v1639_v17 }
 0x435   : > { %3418 = vmatmul.mubr.msk.bf16.vlgmr.msra.gmra.mxu1 %vm1384_vm3, %v1744_v32  ;;  %v1718_v58 = vmul.f32 %v3680_v19, %v4565_v14  ;;  %v3682_v31 = vpop.eup %3681 }
 0x436   : > { %v1657_v36 = vpop.xlane.xlu1 %1656  ;;  %v1642_v9 = vpop.xlane.xlu0 %1641  ;;  %3428 = vmatpush3.bf16.msra.mxu1 %v4446_v15  ;;  %3429 = vmatprep.mubr.msk.bf16.mxu1 %vm3904_vm1, %v3902_v47  ;;  %v1723_v55 = vmul.f32 %v3682_v31, %v4567_v22 }
 0x437   : > { %3695 = vrcp.f32 %v1642_v9  ;;  %v1743_v38 = vpack.c.bf16 %v1718_v58, %v1717_v35  ;;  %3439 = vmatprep.subr.bf16.mxu1 %v3902_v47 }
 0x438   : > { %v3684_v24 = vpop.eup %3683  ;;  %3697 = vrcp.f32 %v1657_v36 }
 0x439   : > { %3412 = vmatmul.mubr.msk.bf16.vlgmr.msra.gmra.mxu0 %vm1384_vm3, %v1743_v38  ;;  %v1724_v14 = vmul.f32 %v3684_v24, %v4577_v33  ;;  %v3686_v60 = vpop.eup %3685 }
 0x43a   : > { %v1651_v42 = vpop.xlane.xlu1 %1650  ;;  %v1660_v41 = vpop.xlane.xlu0 %1659  ;;  %3422 = vmatpush3.bf16.msra.mxu0 %v4448_v18  ;;  %3423 = vmatprep.mubr.msk.bf16.mxu0 %vm3904_vm1, %v3902_v47  ;;  %v1721_v22 = vmul.f32 %v3686_v60, %v4575_v30 }
 0x43b   : > { %3699 = vrcp.f32 %v1660_v41  ;;  %v1746_v15 = vpack.c.bf16 %v1724_v14, %v1723_v55  ;;  %3433 = vmatprep.subr.bf16.mxu0 %v3902_v47 }
 0x43c   : > { %v3688_v57 = vpop.eup %3687  ;;  %3701 = vrcp.f32 %v1651_v42 }
 0x43d   : > { %3430 = vmatmul.mubr.msk.bf16.vlgmr.msra.gmra.mxu1 %vm1384_vm3, %v1746_v15  ;;  %v1722_v33 = vmul.f32 %v3688_v57, %v4585_v49  ;;  %v3690_v28 = vpop.eup %3689 }
 0x43e   : > { %v1669_v54 = vpop.xlane.xlu1 %1668  ;;  %v1654_v34 = vpop.xlane.xlu0 %1653  ;;  %3440 = vmatpush3.bf16.msra.mxu1 %v4402_v43  ;;  %3441 = vmatprep.mubr.msk.bf16.mxu1 %vm3904_vm1, %v3902_v47  ;;  %v1727_v30 = vmul.f32 %v3690_v28, %v4587_v51 }
 0x43f   : > { %3703 = vrcp.f32 %v1654_v34  ;;  %v1745_v18 = vpack.c.bf16 %v1722_v33, %v1721_v22  ;;  %3451 = vmatprep.subr.bf16.mxu1 %v3902_v47 }
 0x440   : > { %v3692_v0 = vpop.eup %3691  ;;  %3705 = vrcp.f32 %v1669_v54 }
 0x441   : > { %3424 = vmatmul.mubr.msk.bf16.vlgmr.msra.gmra.mxu0 %vm1384_vm3, %v1745_v18  ;;  %v1728_v49 = vmul.f32 %v3692_v0, %v4597_v11  ;;  %v3694_v61 = vpop.eup %3693 }
 0x442   : > { %v1663_v8 = vpop.xlane.xlu1 %1662  ;;  %v1672_v46 = vpop.xlane.xlu0 %1671  ;;  %3434 = vmatpush3.bf16.msra.mxu0 %v4467_v50  ;;  %3435 = vmatprep.mubr.msk.bf16.mxu0 %vm3904_vm1, %v3902_v47  ;;  %v1725_v29 = vmul.f32 %v3694_v61, %v4595_v2 }
 0x443   : > { %3707 = vrcp.f32 %v1672_v46  ;;  %v1748_v43 = vpack.c.bf16 %v1728_v49, %v1727_v30  ;;  %3445 = vmatprep.subr.bf16.mxu0 %v3902_v47 }
 0x444   : > { %v3696_v56 = vpop.eup %3695  ;;  %3709 = vrcp.f32 %v1663_v8 }
 0x445   : > { %3442 = vmatmul.mubr.msk.bf16.vlgmr.msra.gmra.mxu1 %vm1384_vm3, %v1748_v43  ;;  %v1726_v51 = vmul.f32 %v3696_v56, %v4604_v6  ;;  %v3698_v11 = vpop.eup %3697 }
 0x446   : > { %v1666_v59 = vpop.xlane.xlu0 %1665  ;;  %3452 = vmatpush3.bf16.msra.mxu1 %v4646_v25  ;;  %3453 = vmatprep.mubr.msk.bf16.mxu1 %vm3904_vm1, %v3902_v47  ;;  %v1731_v13 = vmul.f32 %v3698_v11, %v4606_v26  ;;  %v2459_v27 = vpop.permute.xlu1 %2458 }
 0x447   : > { %3711 = vrcp.f32 %v1666_v59  ;;  %v1747_v50 = vpack.c.bf16 %v1726_v51, %v1725_v29  ;;  %3463 = vmatprep.subr.bf16.mxu1 %v3902_v47 }
 0x448   : > { %v3700_v39 = vpop.eup %3699 }
 0x449   : > { %3436 = vmatmul.mubr.msk.bf16.vlgmr.msra.gmra.mxu0 %vm1384_vm3, %v1747_v50  ;;  %v1732_v10 = vmul.f32 %v3700_v39, %v4614_v23  ;;  %v3702_v2 = vpop.eup %3701 }
 0x44a   : > { %3446 = vmatpush3.bf16.msra.mxu0 %v4644_v5  ;;  %3447 = vmatprep.mubr.msk.bf16.mxu0 %vm3904_vm1, %v3902_v47  ;;  %v1729_v48 = vmul.f32 %v3702_v2, %v4612_v44  ;;  %v2412_v3 = vpop.permute.xlu0 %2411 }
 0x44b   : > { %v1750_v6 = vpack.c.bf16 %v1732_v10, %v1731_v13  ;;  %3457 = vmatprep.subr.bf16.mxu0 %v3902_v47 }
 0x44c   : > { %v3704_v25 = vpop.eup %3703 }
 0x44d   : > { %3454 = vmatmul.mubr.msk.bf16.vlgmr.msra.gmra.mxu1 %vm1384_vm3, %v1750_v6  ;;  %v1730_v7 = vmul.f32 %v3704_v25, %v4620_v16  ;;  %v3706_v26 = vpop.eup %3705 }
 0x44e   : > { %3464 = vmatpush3.bf16.msra.mxu1 %v2459_v27  ;;  %3465 = vmatprep.mubr.msk.bf16.mxu1 %vm3904_vm1, %v3902_v47  ;;  %v1735_v21 = vmul.f32 %v3706_v26, %v4622_v40 }
 0x44f   : > { %v1749_v23 = vpack.c.bf16 %v1730_v7, %v1729_v48 }
 0x450   : > { %v3708_v5 = vpop.eup %3707 }
 0x451   : > { %v3710_v53 = vpop.eup %3709  ;;  %3448 = vmatmul.mubr.msk.bf16.vlgmr.msra.gmra.mxu0 %vm1384_vm3, %v1749_v23  ;;  %v1736_v20 = vmul.f32 %v3708_v5, %v4630_v1 }
 0x452   : > { %3458 = vmatpush3.bf16.msra.mxu0 %v2412_v3  ;;  %3459 = vmatprep.mubr.msk.bf16.mxu0 %vm3904_vm1, %v3902_v47  ;;  %v1733_v52 = vmul.f32 %v3710_v53, %v4628_v4 }
 0x453   : > { %v1752_v16 = vpack.c.bf16 %v1736_v20, %v1735_v21 }
 0x454   : > { %v3712_v44 = vpop.eup %3711 }
 0x455   : > { %v1734_v17 = vmul.f32 %v3712_v44, %v4636_v12  ;;  %3466 = vmatmul.mubr.msk.bf16.vlgmr.msra.gmra.mxu1 %vm1384_vm3, %v1752_v16 }
 0x457   : > { %v1751_v37 = vpack.c.bf16 %v1734_v17, %v1733_v52 }
 0x459   : > { %3460 = vmatmul.mubr.msk.bf16.vlgmr.msra.gmra.mxu0 %vm1384_vm3, %v1751_v37 }
 0x4b0   : > { %v1793_v63 = vpop.f32.mrf.mxu0 }
 0x4b1   : > { %v3076_v40 = vpack.c.bf16 %v1793_v63, %v1793_v63 }
 0x4b2   : > { %v3377_v45 = vpop.f32.mrf.mxu0 }
 0x4b3   : > { %2550 = vst.msk [vmem:[#allocation2] sm:$0xf] %vm2549_vm4, %v3076_v40 }
 0x4b4   : > { %v1796_v1 = vpop.f32.mrf.mxu0 }
 0x4b5   : > { %v3077_v62 = vpack.c.bf16 %v1796_v1, %v1796_v1  ;;  %v3579_v1 = vld [vmem:[#allocation9 + $0x8] sm:$0xff]  }
 0x4b6   : > { %v3378_v47 = vpop.f32.mrf.mxu0  ;;  %3469 = vmatprep.subr.bf16.mxu0 %v3579_v1 }
 0x4b7   : > { %2551 = vst.msk [vmem:[#allocation2 + $0x4] sm:$0xf] %vm2549_vm4, %v3077_v62  ;;  %3470 = vmatpush3.bf16.msra.mxu0 %v3579_v1 }
 0x4b8   : > { %v1887_v32 = vpop.f32.mrf.mxu0 }
 0x4b9   : > { %v3080_v4 = vpack.c.bf16 %v1887_v32, %v1887_v32 }
 0x4ba   : > { %v3389_v19 = vpop.f32.mrf.mxu0 }
 0x4bb   : > { %2554 = vst.msk [vmem:[#allocation2 + $0x10] sm:$0xf] %vm2549_vm4, %v3080_v4 }
 0x4bc   : > { %v1890_v12 = vpop.f32.mrf.mxu0 }
 0x4bd   : > { %v3081_v36 = vpack.c.bf16 %v1890_v12, %v1890_v12 }
 0x4be   : > { %v3390_v9 = vpop.f32.mrf.mxu0 }
 0x4bf   : > { %2555 = vst.msk [vmem:[#allocation2 + $0x14] sm:$0xf] %vm2549_vm4, %v3081_v36  ;;  %v3580_v36 = vld [vmem:[#allocation9] sm:$0xff]  }
 0x4c0   : > { %3471 = vmatprep.subr.bf16.mxu0 %v3580_v36 }
 0x4c1   : > { %3472 = vmatpush3.bf16.msra.mxu0 %v3580_v36 }
 0x4c2   : > { %v1840_v35 = vpop.f32.mrf.mxu1 }
 0x4c3   : > { %v3078_v58 = vpack.c.bf16 %v1840_v35, %v1840_v35 }
 0x4c4   : > { %v3383_v31 = vpop.f32.mrf.mxu1 }
 0x4c5   : > { %2552 = vst.msk [vmem:[#allocation2 + $0x8] sm:$0xf] %vm2549_vm4, %v3078_v58 }
 0x4c6   : > { %v1843_v38 = vpop.f32.mrf.mxu1 }
 0x4c7   : > { %v3079_v24 = vpack.c.bf16 %v1843_v38, %v1843_v38 }
 0x4c8   : > { %v3384_v42 = vpop.f32.mrf.mxu1 }
 0x4c9   : > { %2553 = vst.msk [vmem:[#allocation2 + $0xc] sm:$0xf] %vm2549_vm4, %v3079_v24 }
 0x4ca   : > { %v1934_v41 = vpop.f32.mrf.mxu1 }
 0x4cb   : > { %v3082_v55 = vpack.c.bf16 %v1934_v41, %v1934_v41 }
 0x4cc   : > { %v3395_v14 = vpop.f32.mrf.mxu1 }
 0x4cd   : > { %2556 = vst.msk [vmem:[#allocation2 + $0x18] sm:$0xf] %vm2549_vm4, %v3082_v55 }
 0x4ce   : > { %v1937_v60 = vpop.f32.mrf.mxu1 }
 0x4cf   : > { %v3083_v15 = vpack.c.bf16 %v1937_v60, %v1937_v60 }
 0x4d0   : > { %v3396_v57 = vpop.f32.mrf.mxu1 }
 0x4d1   : > { %2557 = vst.msk [vmem:[#allocation2 + $0x1c] sm:$0xf] %vm2549_vm4, %v3083_v15 }
 0x4ed   : > { %v2028_v54 = vpop.f32.mrf.mxu1 }
 0x4ee   : > { %v3086_v34 = vpack.c.bf16 %v2028_v54, %v2028_v54 }
 0x4ef   : > { %v3407_v22 = vpop.f32.mrf.mxu1 }
 0x4f0   : > { %2582 = vrot.lane.b32.xlu0 %v3086_v34, %s3908_s19 }
 0x4f1   : > { %v2031_v33 = vpop.f32.mrf.mxu1  ;;  %v1981_v28 = vpop.f32.mrf.mxu0 }
 0x4f2   : > { %v3087_v18 = vpack.c.bf16 %v2031_v33, %v2031_v33  ;;  %v3084_v0 = vpack.c.bf16 %v1981_v28, %v1981_v28 }
 0x4f3   : > { %v3408_v8 = vpop.f32.mrf.mxu1  ;;  %v3401_v46 = vpop.f32.mrf.mxu0 }
 0x4f4   : > { %2584 = vrot.lane.b32.xlu1 %v3087_v18, %s3908_s19  ;;  %2578 = vrot.lane.b32.xlu0 %v3084_v0, %s3908_s19 }
 0x4f5   : > { %v1984_v30 = vpop.f32.mrf.mxu0  ;;  %v2122_v49 = vpop.f32.mrf.mxu1 }
 0x4f6   : > { %v3085_v61 = vpack.c.bf16 %v1984_v30, %v1984_v30  ;;  %v3090_v43 = vpack.c.bf16 %v2122_v49, %v2122_v49 }
 0x4f7   : > { %v3402_v56 = vpop.f32.mrf.mxu0  ;;  %v3419_v59 = vpop.f32.mrf.mxu1 }
 0x4f8   : > { %2580 = vrot.lane.b32.xlu1 %v3085_v61, %s3908_s19  ;;  %2590 = vrot.lane.b32.xlu0 %v3090_v43, %s3908_s19 }
 0x4f9   : > { %v2075_v29 = vpop.f32.mrf.mxu0  ;;  %v2125_v51 = vpop.f32.mrf.mxu1 }
 0x4fa   : > { %v3088_v11 = vpack.c.bf16 %v2075_v29, %v2075_v29  ;;  %v3091_v50 = vpack.c.bf16 %v2125_v51, %v2125_v51 }
 0x4fb   : > { %v3413_v39 = vpop.f32.mrf.mxu0  ;;  %v3420_v13 = vpop.f32.mrf.mxu1 }
 0x4fc   : > { %2586 = vrot.lane.b32.xlu0 %v3088_v11, %s3908_s19  ;;  %2592 = vrot.lane.b32.xlu1 %v3091_v50, %s3908_s19 }
 0x4fd   : > { %v2078_v10 = vpop.f32.mrf.mxu0  ;;  %v2216_v2 = vpop.f32.mrf.mxu1 }
 0x4fe   : > { %v3089_v6 = vpack.c.bf16 %v2078_v10, %v2078_v10  ;;  %v3094_v25 = vpack.c.bf16 %v2216_v2, %v2216_v2 }
 0x4ff   : > { %v3414_v27 = vpop.f32.mrf.mxu0  ;;  %v3431_v48 = vpop.f32.mrf.mxu1 }
 0x500   : > { %2588 = vrot.lane.b32.xlu1 %v3089_v6, %s3908_s19  ;;  %2635 = vrot.lane.b32.xlu0 %v3094_v25, %s3909_s10 }
 0x501   : > { %v2169_v7 = vpop.f32.mrf.mxu0  ;;  %v2219_v26 = vpop.f32.mrf.mxu1 }
 0x502   : > { %v3092_v23 = vpack.c.bf16 %v2169_v7, %v2169_v7  ;;  %v3095_v5 = vpack.c.bf16 %v2219_v26, %v2219_v26 }
 0x503   : > { %v3425_v53 = vpop.f32.mrf.mxu0  ;;  %v3432_v3 = vpop.f32.mrf.mxu1 }
 0x504   : > { %2631 = vrot.lane.b32.xlu0 %v3092_v23, %s3909_s10  ;;  %2637 = vrot.lane.b32.xlu1 %v3095_v5, %s3909_s10 }
 0x505   : > { %v2172_v21 = vpop.f32.mrf.mxu0  ;;  %v2310_v20 = vpop.f32.mrf.mxu1 }
 0x506   : > { %v3093_v44 = vpack.c.bf16 %v2172_v21, %v2172_v21  ;;  %v3098_v55 = vpack.c.bf16 %v2310_v20, %v2310_v20 }
 0x507   : > { %v3426_v16 = vpop.f32.mrf.mxu0  ;;  %v3443_v52 = vpop.f32.mrf.mxu1 }
 0x508   : > { %2633 = vrot.lane.b32.xlu1 %v3093_v44, %s3909_s10 }
 0x509   : > { %v2263_v17 = vpop.f32.mrf.mxu0  ;;  %v2313_v37 = vpop.f32.mrf.mxu1 }
 0x50a   : > { %v3096_v63 = vpack.c.bf16 %v2263_v17, %v2263_v17  ;;  %v3099_v34 = vpack.c.bf16 %v2313_v37, %v2313_v37  ;;  %v3057_v17 = vld [vmem:[%s4876_s5] ss:$0 sm:$0xff] }
 0x50b   : > { %v3437_v40 = vpop.f32.mrf.mxu0  ;;  %v3444_v45 = vpop.f32.mrf.mxu1 }
 0x50c   : > { %2639 = vrot.lane.b32.xlu0 %v3096_v63, %s3909_s10 }
 0x50d   : > { %v2266_v62 = vpop.f32.mrf.mxu0  ;;  %v2404_v47 = vpop.f32.mrf.mxu1 }
 0x50e   : > { %v3097_v32 = vpack.c.bf16 %v2266_v62, %v2266_v62  ;;  %v3102_v4 = vpack.c.bf16 %v2404_v47, %v2404_v47 }
 0x50f   : > { %v3438_v19 = vpop.f32.mrf.mxu0  ;;  %v3455_v12 = vpop.f32.mrf.mxu1 }
 0x510   : > { %2641 = vrot.lane.b32.xlu1 %v3097_v32, %s3909_s10  ;;  %2688 = vrot.lane.b32.xlu0 %v3102_v4, %s3910_s7 }
 0x511   : > { %v2357_v9 = vpop.f32.mrf.mxu0  ;;  %v2407_v35 = vpop.f32.mrf.mxu1 }
 0x512   : > { %v3100_v58 = vpack.c.bf16 %v2357_v9, %v2357_v9  ;;  %v3103_v31 = vpack.c.bf16 %v2407_v35, %v2407_v35 }
 0x513   : > { %v3449_v38 = vpop.f32.mrf.mxu0  ;;  %v3456_v24 = vpop.f32.mrf.mxu1 }
 0x514   : > { %2684 = vrot.lane.b32.xlu0 %v3100_v58, %s3910_s7  ;;  %2690 = vrot.lane.b32.xlu1 %v3103_v31, %s3910_s7 }
 0x515   : > { %v2360_v42 = vpop.f32.mrf.mxu0  ;;  %v2498_v41 = vpop.f32.mrf.mxu1 }
 0x516   : > { %v3101_v14 = vpack.c.bf16 %v2360_v42, %v2360_v42  ;;  %v3106_v0 = vpack.c.bf16 %v2498_v41, %v2498_v41 }
 0x517   : > { %v3450_v60 = vpop.f32.mrf.mxu0  ;;  %v3467_v15 = vpop.f32.mrf.mxu1 }
 0x518   : > { %2643 = vrot.lane.b32.xlu0 %v3098_v55, %s3909_s10  ;;  %2686 = vrot.lane.b32.xlu1 %v3101_v14, %s3910_s7 }
 0x519   : > { %v2451_v57 = vpop.f32.mrf.mxu0  ;;  %v2501_v54 = vpop.f32.mrf.mxu1 }
 0x51a   : > { %v3104_v22 = vpack.c.bf16 %v2451_v57, %v2451_v57  ;;  %v3107_v30 = vpack.c.bf16 %v2501_v54, %v2501_v54 }
 0x51b   : > { %v3461_v33 = vpop.f32.mrf.mxu0  ;;  %v3468_v28 = vpop.f32.mrf.mxu1 }
 0x51c   : > { %2692 = vrot.lane.b32.xlu0 %v3104_v22, %s3910_s7  ;;  %2645 = vrot.lane.b32.xlu1 %v3099_v34, %s3909_s10  ;;  %s3825_s10 = scalar_lea.vmem %s3824_s15, 2048 }
 0x51d   : > { %v2454_v18 = vpop.f32.mrf.mxu0  ;;  %p3827_p3 = scmp.lt.s32.totalorder %s3825_s10, %s3819_s26 }
 0x51e   : > { %v3105_v8 = vpack.c.bf16 %v2454_v18, %v2454_v18 }
 0x51f   : > { %v3462_v46 = vpop.f32.mrf.mxu0  ;;  %p3828_p7 = por %p3827_p3, %p3826_p5 }
 0x520   : > { %2694 = vrot.lane.b32.xlu1 %v3105_v8, %s3910_s7  ;;  %2696 = vrot.lane.b32.xlu0 %v3106_v0, %s3910_s7 }
 0x521   : > { %p3829_p9 = pnand %p3828_p7, %p3822_p0 }
 0x524   : > { %2698 = vrot.lane.b32.xlu1 %v3107_v30, %s3910_s7 }
 0x562   : > { %v2583_v49 = vpop.permute.xlu0 %2582 }
 0x563   : > { %2605 = vst.msk [vmem:[#allocation2 + $0x8] sm:$0xf] %vm2602_vm5, %v2583_v49 }
 0x566   : > { %v2585_v61 = vpop.permute.xlu1 %2584  ;;  %v2579_v43 = vpop.permute.xlu0 %2578 }
 0x567   : > { %2606 = vst.msk [vmem:[#allocation2 + $0xc] sm:$0xf] %vm2602_vm5, %v2585_v61  ;;  %2603 = vst.msk [vmem:[#allocation2] sm:$0xf] %vm2602_vm5, %v2579_v43 }
 0x56a   : > { %v2581_v56 = vpop.permute.xlu1 %2580  ;;  %v2591_v59 = vpop.permute.xlu0 %2590 }
 0x56b   : > { %2604 = vst.msk [vmem:[#allocation2 + $0x4] sm:$0xf] %vm2602_vm5, %v2581_v56  ;;  %2609 = vst.msk [vmem:[#allocation2 + $0x18] sm:$0xf] %vm2602_vm5, %v2591_v59 }
 0x56e   : > { %v2587_v29 = vpop.permute.xlu0 %2586  ;;  %v2593_v51 = vpop.permute.xlu1 %2592 }
 0x56f   : > { %2607 = vst.msk [vmem:[#allocation2 + $0x10] sm:$0xf] %vm2602_vm5, %v2587_v29  ;;  %2610 = vst.msk [vmem:[#allocation2 + $0x1c] sm:$0xf] %vm2602_vm5, %v2593_v51 }
 0x572   : > { %v2589_v11 = vpop.permute.xlu1 %2588  ;;  %v2636_v50 = vpop.permute.xlu0 %2635 }
 0x573   : > { %2608 = vst.msk [vmem:[#allocation2 + $0x14] sm:$0xf] %vm2602_vm5, %v2589_v11 }
 0x574   : > { %2658 = vst.msk [vmem:[#allocation2 + $0x8] sm:$0xf] %vm2655_vm6, %v2636_v50 }
 0x576   : > { %v2632_v39 = vpop.permute.xlu0 %2631  ;;  %v2638_v13 = vpop.permute.xlu1 %2637 }
 0x577   : > { %2656 = vst.msk [vmem:[#allocation2] sm:$0xf] %vm2655_vm6, %v2632_v39  ;;  %2659 = vst.msk [vmem:[#allocation2 + $0xc] sm:$0xf] %vm2655_vm6, %v2638_v13 }
 0x57a   : > { %v2634_v10 = vpop.permute.xlu1 %2633 }
 0x57b   : > { %2657 = vst.msk [vmem:[#allocation2 + $0x4] sm:$0xf] %vm2655_vm6, %v2634_v10 }
 0x57e   : > { %v2640_v2 = vpop.permute.xlu0 %2639 }
 0x57f   : > { %2660 = vst.msk [vmem:[#allocation2 + $0x10] sm:$0xf] %vm2655_vm6, %v2640_v2 }
 0x582   : > { %v2642_v6 = vpop.permute.xlu1 %2641  ;;  %v2689_v25 = vpop.permute.xlu0 %2688 }
 0x583   : > { %2661 = vst.msk [vmem:[#allocation2 + $0x14] sm:$0xf] %vm2655_vm6, %v2642_v6 }
 0x584   : > { %2711 = vst.msk [vmem:[#allocation2 + $0x8] sm:$0xf] %vm2708_vm7, %v2689_v25 }
 0x586   : > { %v2685_v27 = vpop.permute.xlu0 %2684  ;;  %v2691_v48 = vpop.permute.xlu1 %2690 }
 0x587   : > { %2709 = vst.msk [vmem:[#allocation2] sm:$0xf] %vm2708_vm7, %v2685_v27  ;;  %2712 = vst.msk [vmem:[#allocation2 + $0xc] sm:$0xf] %vm2708_vm7, %v2691_v48 }
 0x58a   : > { %v2644_v7 = vpop.permute.xlu0 %2643  ;;  %v2687_v26 = vpop.permute.xlu1 %2686 }
 0x58b   : > { %2662 = vst.msk [vmem:[#allocation2 + $0x18] sm:$0xf] %vm2655_vm6, %v2644_v7 }
 0x58c   : > { %2710 = vst.msk [vmem:[#allocation2 + $0x4] sm:$0xf] %vm2708_vm7, %v2687_v26 }
 0x58e   : > { %v2693_v23 = vpop.permute.xlu0 %2692  ;;  %v2646_v5 = vpop.permute.xlu1 %2645  ;;  %v3582_v20 = vld [vmem:[#allocation2 + $0x8] sm:$0xff]  }
 0x58f   : > { %2713 = vst.msk [vmem:[#allocation2 + $0x10] sm:$0xf] %vm2708_vm7, %v2693_v23 }
 0x590   : > { %2663 = vst.msk [vmem:[#allocation2 + $0x1c] sm:$0xf] %vm2655_vm6, %v2646_v5 }
 0x592   : > { %v2695_v53 = vpop.permute.xlu1 %2694  ;;  %v2697_v3 = vpop.permute.xlu0 %2696 }
 0x593   : > { %v3581_v21 = vld [vmem:[#allocation2] sm:$0xff]   ;;  %2714 = vst.msk [vmem:[#allocation2 + $0x14] sm:$0xf] %vm2708_vm7, %v2695_v53  ;;  %2715 = vst.msk [vmem:[#allocation2 + $0x18] sm:$0xf] %vm2708_vm7, %v2697_v3 }
 0x594   : > { %3473 = vmatprep.mubr.msk.bf16.mxu0 %vm353_vm0, %v3581_v21 }
 0x595   : > { %3474 = vmatmul.mubr.msk.bf16.vlgmr.msra.gmra.mxu0 %vm353_vm0, %v3582_v20 }
 0x596   : > { %v2699_v44 = vpop.permute.xlu1 %2698 }
 0x597   : > { %2716 = vst.msk [vmem:[#allocation2 + $0x1c] sm:$0xf] %vm2708_vm7, %v2699_v44 }
 0x59a   : > { %v3583_v16 = vld [vmem:[#allocation2 + $0x10] sm:$0xff]  }
 0x59b   : > { %3477 = vmatprep.mubr.msk.bf16.mxu0 %vm353_vm0, %v3583_v16 }
 0x59e   : > { %v3584_v52 = vld [vmem:[#allocation2 + $0x18] sm:$0xff]  }
 0x59f   : > { %3478 = vmatmul.mubr.msk.bf16.gmra.mxu0 %vm353_vm0, %v3584_v52 }
 0x655   : > { %v3475_v37 = vpop.f32.mrf.mxu0 }
 0x656   : > { %v2823_v63 = vadd.f32 %v3475_v37, %v3057_v17 }
 0x657   : > { %v2814_v40 = vpop.f32.mrf.mxu0 }
 0x658   : > { %2847 = vst.msk [vmem:[%s314_s16 + $0x10] sm:$0xff] %vm353_vm0, %v2823_v63  ;;  %v2815_v45 = vadd.f32 %v3057_v17, %v2814_v40 }
 0x659   : > { %v3476_v1 = vpop.f32.mrf.mxu0 }
 0x65a   : > { %2845 = vst.msk [vmem:[%s314_s16] sm:$0xff] %vm353_vm0, %v2815_v45  ;;  %v2826_v62 = vadd.f32 %v3476_v1, %v3057_v17 }
 0x65b   : > { %v2817_v47 = vpop.f32.mrf.mxu0 }
 0x65c   : > { %2848 = vst.msk [vmem:[%s314_s16 + $0x18] sm:$0xff] %vm353_vm0, %v2826_v62  ;;  %v2818_v32 = vadd.f32 %v3057_v17, %v2817_v47 }
 0x65e   : > { %2846 = vst.msk [vmem:[%s314_s16 + $0x8] sm:$0xff] %vm353_vm0, %v2818_v32 }
 0x65f   : > { %v3479_v4 = vpop.f32.mrf.mxu0 }
 0x660   : > { %v2839_v19 = vadd.f32 %v3479_v4, %v3057_v17 }
 0x661   : > { %v2830_v12 = vpop.f32.mrf.mxu0 }
 0x662   : > { %2851 = vst.msk [vmem:[%s314_s16 + $0x30] sm:$0xff] %vm353_vm0, %v2839_v19  ;;  %v2831_v36 = vadd.f32 %v3057_v17, %v2830_v12 }
 0x663   : > { %v3480_v9 = vpop.f32.mrf.mxu0 }
 0x664   : > { %2849 = vst.msk [vmem:[%s314_s16 + $0x20] sm:$0xff] %vm353_vm0, %v2831_v36  ;;  %v2842_v35 = vadd.f32 %v3480_v9, %v3057_v17 }
 0x665   : > { %v2833_v58 = vpop.f32.mrf.mxu0 }
 0x666   : > { %2852 = vst.msk [vmem:[%s314_s16 + $0x38] sm:$0xff] %vm353_vm0, %v2842_v35  ;;  %v2834_v31 = vadd.f32 %v3057_v17, %v2833_v58 }
 0x668   : > { %2850 = vst.msk [vmem:[%s314_s16 + $0x28] sm:$0xff] %vm353_vm0, %v2834_v31 }
 0x669   : > { %3832 = shalt.err (!%p3829_p9)
}
 0x66a   : > { %s3833_s7 = scalar_lea.hbm %s4823_s20, 1024  ;;  %s3837_s16 = scalar_lea.hbm %s4877_s6, 2048 }
 0x66b   : > { %p3834_p1 = scmp.ne.s32.totalorder %s4823_s20, %s3833_s7  ;;  %p3838_p11 = scmp.lt.s32.totalorder %s4823_s20, %s4877_s6 }
 0x66c   : > { %p3839_p13 = scmp.lt.s32.totalorder %s3837_s16, %s3833_s7 }
 0x66d   : > { %p3835_p8 = pnand %p3834_p1, %p4895_p6 }
 0x66e   : > { %p3840_p2 = por %p3839_p13, %p3838_p11 }
 0x66f   : > { %p3836_p10 = pneg %p3835_p8 }
 0x671   : > { %p3841_p4 = pnand %p3840_p2, %p3836_p10 }
 0x673   : > { %3844 = shalt.err (!%p3841_p4)
}
 0x674   : > { %s3912_s18 = smov 128  }
 0x675   : > { %3499 = dma.vmem_to_hbm [thread:$0]  (%p4895_p6), %s4826_s27, 1024, %s4823_s20, %s2854_s25, %s3912_s18, %s3912_s18, %s3908_s19  }
 0x676 PF: > { %s2883_s26 = sand.u32 1, %s3879_s21   ;;  %p4896_p12 = scmp.ne.s32.totalorder %s4883_s28, 0 }
 0x677   : > { %p4897_p0 = scmp.ge.s32.totalorder %s3891_s24, 2  ;;  %s2884_s30 = scalar_lea.sflag [#allocation5], %s2883_s26 }
 0x679   : > { %p3516_p5 = pnand %p4897_p0, %p4896_p12 }
 0x67b   : > { %p3517_p3 = pneg %p3516_p5 }
 0x67d   : > { %3874 = dma.done.wait (%p3517_p3), %s2884_s30, 1024  }
 0x67e   : > { %3876 = vsyncadd (%p3517_p3), %s2884_s30, 4294966272  ;;  %p21_p7 = scmp.ge.s32.totalorder %s4028_s9, 4   ;;  %s4898_s21 = smov %s3883_s22 }
 0x67f   : > { %s4899_s22 = smov %s3887_s23  ;;  %s4900_s23 = smov %s4038_s11 }
 0x680   : > { %s4901_s24 = smov %s4028_s9  ;;  %23 = sbr.rel (!%p21_p7) target bundleno = 7 (0x7), region = 101 }
 0x685   :  { %2889 = vsyncpa [#allocation4], 1 }
 0x686   :  { %2891 = vsyncpa [#allocation4 + $0x1], 1 }
 0x687   :  { %2892 = vsyncpa [#allocation7], 1 }
 0x688   :  { %2893 = vsyncpa [#allocation10], 1 }
 0x689   :  { %2894 = vsyncpa [#allocation5], 1 }
 0x68a   :  { %2896 = vsyncpa [#allocation5 + $0x1], 1 }

// kernel: tpu_custom_call.1
= control target key start
LH: loop header
LB: loop body
LE: loop exit
PB: predicated region body
PF: predicated region fallthrough
CT: control target
= control target key end

     0   :  { %11 = vsyncpa [#allocation4], 0  ;;  %s4871_s0 = inlined_call_operand.hbm [shape: f32[8,16,32], index: 0, kind: input, shape index: {}]   ;;  %s4872_s1 = inlined_call_operand.hbm [shape: bf16[32,96], index: 1, kind: input, shape index: {}]   ;;  %s4873_s2 = inlined_call_operand.vmem [shape: f32[1,96], index: 2, kind: input, shape index: {}]   ;;  %s4874_s3 = inlined_call_operand.hbm [shape: bf16[4,4,16,16], index: 3, kind: input, shape index: {}]   ;;  %s4875_s4 = inlined_call_operand.hbm [shape: bf16[32,32], index: 4, kind: input, shape index: {}]   ;;  %s4876_s5 = inlined_call_operand.vmem [shape: f32[1,32], index: 5, kind: input, shape index: {}]   ;;  %s4877_s6 = inlined_call_operand.hbm [shape: f32[8,16,32], index: 6, kind: output, shape index: {}]  }
   0x1   :  { %13 = vsyncpa [#allocation4 + $0x1], 0 }
   0x2   :  { %14 = vsyncpa [#allocation7], 0 }
   0x3   :  { %15 = vsyncpa [#allocation10], 0 }
   0x4   :  { %16 = vsyncpa [#allocation5], 0 }
   0x5   :  { %18 = vsyncpa [#allocation5 + $0x1], 0  ;;  %s3948_s21 = smov 0   ;;  %s3950_s22 = smov 0  }
   0x6   :  { %s3952_s23 = smov 0   ;;  %s3954_s24 = smov 0  }
   0x7 LB: > { %s3969_s25 = sadd.s32 4294967295, %s3891_s24   ;;  %s2970_s26 = sadd.s32 4294967294, %s3891_s24   ;;  %s3891_s24 = sphi %s3954_s24, %s4901_s24   ;;  %s3887_s23 = sphi %s3952_s23, %s4900_s23   ;;  %s3883_s22 = sphi %s3950_s22, %s4899_s22   ;;  %s3879_s21 = sphi %s3948_s21, %s4898_s21  }
   0x8   : > { %p44_p0 = scmp.ne.s32.totalorder %s3883_s22, %s3879_s21  ;;  %p4878_p1 = scmp.eq.s32.totalorder %s3969_s25, 0 }
   0x9   : > { %p179_p3 = scmp.eq.s32.totalorder %s2970_s26, 1  ;;  %p2971_p5 = scmp.ge.s32.totalorder %s3891_s24, 1 }
   0xa   : > { %p3978_p4 = por %p4878_p1, %p44_p0  ;;  %p186_p7 = scmp.lt.s32.totalorder %s3891_s24, 3 }
   0xb   : > { %p3983_p6 = por %p179_p3, %p44_p0  ;;  %s3893_s30 = smov [#allocation6]  }
   0xc   : > { %s4882_s27 = scalar_select %p3978_p4, 1, 0 }
   0xd   : > { %s4883_s28 = scalar_select %p3983_p6, 1, 0 }
   0xe   : > { %p3988_p8 = pnand %p2971_p5, %p186_p7  ;;  %s198_s7 = sshll.u32 %s3893_s30, 4  ;;  %s199_s7 = int_to_ptr.vmem [resolvable:$true] %s198_s7 }
   0xf   : > { %s3894_s9 = smov [#allocation8]   ;;  %s3895_s11 = smov [#allocation9]  }
  0x10   : > { %s4884_s29 = scalar_select %p3988_p8, 1, 0 }
  0x11   : > { %p3501_p9 = pneg %p3988_p8  ;;  %s214_s10 = sshll.u32 %s3894_s9, 4  ;;  %s215_s10 = int_to_ptr.vmem [resolvable:$true] %s214_s10 }
  0x12   : > { %s227_s12 = sshll.u32 %s3895_s11, 4  ;;  %s3724_s13 = scalar_lea.vmem %s199_s7, 256  ;;  %s228_s12 = int_to_ptr.vmem [resolvable:$true] %s227_s12 }
  0x13   : > { %p3997_p11 = pnand %p3501_p9, %p4878_p1  ;;  %p3725_p13 = scmp.ne.s32.totalorder %s199_s7, %s3724_s13 }
  0x14   : > { %p3732_p5 = scmp.lt.s32.totalorder %s199_s7, %s199_s7  ;;  %p3733_p7 = scmp.lt.s32.totalorder %s3724_s13, %s3724_s13 }
  0x15   : > { %p3715_p12 = pneg %p3997_p11 }
  0x16   : > { %p3734_p9 = por %p3733_p7, %p3732_p5 }
  0x17   : > { %p3727_p0 = pnand %p3725_p13, %p3715_p12 }
  0x19   : > { %p3728_p3 = pneg %p3727_p0 }
  0x1b   : > { %p3735_p10 = pnand %p3734_p9, %p3728_p3 }
  0x1d   : > { %3738 = shalt.err (!%p3735_p10)
}
  0x1e   : > { %s3896_s14 = smov 64   ;;  %s3897_s15 = smov 4  }
  0x1f   : > { %3504 = dma.hbm_to_vmem [thread:$0]  (!%p3997_p11), %s4872_s1, 256, %s199_s7, [#allocation7], %s3896_s14, %s3896_s14, %s3897_s15  }
  0x20   : > { %s3750_s18 = scalar_lea.vmem %s215_s10, 2048  ;;  %p3758_p2 = scmp.lt.s32.totalorder %s215_s10, %s215_s10 }
  0x21   : > { %p3751_p1 = scmp.ne.s32.totalorder %s215_s10, %s3750_s18  ;;  %p3759_p6 = scmp.lt.s32.totalorder %s3750_s18, %s3750_s18 }
  0x23   : > { %p3753_p13 = pnand %p3751_p1, %p3715_p12  ;;  %p3760_p5 = por %p3759_p6, %p3758_p2 }
  0x25   : > { %p3754_p0 = pneg %p3753_p13 }
  0x27   : > { %p3761_p3 = pnand %p3760_p5, %p3754_p0 }
  0x29   : > { %3764 = shalt.err (!%p3761_p3)
}
  0x2a   : > { %3507 = dma.hbm_to_vmem [thread:$0]  (!%p3997_p11), %s4874_s3, 2048, %s215_s10, [#allocation7], %s3896_s14, %s3896_s14, %s3897_s15  }
  0x2b   : > { %s3776_s26 = scalar_lea.vmem %s228_s12, 256  ;;  %p3784_p9 = scmp.lt.s32.totalorder %s228_s12, %s228_s12 }
  0x2c   : > { %p3777_p10 = scmp.ne.s32.totalorder %s228_s12, %s3776_s26  ;;  %p3785_p13 = scmp.lt.s32.totalorder %s3776_s26, %s3776_s26 }
  0x2e   : > { %p3779_p7 = pnand %p3777_p10, %p3715_p12  ;;  %p3786_p4 = por %p3785_p13, %p3784_p9 }
  0x30   : > { %p3780_p1 = pneg %p3779_p7 }
  0x32   : > { %p3787_p2 = pnand %p3786_p4, %p3780_p1 }
  0x34   : > { %3790 = shalt.err (!%p3787_p2)
}
  0x35   : > { %3510 = dma.hbm_to_vmem [thread:$0]  (!%p3997_p11), %s4875_s4, 256, %s228_s12, [#allocation10], %s3896_s14, %s3896_s14, %s3897_s15  }
  0x36   : > { %s4028_s9 = sadd.s32 1, %s3891_s24   ;;  %s31_s8 = sadd.s32 1, %s3887_s23 }
  0x37   : > { %s28_s10 = ssub.s32 %s3891_s24, %s4028_s9  ;;  %p38_p6 = scmp.ne.s32.totalorder %s3887_s23, %s3883_s22 }
  0x38   : > { %p29_p4 = scmp.eq.s32.totalorder %s28_s10, 0  ;;  %p39_p12 = scmp.eq.s32.totalorder %s3891_s24, 0 }
  0x39   : > { %p3522_p0 = scmp.lt.s32.totalorder %s3891_s24, 2  ;;  %p4886_p3 = scmp.eq.s32.totalorder %s3969_s25, 1 }
  0x3a   : > { %s4038_s11 = scalar_select %p29_p4, %s3887_s23, %s31_s8  }
  0x3b   : > { %p40_p5 = por %p39_p12, %p38_p6  ;;  %p4042_p10 = por %p4886_p3, %p38_p6 }
  0x3c   : > { %s244_s16 = sand.u32 1, %s3887_s23   ;;  %s3075_s17 = sshll.u32 %s3891_s24, 10 }
  0x3d   : > { %s4887_s13 = scalar_select %p4042_p10, 1, 0 }
  0x3e   : > { %s2976_s12 = sshll.u32 %s244_s16, 6  ;;  %s4051_s18 = scalar_lea.hbm %s4871_s0, %s3075_s17 }
  0x3f   : > { %s248_s19 = scalar_lea.vmem [#allocation3], %s2976_s12  ;;  %p4053_p11 = pnand %p3522_p0, %p40_p5 }
  0x40   : > { %s256_s20 = sshll.u32 %s248_s19, 4  ;;  %s4059_s30 = scalar_lea.sflag [#allocation4], %s244_s16  ;;  %s4057_s20 = int_to_ptr.vmem [resolvable:$true] %s256_s20 }
  0x41   : > { %s3791_s7 = scalar_lea.hbm %s4051_s18, 1024  ;;  %p3793_p1 = pneg %p4053_p11 }
  0x42   : > { %p3792_p7 = scmp.ne.s32.totalorder %s4051_s18, %s3791_s7  ;;  %s3796_s17 = scalar_lea.hbm %s4871_s0, 2048 }
  0x43   : > { %p3797_p2 = scmp.lt.s32.totalorder %s4051_s18, %s4871_s0  ;;  %p3798_p4 = scmp.lt.s32.totalorder %s3796_s17, %s3791_s7 }
  0x44   : > { %p3794_p9 = pnand %p3793_p1, %p3792_p7 }
  0x45   : > { %p3799_p6 = por %p3798_p4, %p3797_p2 }
  0x46   : > { %p3795_p13 = pneg %p3794_p9 }
  0x48   : > { %p3800_p12 = pnand %p3799_p6, %p3795_p13 }
  0x4a   : > { %3803 = shalt.err (!%p3800_p12)
}
  0x4b   : > { %s3804_s16 = scalar_lea.vmem %s4057_s20, 1024  ;;  %s3898_s15 = smov [#allocation3]  }
  0x4c   : > { %p3805_p0 = scmp.ne.s32.totalorder %s4057_s20, %s3804_s16  ;;  %s3809_s19 = sshll.u32 %s3898_s15, 4  ;;  %s3810_s19 = int_to_ptr.vmem [resolvable:$false] %s3809_s19 }
  0x4d   : > { %s3811_s10 = scalar_lea.vmem %s3810_s19, 2048  ;;  %p3812_p7 = scmp.lt.s32.totalorder %s4057_s20, %s3810_s19 }
  0x4e   : > { %p3807_p5 = pnand %p3805_p0, %p3793_p1  ;;  %p3813_p9 = scmp.lt.s32.totalorder %s3811_s10, %s3804_s16 }
  0x50   : > { %p3808_p3 = pneg %p3807_p5  ;;  %p3814_p10 = por %p3813_p9, %p3812_p7 }
  0x52   : > { %p3815_p8 = pnand %p3814_p10, %p3808_p3 }
  0x54   : > { %3818 = shalt.err (!%p3815_p8)
}
  0x55   : > { %s3899_s7 = smov 128   ;;  %s3900_s8 = smov 8  }
  0x56   : > { %3514 = dma.hbm_to_vmem [thread:$0]  (!%p4053_p11), %s4051_s18, 1024, %s4057_s20, %s4059_s30, %s3899_s7, %s3899_s7, %s3900_s8  }
  0x57   : > { %p4889_p1 = scmp.ne.s32.totalorder %s4884_s29, 0 }
  0x58   : > { %s4083_s17 = sand.u32 (!%p4889_p1), 1, %s3883_s22   ;;  %p4890_p8 = scmp.ne.s32.totalorder (!%p4889_p1), %s4882_s27, 0 }
  0x59   : > { %268 = sbr.rel (%p4889_p1) target bundleno = 1654 (0x676), region = 44  ;;  %s2981_s12 = sshll.u32 (!%p4889_p1), %s4083_s17, 6 }
  0x5a   : > { %s271_s14 = scalar_lea.sflag (!%p4889_p1), [#allocation4], %s4083_s17  ;;  %s274_s16 = scalar_lea.vmem (!%p4889_p1), [#allocation3], %s2981_s12 }
  0x5e   : > { %3862 = dma.done.wait (%p4890_p8), %s271_s14, 1024  }
  0x5f   : > { %3864 = vsyncadd (%p4890_p8), %s271_s14, 4294966272  ;;  %p4891_p10 = scmp.eq.s32.totalorder %s3969_s25, 0 }
  0x61   : > { %3866 = dma.done.wait (%p4891_p10), [#allocation7], 2304   ;;  %p4892_p11 = pmov %p4891_p10 }
  0x62   : > { %p4893_p13 = pmov %p4891_p10 }
  0x63   : > { %3868 = vsyncadd (%p4892_p11), [#allocation7], 4294964992 }
  0x64   : > { %3870 = dma.done.wait (%p4893_p13), [#allocation10], 256   ;;  %p4894_p2 = pmov %p4891_p10 }
  0x65   : > { %v3577_v0 = vld [vmem:[#allocation6 + $0x8] sm:$0xff]   ;;  %v3578_v1 = vld [vmem:[#allocation6] sm:$0xff]   ;;  %vm353_vm0 = vcmask 261120   ;;  %v320_v7 = vld [vmem:[%s274_s16 + $0x10] sm:$0xff]  ;;  %s3901_s18 = smov 120   ;;  %v3902_v47 = vmov 0.0  }
  0x66   : > { %3872 = vsyncadd (%p4894_p2), [#allocation10], 4294967040  ;;  %3265 = vmatprep.subr.bf16.mxu0 %v3577_v0  ;;  %3481 = vmatprep.subr.bf16.mxu1 %v3577_v0  ;;  %v318_v2 = vld [vmem:[%s274_s16] sm:$0xff]  ;;  %v319_v3 = vld [vmem:[%s274_s16 + $0x8] sm:$0xff]  ;;  %s3903_s20 = smov 112   ;;  %vm3904_vm1 = vmmov 0  }
  0x67   : > { %v322_v4 = vld [vmem:[%s274_s16 + $0x20] sm:$0xff]  ;;  %3266 = vmatpush3.bf16.msra.mxu0 %v3577_v0  ;;  %3483 = vmatpush3.bf16.msra.mxu1 %v3577_v0  ;;  %v326_v5 = vpack.c.bf16 %v319_v3, %v318_v2  ;;  %v323_v6 = vld [vmem:[%s274_s16 + $0x28] sm:$0xff]  ;;  %v321_v8 = vld [vmem:[%s274_s16 + $0x18] sm:$0xff]  ;;  %s3905_s26 = smov 104   ;;  %s3906_s30 = smov 96   ;;  %vm505_vm2 = vcmask 64512  }
  0x68   : > { %3267 = vmatprep.subr.bf16.mxu0 %v3578_v1  ;;  %3482 = vmatprep.subr.bf16.mxu1 %v3578_v1  ;;  %v328_v9 = vpack.c.bf16 %v323_v6, %v322_v4  ;;  %v324_v10 = vld [vmem:[%s274_s16 + $0x30] sm:$0xff]  ;;  %v325_v11 = vld [vmem:[%s274_s16 + $0x38] sm:$0xff]  ;;  %v327_v12 = vpack.c.bf16 %v321_v8, %v320_v7  ;;  %v2986_v15 = vld [vmem:[%s4873_s2] ss:$0 sm:$0xff]  ;;  %s3907_s15 = smov 64   ;;  %vm1384_vm3 = vcmask 130048  }
  0x69   : > { %3269 = vmatprep.mubr.msk.bf16.mxu0 %vm353_vm0, %v326_v5  ;;  %v329_v13 = vpack.c.bf16 %v325_v11, %v324_v10  ;;  %vm2549_vm4 = vcmask 60416   ;;  %s3908_s19 = smov 8   ;;  %s3909_s10 = smov 16   ;;  %vm2602_vm5 = vcmask 126016   ;;  %vm2655_vm6 = vcmask 191616  }
  0x6a   : > { %3273 = vmatprep.mubr.msk.bf16.mxu1 %vm353_vm0, %v328_v9  ;;  %s3910_s7 = smov 24   ;;  %vm2708_vm7 = vcmask 257216   ;;  %s314_s16 = scalar_lea.vmem [#allocation11], %s2981_s12 }
  0x6b   : > { %3268 = vmatpush3.bf16.msra.mxu0 %v3578_v1  ;;  %3484 = vmatpush3.bf16.msra.mxu1 %v3578_v1  ;;  %s3109_s12 = sshll.u32 %s3969_s25, 10  ;;  %s2868_s27 = sshll.u32 %s314_s16, 4  ;;  %s4826_s27 = int_to_ptr.vmem [resolvable:$true] %s2868_s27 }
  0x6c   : > { %3277 = vmatprep.subr.bf16.mxu1 %v3902_v47  ;;  %3289 = vmatprep.subr.bf16.mxu0 %v3902_v47  ;;  %s2854_s25 = scalar_lea.sflag [#allocation5], %s4083_s17  ;;  %p4895_p6 = scmp.ne.s32.totalorder %s4887_s13, 0 }
  0x6e   : > { %3270 = vmatmul.mubr.msk.bf16.vlgmr.msra.gmra.mxu0 %vm353_vm0, %v327_v12  ;;  %3274 = vmatmul.mubr.msk.bf16.vlgmr.msra.gmra.mxu1 %vm353_vm0, %v329_v13 }
  0x6f   : > { %3279 = vmatprep.mubr.msk.bf16.mxu1 %vm3904_vm1, %v3902_v47  ;;  %3291 = vmatprep.mubr.msk.bf16.mxu0 %vm3904_vm1, %v3902_v47 }
 0x12e   : > { %v3271_v14 = vpop.f32.mrf.mxu0  ;;  %v3275_v16 = vpop.f32.mrf.mxu1 }
 0x12f   : > { %v425_v17 = vadd.f32 %v3275_v16, %v2986_v15  ;;  %v409_v20 = vadd.f32 %v3271_v14, %v2986_v15 }
 0x130   : > { %v400_v18 = vpop.f32.mrf.mxu0  ;;  %v416_v19 = vpop.f32.mrf.mxu1 }
 0x131   : > { %v437_v23 = vmul.f32 0.35355338, %v425_v17  ;;  %v401_v24 = vadd.f32 %v2986_v15, %v400_v18  ;;  %v417_v27 = vadd.f32 %v2986_v15, %v416_v19  ;;  %v433_v30 = vmul.f32 0.35355338, %v409_v20 }
 0x132   : > { %v3272_v21 = vpop.f32.mrf.mxu0  ;;  %v3276_v22 = vpop.f32.mrf.mxu1 }
 0x133   : > { %v412_v25 = vadd.f32 %v3272_v21, %v2986_v15  ;;  %v428_v26 = vadd.f32 %v3276_v22, %v2986_v15  ;;  %v435_v33 = vmul.f32 0.35355338, %v417_v27  ;;  %v431_v36 = vmul.f32 0.35355338, %v401_v24 }
 0x134   : > { %v403_v28 = vpop.f32.mrf.mxu0  ;;  %v419_v29 = vpop.f32.mrf.mxu1 }
 0x135   : > { %v434_v31 = vmul.f32 0.35355338, %v412_v25  ;;  %v438_v32 = vmul.f32 0.35355338, %v428_v26  ;;  %v404_v34 = vadd.f32 %v2986_v15, %v403_v28  ;;  %v420_v35 = vadd.f32 %v2986_v15, %v419_v29 }
 0x136   : > { %v4124_v45 = vpack.c.bf16 %v412_v25, %v409_v20  ;;  %v4126_v46 = vpack.c.bf16 %v428_v26, %v425_v17 }
 0x137   : > { %v4108_v37 = vpack.c.bf16 %v434_v31, %v433_v30  ;;  %v4110_v38 = vpack.c.bf16 %v438_v32, %v437_v23  ;;  %v432_v39 = vmul.f32 0.35355338, %v404_v34  ;;  %v4112_v40 = vpack.c.bf16 %v404_v34, %v401_v24 }
 0x138   : > { %v436_v41 = vmul.f32 0.35355338, %v420_v35  ;;  %v4114_v42 = vpack.c.bf16 %v420_v35, %v417_v27 }
 0x139   : > { %v4116_v43 = vpack.c.bf16 %v432_v39, %v431_v36  ;;  %479 = vrot.lane.b32.xlu0 %v4112_v40, %s3901_s18 }
 0x13a   : > { %v4118_v44 = vpack.c.bf16 %v436_v41, %v435_v33  ;;  %483 = vrot.lane.b32.xlu1 %v4114_v42, %s3901_s18 }
 0x13d   : > { %481 = vrot.lane.b32.xlu0 %v4124_v45, %s3901_s18 }
 0x13e   : > { %485 = vrot.lane.b32.xlu1 %v4126_v46, %s3901_s18 }
 0x141   : > { %487 = vrot.lane.b32.xlu0 %v4112_v40, %s3903_s20 }
 0x142   : > { %489 = vrot.lane.b32.xlu1 %v4124_v45, %s3903_s20 }
 0x145   : > { %491 = vrot.lane.b32.xlu0 %v4114_v42, %s3903_s20 }
 0x146   : > { %493 = vrot.lane.b32.xlu1 %v4126_v46, %s3903_s20 }
 0x149   : > { %495 = vrot.lane.b32.xlu0 %v4112_v40, %s3905_s26 }
 0x14a   : > { %497 = vrot.lane.b32.xlu1 %v4124_v45, %s3905_s26 }
 0x14d   : > { %503 = vrot.lane.b32.xlu0 %v4112_v40, %s3906_s30 }
 0x14e   : > { %499 = vrot.lane.b32.xlu1 %v4114_v42, %s3905_s26 }
 0x151   : > { %501 = vrot.lane.b32.xlu0 %v4126_v46, %s3905_s26 }
 0x152   : > { %553 = vrot.lane.b32.xlu1 %v4124_v45, %s3906_s30 }
 0x155   : > { %602 = vrot.lane.b32.xlu0 %v4114_v42, %s3906_s30 }
 0x156   : > { %651 = vrot.lane.b32.xlu1 %v4126_v46, %s3906_s30 }
 0x1ab   : > { %v4164_v49 = vpop.permute.xlu0 %479 }
 0x1ac   : > { %v4162_v48 = vpop.permute.xlu1 %483  ;;  %700 = vrot.lane.b32.xlu0 %v4164_v49, %s3906_s30 }
 0x1af   : > { %v482_v51 = vpop.permute.xlu0 %481 }
 0x1b0   : > { %v4168_v50 = vpop.permute.xlu1 %485  ;;  %749 = vrot.lane.b32.xlu1 %v482_v51, %s3906_s30  ;;  %451 = vrot.lane.b32.xlu0 %v4116_v43, %s3901_s18 }
 0x1b3   : > { %v4173_v53 = vpop.permute.xlu0 %487 }
 0x1b4   : > { %v490_v52 = vpop.permute.xlu1 %489  ;;  %798 = vrot.lane.b32.xlu1 %v4162_v48, %s3906_s30  ;;  %453 = vrot.lane.b32.xlu0 %v4108_v37, %s3901_s18 }
 0x1b7   : > { %v492_v55 = vpop.permute.xlu0 %491 }
 0x1b8   : > { %v494_v54 = vpop.permute.xlu1 %493  ;;  %847 = vrot.lane.b32.xlu1 %v4168_v50, %s3906_s30  ;;  %455 = vrot.lane.b32.xlu0 %v4118_v44, %s3901_s18 }
 0x1bb   : > { %v4185_v57 = vpop.permute.xlu0 %495 }
 0x1bc   : > { %v4183_v56 = vpop.permute.xlu1 %497  ;;  %896 = vrot.lane.b32.xlu1 %v4173_v53, %s3906_s30  ;;  %457 = vrot.lane.b32.xlu0 %v4110_v38, %s3901_s18 }
 0x1bf   : > { %v504_v58 = vpop.permute.xlu0 %503 }
 0x1c0   : > { %v4191_v59 = vpop.permute.xlu1 %499  ;;  %v510_v60 = vsel %vm505_vm2, %v504_v58, 0  ;;  %945 = vrot.lane.b32.xlu1 %v490_v52, %s3906_s30  ;;  %459 = vrot.lane.b32.xlu0 %v4116_v43, %s3903_s20 }
 0x1c1   : > { %3278 = vmatpush3.bf16.xpose.msra.mxu1 %v510_v60 }
 0x1c2   : > { %3283 = vmatprep.subr.bf16.mxu1 %v3902_v47 }
 0x1c3   : > { %v4198_v61 = vpop.permute.xlu0 %501 }
 0x1c4   : > { %994 = vrot.lane.b32.xlu1 %v492_v55, %s3906_s30  ;;  %461 = vrot.lane.b32.xlu0 %v4108_v37, %s3903_s20  ;;  %v554_v62 = vpop.permute.xlu1 %553 }
 0x1c5   : > { %v559_v1 = vsel %vm505_vm2, %v554_v62, 0 }
 0x1c7   : > { %v603_v63 = vpop.permute.xlu0 %602 }
 0x1c8   : > { %v608_v0 = vsel %vm505_vm2, %v603_v63, 0  ;;  %1043 = vrot.lane.b32.xlu1 %v494_v54, %s3906_s30  ;;  %463 = vrot.lane.b32.xlu0 %v4118_v44, %s3903_s20  ;;  %v652_v2 = vpop.permute.xlu1 %651 }
 0x1c9   : > { %3280 = vmatmul.mubr.msk.bf16.vlgmr.msra.gmra.mxu1 %vm505_vm2, %v4116_v43  ;;  %3290 = vmatpush3.bf16.xpose.msra.mxu0 %v608_v0  ;;  %v657_v3 = vsel %vm505_vm2, %v652_v2, 0 }
 0x1ca   : > { %3284 = vmatpush3.bf16.xpose.msra.mxu1 %v559_v1  ;;  %3285 = vmatprep.mubr.msk.bf16.mxu1 %vm3904_vm1, %v3902_v47 }
 0x1cb   : > { %3295 = vmatprep.subr.bf16.mxu1 %v3902_v47  ;;  %3301 = vmatprep.subr.bf16.mxu0 %v3902_v47 }
 0x1cc   : > { %1092 = vrot.lane.b32.xlu1 %v4185_v57, %s3906_s30  ;;  %465 = vrot.lane.b32.xlu0 %v4110_v38, %s3903_s20  ;;  %s4823_s20 = scalar_lea.hbm %s4877_s6, %s3109_s12 }
 0x1d0   : > { %1141 = vrot.lane.b32.xlu1 %v4183_v56, %s3906_s30  ;;  %3292 = vmatmul.mubr.msk.bf16.vlgmr.msra.gmra.mxu0 %vm505_vm2, %v4118_v44 }
 0x1d1   : > { %467 = vrot.lane.b32.xlu0 %v4116_v43, %s3905_s26  ;;  %3286 = vmatmul.mubr.msk.bf16.vlgmr.msra.gmra.mxu1 %vm505_vm2, %v4108_v37 }
 0x1d2   : > { %3296 = vmatpush3.bf16.xpose.msra.mxu1 %v657_v3  ;;  %3297 = vmatprep.mubr.msk.bf16.mxu1 %vm3904_vm1, %v3902_v47 }
 0x1d3   : > { %3307 = vmatprep.subr.bf16.mxu1 %v3902_v47  ;;  %3303 = vmatprep.mubr.msk.bf16.mxu0 %vm3904_vm1, %v3902_v47 }
 0x1d4   : > { %1190 = vrot.lane.b32.xlu1 %v4191_v59, %s3906_s30 }
 0x1d5   : > { %469 = vrot.lane.b32.xlu0 %v4108_v37, %s3905_s26 }
 0x1d8   : > { %1239 = vrot.lane.b32.xlu1 %v4198_v61, %s3906_s30  ;;  %s3911_s30 = smov [#allocation11]  }
 0x1d9   : > { %471 = vrot.lane.b32.xlu0 %v4118_v44, %s3905_s26  ;;  %3298 = vmatmul.mubr.msk.bf16.vlgmr.msra.gmra.mxu1 %vm505_vm2, %v4110_v38 }
 0x1da   : > { %3309 = vmatprep.mubr.msk.bf16.mxu1 %vm3904_vm1, %v3902_v47 }
 0x1dc   : > { %473 = vrot.lane.b32.xlu1 %v4110_v38, %s3905_s26  ;;  %s3819_s26 = scalar_lea.vmem %s4826_s27, 1024 }
 0x1dd   : > { %1800 = vrot.lane.b32.xlu0 %v4124_v45, %s3907_s15  ;;  %p3820_p4 = scmp.ne.s32.totalorder %s4826_s27, %s3819_s26 }
 0x1df   : > { %p3821_p12 = pnand %p3820_p4, %p4895_p6 }
 0x1e0   : > { %1753 = vrot.lane.b32.xlu1 %v4112_v40, %s3907_s15 }
 0x1e1   : > { %1894 = vrot.lane.b32.xlu0 %v4126_v46, %s3907_s15  ;;  %v3175_v46 = vld [vmem:[#allocation8 + $0x10] sm:$0xff]   ;;  %p3822_p0 = pneg %p3821_p12 }
 0x1e2   : > { %v3121_v62 = vunpack.c.h.bf16 %v3175_v46 }
 0x1e4   : > { %1847 = vrot.lane.b32.xlu1 %v4114_v42, %s3907_s15  ;;  %v3111_v42 = vld [vmem:[#allocation8] sm:$0xff]  }
 0x1e5   : > { %1988 = vrot.lane.b32.xlu0 %v482_v51, %s3907_s15  ;;  %v3112_v43 = vunpack.c.l.bf16 %v3111_v42  ;;  %v3120_v51 = vunpack.c.l.bf16 %v3175_v46 }
 0x1e8   : > { %2270 = vrot.lane.b32.xlu1 %v494_v54, %s3907_s15  ;;  %v3174_v54 = vld [vmem:[#allocation8 + $0x8] sm:$0xff]  }
 0x1e9   : > { %2082 = vrot.lane.b32.xlu0 %v4168_v50, %s3907_s15  ;;  %v3116_v1 = vunpack.c.l.bf16 %v3174_v54 }
 0x1ec   : > { %1941 = vrot.lane.b32.xlu1 %v4164_v49, %s3907_s15 }
 0x1ed   : > { %2176 = vrot.lane.b32.xlu0 %v490_v52, %s3907_s15  ;;  %v3113_v52 = vunpack.c.h.bf16 %v3111_v42 }
 0x1f0   : > { %2035 = vrot.lane.b32.xlu1 %v4162_v48, %s3907_s15 }
 0x1f4   : > { %2129 = vrot.lane.b32.xlu1 %v4173_v53, %s3907_s15 }
 0x1f8   : > { %2223 = vrot.lane.b32.xlu1 %v492_v55, %s3907_s15 }
 0x21e   : > { %v701_v4 = vpop.permute.xlu0 %700 }
 0x21f   : > { %v706_v5 = vsel %vm505_vm2, %v701_v4, 0  ;;  %v3176_v4 = vld [vmem:[#allocation8 + $0x18] sm:$0xff]  }
 0x220   : > { %3302 = vmatpush3.bf16.xpose.msra.mxu0 %v706_v5 }
 0x221   : > { %3313 = vmatprep.subr.bf16.mxu0 %v3902_v47 }
 0x222   : > { %v750_v6 = vpop.permute.xlu1 %749  ;;  %v452_v7 = vpop.permute.xlu0 %451 }
 0x223   : > { %v755_v8 = vsel %vm505_vm2, %v750_v6, 0 }
 0x224   : > { %3308 = vmatpush3.bf16.xpose.msra.mxu1 %v755_v8 }
 0x225   : > { %3319 = vmatprep.subr.bf16.mxu1 %v3902_v47 }
 0x226   : > { %v799_v9 = vpop.permute.xlu1 %798  ;;  %v454_v10 = vpop.permute.xlu0 %453 }
 0x227   : > { %v804_v11 = vsel %vm505_vm2, %v799_v9, 0  ;;  %3304 = vmatmul.mubr.msk.bf16.vlgmr.msra.gmra.mxu0 %vm505_vm2, %v452_v7  ;;  %v3124_v9 = vunpack.c.l.bf16 %v3176_v4 }
 0x228   : > { %3314 = vmatpush3.bf16.xpose.msra.mxu0 %v804_v11  ;;  %3315 = vmatprep.mubr.msk.bf16.mxu0 %vm3904_vm1, %v3902_v47  ;;  %v3117_v11 = vunpack.c.h.bf16 %v3174_v54 }
 0x229   : > { %3325 = vmatprep.subr.bf16.mxu0 %v3902_v47 }
 0x22a   : > { %v848_v12 = vpop.permute.xlu1 %847  ;;  %v456_v13 = vpop.permute.xlu0 %455 }
 0x22b   : > { %v853_v14 = vsel %vm505_vm2, %v848_v12, 0  ;;  %3310 = vmatmul.mubr.msk.bf16.vlgmr.msra.gmra.mxu1 %vm505_vm2, %v454_v10 }
 0x22c   : > { %3320 = vmatpush3.bf16.xpose.msra.mxu1 %v853_v14  ;;  %3321 = vmatprep.mubr.msk.bf16.mxu1 %vm3904_vm1, %v3902_v47 }
 0x22d   : > { %3331 = vmatprep.subr.bf16.mxu1 %v3902_v47 }
 0x22e   : > { %v897_v15 = vpop.permute.xlu1 %896  ;;  %v458_v16 = vpop.permute.xlu0 %457 }
 0x22f   : > { %v902_v17 = vsel %vm505_vm2, %v897_v15, 0  ;;  %3316 = vmatmul.mubr.msk.bf16.vlgmr.msra.gmra.mxu0 %vm505_vm2, %v456_v13 }
 0x230   : > { %3326 = vmatpush3.bf16.xpose.msra.mxu0 %v902_v17  ;;  %3327 = vmatprep.mubr.msk.bf16.mxu0 %vm3904_vm1, %v3902_v47 }
 0x231   : > { %3337 = vmatprep.subr.bf16.mxu0 %v3902_v47 }
 0x232   : > { %v946_v18 = vpop.permute.xlu1 %945  ;;  %v460_v19 = vpop.permute.xlu0 %459 }
 0x233   : > { %v951_v20 = vsel %vm505_vm2, %v946_v18, 0  ;;  %3322 = vmatmul.mubr.msk.bf16.vlgmr.msra.gmra.mxu1 %vm505_vm2, %v458_v16 }
 0x234   : > { %3332 = vmatpush3.bf16.xpose.msra.mxu1 %v951_v20  ;;  %3333 = vmatprep.mubr.msk.bf16.mxu1 %vm3904_vm1, %v3902_v47  ;;  %v3125_v20 = vunpack.c.h.bf16 %v3176_v4  ;;  %v3182_v4 = vld [vmem:[#allocation8 + $0x48] sm:$0xff]  }
 0x235   : > { %3343 = vmatprep.subr.bf16.mxu1 %v3902_v47 }
 0x236   : > { %v995_v21 = vpop.permute.xlu1 %994  ;;  %v462_v22 = vpop.permute.xlu0 %461 }
 0x237   : > { %v1000_v23 = vsel %vm505_vm2, %v995_v21, 0  ;;  %3328 = vmatmul.mubr.msk.bf16.vlgmr.msra.gmra.mxu0 %vm505_vm2, %v460_v19 }
 0x238   : > { %3338 = vmatpush3.bf16.xpose.msra.mxu0 %v1000_v23  ;;  %3339 = vmatprep.mubr.msk.bf16.mxu0 %vm3904_vm1, %v3902_v47 }
 0x239   : > { %3349 = vmatprep.subr.bf16.mxu0 %v3902_v47 }
 0x23a   : > { %v1044_v24 = vpop.permute.xlu1 %1043  ;;  %v464_v25 = vpop.permute.xlu0 %463 }
 0x23b   : > { %v1049_v26 = vsel %vm505_vm2, %v1044_v24, 0  ;;  %3334 = vmatmul.mubr.msk.bf16.vlgmr.msra.gmra.mxu1 %vm505_vm2, %v462_v22 }
 0x23c   : > { %3344 = vmatpush3.bf16.xpose.msra.mxu1 %v1049_v26  ;;  %3345 = vmatprep.mubr.msk.bf16.mxu1 %vm3904_vm1, %v3902_v47 }
 0x23d   : > { %3355 = vmatprep.subr.bf16.mxu1 %v3902_v47 }
 0x23e   : > { %v1093_v27 = vpop.permute.xlu1 %1092  ;;  %v466_v28 = vpop.permute.xlu0 %465 }
 0x23f   : > { %v1098_v29 = vsel %vm505_vm2, %v1093_v27, 0  ;;  %3340 = vmatmul.mubr.msk.bf16.vlgmr.msra.gmra.mxu0 %vm505_vm2, %v464_v25  ;;  %v3178_v27 = vld [vmem:[#allocation8 + $0x28] sm:$0xff]  }
 0x240   : > { %3350 = vmatpush3.bf16.xpose.msra.mxu0 %v1098_v29  ;;  %3351 = vmatprep.mubr.msk.bf16.mxu0 %vm3904_vm1, %v3902_v47  ;;  %v3177_v29 = vld [vmem:[#allocation8 + $0x20] sm:$0xff]  }
 0x241   : > { %3361 = vmatprep.subr.bf16.mxu0 %v3902_v47 }
 0x242   : > { %v1142_v30 = vpop.permute.xlu1 %1141 }
 0x243   : > { %v1147_v31 = vsel %vm505_vm2, %v1142_v30, 0  ;;  %v468_v32 = vpop.permute.xlu0 %467  ;;  %3346 = vmatmul.mubr.msk.bf16.vlgmr.msra.gmra.mxu1 %vm505_vm2, %v466_v28  ;;  %v3132_v30 = vunpack.c.l.bf16 %v3178_v27 }
 0x244   : > { %3356 = vmatpush3.bf16.xpose.msra.mxu1 %v1147_v31  ;;  %3357 = vmatprep.mubr.msk.bf16.mxu1 %vm3904_vm1, %v3902_v47 }
 0x245   : > { %3367 = vmatprep.subr.bf16.mxu1 %v3902_v47 }
 0x246   : > { %v1191_v33 = vpop.permute.xlu1 %1190 }
 0x247   : > { %v1196_v34 = vsel %vm505_vm2, %v1191_v33, 0  ;;  %v470_v35 = vpop.permute.xlu0 %469  ;;  %3352 = vmatmul.mubr.msk.bf16.vlgmr.msra.gmra.mxu0 %vm505_vm2, %v468_v32  ;;  %v3128_v32 = vunpack.c.l.bf16 %v3177_v29 }
 0x248   : > { %3362 = vmatpush3.bf16.xpose.msra.mxu0 %v1196_v34  ;;  %3363 = vmatprep.mubr.msk.bf16.mxu0 %vm3904_vm1, %v3902_v47 }
 0x249   : > { %3373 = vmatprep.subr.bf16.mxu0 %v3902_v47 }
 0x24a   : > { %v1240_v36 = vpop.permute.xlu1 %1239 }
 0x24b   : > { %v1245_v37 = vsel %vm505_vm2, %v1240_v36, 0  ;;  %3358 = vmatmul.mubr.msk.bf16.vlgmr.msra.gmra.mxu1 %vm505_vm2, %v470_v35  ;;  %v472_v38 = vpop.permute.xlu0 %471  ;;  %v3133_v36 = vunpack.c.h.bf16 %v3178_v27 }
 0x24c   : > { %3368 = vmatpush3.bf16.xpose.msra.mxu1 %v1245_v37  ;;  %3369 = vmatprep.mubr.msk.bf16.mxu1 %vm3904_vm1, %v3902_v47 }
 0x24d   : > { %3379 = vmatprep.subr.bf16.mxu1 %v3902_v47 }
 0x24e   : > { %v474_v39 = vpop.permute.xlu1 %473 }
 0x24f   : > { %3364 = vmatmul.mubr.msk.bf16.vlgmr.msra.gmra.mxu0 %vm505_vm2, %v472_v38  ;;  %v1801_v41 = vpop.permute.xlu0 %1800 }
 0x250   : > { %3375 = vmatprep.mubr.msk.bf16.mxu0 %vm3904_vm1, %v3902_v47 }
 0x252   : > { %v1754_v40 = vpop.permute.xlu1 %1753 }
 0x253   : > { %3370 = vmatmul.mubr.msk.bf16.vlgmr.msra.gmra.mxu1 %vm505_vm2, %v474_v39  ;;  %3374 = vmatpush3.bf16.msra.mxu0 %v1754_v40  ;;  %v3180_v39 = vld [vmem:[#allocation8 + $0x38] sm:$0xff]  }
 0x254   : > { %3380 = vmatpush3.bf16.msra.mxu1 %v1801_v41  ;;  %3385 = vmatprep.subr.bf16.mxu0 %v3902_v47  ;;  %v3129_v41 = vunpack.c.h.bf16 %v3177_v29  ;;  %v3149_v29 = vunpack.c.h.bf16 %v3182_v4 }
 0x255   : > { %3381 = vmatprep.mubr.msk.bf16.mxu1 %vm3904_vm1, %v3902_v47  ;;  %3391 = vmatprep.subr.bf16.mxu1 %v3902_v47 }
 0x289   : > { %v546_v44 = vpop.f32.mrf.mxu1 }
 0x28a   : > { %v4328_v45 = vadd.f32 %v3112_v43, %v546_v44  ;;  %v3179_v44 = vld [vmem:[#allocation8 + $0x30] sm:$0xff]  }
 0x28b   : > { %v3281_v48 = vpop.f32.mrf.mxu1 }
 0x28c   : > { %v1385_v49 = vsel %vm1384_vm3, %v4328_v45, -inf }
 0x28d   : > { %1386 = vmax.xlane.f32.xlu0 %v1385_v49  ;;  %v549_v50 = vpop.f32.mrf.mxu1  ;;  %v3140_v49 = vunpack.c.l.bf16 %v3180_v39 }
 0x28e   : > { %v4334_v0 = vadd.f32 %v3113_v52, %v549_v50 }
 0x28f   : > { %v3282_v53 = vpop.f32.mrf.mxu1 }
 0x290   : > { %v644_v55 = vpop.f32.mrf.mxu0  ;;  %v1388_v14 = vsel %vm1384_vm3, %v4334_v0, -inf  ;;  %v3136_v53 = vunpack.c.l.bf16 %v3179_v44 }
 0x291   : > { %v595_v58 = vpop.f32.mrf.mxu1  ;;  %v4332_v60 = vadd.f32 %v3120_v51, %v644_v55 }
 0x292   : > { %v3293_v63 = vpop.f32.mrf.mxu0  ;;  %v4340_v10 = vadd.f32 %v3116_v1, %v595_v58  ;;  %v3141_v1 = vunpack.c.h.bf16 %v3180_v39  ;;  %v3183_v39 = vld [vmem:[#allocation8 + $0x50] sm:$0xff]  }
 0x293   : > { %v3287_v2 = vpop.f32.mrf.mxu1  ;;  %v1397_v3 = vsel %vm1384_vm3, %v4332_v60, -inf }
 0x294   : > { %1398 = vmax.xlane.f32.xlu1 %v1397_v3  ;;  %v647_v5 = vpop.f32.mrf.mxu0  ;;  %v1391_v19 = vsel %vm1384_vm3, %v4340_v10, -inf }
 0x295   : > { %v598_v6 = vpop.f32.mrf.mxu1  ;;  %v4338_v7 = vadd.f32 %v3121_v62, %v647_v5 }
 0x296   : > { %v3294_v8 = vpop.f32.mrf.mxu0  ;;  %v4348_v17 = vadd.f32 %v3117_v11, %v598_v6  ;;  %v3137_v6 = vunpack.c.h.bf16 %v3179_v44 }
 0x297   : > { %v3288_v12 = vpop.f32.mrf.mxu1  ;;  %v1400_v13 = vsel %vm1384_vm3, %v4338_v7, -inf }
 0x298   : > { %1401 = vmax.xlane.f32.xlu0 %v1400_v13  ;;  %1389 = vmax.xlane.f32.xlu1 %v1388_v14  ;;  %v1394_v25 = vsel %vm1384_vm3, %v4348_v17, -inf  ;;  %v3181_v12 = vld [vmem:[#allocation8 + $0x40] sm:$0xff]  }
 0x299   : > { %v693_v15 = vpop.f32.mrf.mxu1 }
 0x29a   : > { %v4346_v16 = vadd.f32 %v3124_v9, %v693_v15  ;;  %v3148_v15 = vunpack.c.l.bf16 %v3182_v4 }
 0x29b   : > { %v3299_v18 = vpop.f32.mrf.mxu1 }
 0x29c   : > { %1392 = vmax.xlane.f32.xlu0 %v1391_v19  ;;  %v1403_v21 = vsel %vm1384_vm3, %v4346_v16, -inf }
 0x29d   : > { %1404 = vmax.xlane.f32.xlu1 %v1403_v21  ;;  %v696_v22 = vpop.f32.mrf.mxu1 }
 0x29e   : > { %v4354_v23 = vadd.f32 %v3125_v20, %v696_v22  ;;  %v4384_v20 = vpop.permute.xlu1 %1847  ;;  %v3144_v22 = vunpack.c.l.bf16 %v3181_v12 }
 0x29f   : > { %v3300_v24 = vpop.f32.mrf.mxu1 }
 0x2a0   : > { %1395 = vmax.xlane.f32.xlu0 %v1394_v25  ;;  %v1406_v26 = vsel %vm1384_vm3, %v4354_v23, -inf }
 0x2a4   : > { %1407 = vmax.xlane.f32.xlu0 %v1406_v26 }
 0x2e7   : > { %v742_v28 = vpop.f32.mrf.mxu0 }
 0x2e8   : > { %v4362_v40 = vadd.f32 %v3128_v32, %v742_v28  ;;  %v3184_v32 = vld [vmem:[#allocation8 + $0x58] sm:$0xff]  }
 0x2e9   : > { %v3305_v31 = vpop.f32.mrf.mxu0 }
 0x2ea   : > { %v1409_v54 = vsel %vm1384_vm3, %v4362_v40, -inf }
 0x2eb   : > { %v745_v33 = vpop.f32.mrf.mxu0  ;;  %v791_v34 = vpop.f32.mrf.mxu1 }
 0x2ec   : > { %v4360_v35 = vadd.f32 %v3132_v30, %v791_v34  ;;  %v4368_v52 = vadd.f32 %v3129_v41, %v745_v33  ;;  %v3145_v34 = vunpack.c.h.bf16 %v3181_v12  ;;  %v3153_v12 = vunpack.c.h.bf16 %v3183_v39 }
 0x2ed   : > { %v3306_v37 = vpop.f32.mrf.mxu0  ;;  %v3311_v38 = vpop.f32.mrf.mxu1 }
 0x2ee   : > { %v1415_v42 = vsel %vm1384_vm3, %v4360_v35, -inf  ;;  %v1412_v8 = vsel %vm1384_vm3, %v4368_v52, -inf }
 0x2ef   : > { %v840_v43 = vpop.f32.mrf.mxu0  ;;  %1416 = vmax.xlane.f32.xlu1 %v1415_v42  ;;  %v794_v46 = vpop.f32.mrf.mxu1 }
 0x2f0   : > { %v4366_v48 = vadd.f32 %v3133_v36, %v794_v46  ;;  %v4376_v5 = vadd.f32 %v3136_v53, %v840_v43  ;;  %v4400_v42 = vpop.permute.xlu0 %1894  ;;  %v4402_v43 = vpop.permute.xlu1 %2270  ;;  %v3156_v46 = vunpack.c.l.bf16 %v3184_v32  ;;  %v3152_v53 = vunpack.c.l.bf16 %v3183_v39 }
 0x2f1   : > { %v3312_v50 = vpop.f32.mrf.mxu1  ;;  %v3317_v51 = vpop.f32.mrf.mxu0 }
 0x2f2   : > { %v1418_v55 = vsel %vm1384_vm3, %v4366_v48, -inf  ;;  %v1421_v24 = vsel %vm1384_vm3, %v4376_v5, -inf }
 0x2f3   : > { %v843_v58 = vpop.f32.mrf.mxu0  ;;  %1410 = vmax.xlane.f32.xlu1 %v1409_v54  ;;  %1419 = vmax.xlane.f32.xlu0 %v1418_v55  ;;  %v889_v62 = vpop.f32.mrf.mxu1 }
 0x2f4   : > { %v4374_v63 = vadd.f32 %v3140_v49, %v889_v62  ;;  %v4386_v21 = vadd.f32 %v3137_v6, %v843_v58  ;;  %v3186_v6 = vld [vmem:[#allocation8 + $0x68] sm:$0xff]  }
 0x2f5   : > { %v3318_v2 = vpop.f32.mrf.mxu0  ;;  %v3323_v3 = vpop.f32.mrf.mxu1 }
 0x2f6   : > { %v1427_v9 = vsel %vm1384_vm3, %v4374_v63, -inf  ;;  %v1424_v36 = vsel %vm1384_vm3, %v4386_v21, -inf  ;;  %v3157_v2 = vunpack.c.h.bf16 %v3184_v32 }
 0x2f7   : > { %v938_v11 = vpop.f32.mrf.mxu0  ;;  %1413 = vmax.xlane.f32.xlu0 %v1412_v8  ;;  %1428 = vmax.xlane.f32.xlu1 %v1427_v9  ;;  %v892_v13 = vpop.f32.mrf.mxu1 }
 0x2f8   : > { %v4382_v14 = vadd.f32 %v3141_v1, %v892_v13  ;;  %v4394_v33 = vadd.f32 %v3144_v22, %v938_v11  ;;  %v4414_v8 = vpop.permute.xlu0 %1988  ;;  %v4416_v9 = vpop.permute.xlu1 %1941 }
 0x2f9   : > { %v3324_v18 = vpop.f32.mrf.mxu1  ;;  %v3329_v19 = vpop.f32.mrf.mxu0 }
 0x2fa   : > { %v1430_v25 = vsel %vm1384_vm3, %v4382_v14, -inf  ;;  %v1433_v54 = vsel %vm1384_vm3, %v4394_v33, -inf  ;;  %v3185_v19 = vld [vmem:[#allocation8 + $0x60] sm:$0xff]  }
 0x2fb   : > { %v941_v26 = vpop.f32.mrf.mxu0  ;;  %1422 = vmax.xlane.f32.xlu1 %v1421_v24  ;;  %1431 = vmax.xlane.f32.xlu0 %v1430_v25  ;;  %v987_v27 = vpop.f32.mrf.mxu1  ;;  %v3164_v25 = vunpack.c.l.bf16 %v3186_v6 }
 0x2fc   : > { %v4392_v28 = vadd.f32 %v3148_v15, %v987_v27  ;;  %v4406_v51 = vadd.f32 %v3145_v34, %v941_v26 }
 0x2fd   : > { %v3330_v30 = vpop.f32.mrf.mxu0  ;;  %v3335_v31 = vpop.f32.mrf.mxu1 }
 0x2fe   : > { %v1439_v37 = vsel %vm1384_vm3, %v4392_v28, -inf  ;;  %v1436_v13 = vsel %vm1384_vm3, %v4406_v51, -inf  ;;  %v3160_v30 = vunpack.c.l.bf16 %v3185_v19 }
 0x2ff   : > { %v1036_v38 = vpop.f32.mrf.mxu0  ;;  %1425 = vmax.xlane.f32.xlu0 %v1424_v36  ;;  %1440 = vmax.xlane.f32.xlu1 %v1439_v37  ;;  %v990_v41 = vpop.f32.mrf.mxu1 }
 0x300   : > { %v4404_v44 = vadd.f32 %v3149_v29, %v990_v41  ;;  %v4418_v11 = vadd.f32 %v3152_v53, %v1036_v38  ;;  %v4432_v37 = vpop.permute.xlu0 %2082  ;;  %v4434_v38 = vpop.permute.xlu1 %2035  ;;  %v3165_v41 = vunpack.c.h.bf16 %v3186_v6 }
 0x301   : > { %v3336_v49 = vpop.f32.mrf.mxu1  ;;  %v3341_v50 = vpop.f32.mrf.mxu0 }
 0x302   : > { %v1442_v55 = vsel %vm1384_vm3, %v4404_v44, -inf  ;;  %v1445_v31 = vsel %vm1384_vm3, %v4418_v11, -inf  ;;  %v3188_v50 = vld [vmem:[#allocation8 + $0x78] sm:$0xff]  }
 0x303   : > { %v1039_v58 = vpop.f32.mrf.mxu0  ;;  %1434 = vmax.xlane.f32.xlu1 %v1433_v54  ;;  %1443 = vmax.xlane.f32.xlu0 %v1442_v55  ;;  %v1085_v62 = vpop.f32.mrf.mxu1  ;;  %v3161_v54 = vunpack.c.h.bf16 %v3185_v19  ;;  %v3172_v6 = vunpack.c.l.bf16 %v3188_v50 }
 0x304   : > { %v4412_v1 = vadd.f32 %v3156_v46, %v1085_v62  ;;  %v4426_v29 = vadd.f32 %v3153_v12, %v1039_v58 }
 0x305   : > { %v3342_v3 = vpop.f32.mrf.mxu0  ;;  %v3347_v4 = vpop.f32.mrf.mxu1 }
 0x306   : > { %v1451_v15 = vsel %vm1384_vm3, %v4412_v1, -inf  ;;  %v1448_v55 = vsel %vm1384_vm3, %v4426_v29, -inf }
 0x307   : > { %v1134_v18 = vpop.f32.mrf.mxu0  ;;  %1437 = vmax.xlane.f32.xlu0 %v1436_v13  ;;  %1452 = vmax.xlane.f32.xlu1 %v1451_v15  ;;  %v1088_v22 = vpop.f32.mrf.mxu1 }
 0x308   : > { %v4424_v24 = vadd.f32 %v3157_v2, %v1088_v22  ;;  %v4438_v53 = vadd.f32 %v3160_v30, %v1134_v18  ;;  %v3187_v2 = vld [vmem:[#allocation8 + $0x70] sm:$0xff]   ;;  %v4446_v15 = vpop.permute.xlu0 %2176  ;;  %v4448_v18 = vpop.permute.xlu1 %2129 }
 0x309   : > { %v3348_v26 = vpop.f32.mrf.mxu1  ;;  %v3353_v27 = vpop.f32.mrf.mxu0  ;;  %v3168_v22 = vunpack.c.l.bf16 %v3187_v2 }
 0x30a   : > { %v1454_v32 = vsel %vm1384_vm3, %v4424_v24, -inf }
 0x30b   : > { %v1137_v34 = vpop.f32.mrf.mxu0  ;;  %1446 = vmax.xlane.f32.xlu1 %v1445_v31  ;;  %1455 = vmax.xlane.f32.xlu0 %v1454_v32  ;;  %v1183_v36 = vpop.f32.mrf.mxu1  ;;  %v3173_v32 = vunpack.c.h.bf16 %v3188_v50 }
 0x30c   : > { %v4436_v39 = vadd.f32 %v3164_v25, %v1183_v36  ;;  %v4450_v19 = vadd.f32 %v3161_v54, %v1137_v34  ;;  %v1457_v25 = vsel %vm1384_vm3, %v4438_v53, -inf  ;;  %v3169_v34 = vunpack.c.h.bf16 %v3187_v2  ;;  %v4467_v50 = vpop.permute.xlu1 %2223 }
 0x30d   : > { %v3354_v46 = vpop.f32.mrf.mxu0  ;;  %v3359_v49 = vpop.f32.mrf.mxu1 }
 0x30e   : > { %v1463_v58 = vsel %vm1384_vm3, %v4436_v39, -inf  ;;  %v1460_v54 = vsel %vm1384_vm3, %v4450_v19, -inf }
 0x30f   : > { %v1232_v62 = vpop.f32.mrf.mxu0  ;;  %1449 = vmax.xlane.f32.xlu0 %v1448_v55  ;;  %1464 = vmax.xlane.f32.xlu1 %v1463_v58  ;;  %v1186_v3 = vpop.f32.mrf.mxu1 }
 0x310   : > { %v4444_v4 = vadd.f32 %v3165_v41, %v1186_v3  ;;  %v4458_v46 = vadd.f32 %v3168_v22, %v1232_v62 }
 0x311   : > { %v3360_v12 = vpop.f32.mrf.mxu1  ;;  %v3365_v13 = vpop.f32.mrf.mxu0 }
 0x312   : > { %v1466_v26 = vsel %vm1384_vm3, %v4444_v4, -inf  ;;  %v1469_v2 = vsel %vm1384_vm3, %v4458_v46, -inf }
 0x313   : > { %v1235_v27 = vpop.f32.mrf.mxu0  ;;  %1458 = vmax.xlane.f32.xlu1 %v1457_v25  ;;  %1467 = vmax.xlane.f32.xlu0 %v1466_v26  ;;  %v1281_v30 = vpop.f32.mrf.mxu1 }
 0x314   : > { %v4456_v31 = vadd.f32 %v3172_v6, %v1281_v30  ;;  %v4469_v13 = vadd.f32 %v3169_v34, %v1235_v27 }
 0x315   : > { %v3366_v36 = vpop.f32.mrf.mxu0  ;;  %v3371_v41 = vpop.f32.mrf.mxu1 }
 0x316   : > { %v1387_v49 = vpop.xlane.xlu0 %1386  ;;  %v1475_v55 = vsel %vm1384_vm3, %v4456_v31, -inf  ;;  %v1472_v26 = vsel %vm1384_vm3, %v4469_v13, -inf }
 0x317   : > { %v1481_v58 = vsub.f32 %v4328_v45, %v1387_v49  ;;  %1461 = vmax.xlane.f32.xlu0 %v1460_v54  ;;  %1476 = vmax.xlane.f32.xlu1 %v1475_v55  ;;  %v1284_v3 = vpop.f32.mrf.mxu1 }
 0x318   : > { %v4465_v6 = vadd.f32 %v3173_v32, %v1284_v3 }
 0x319   : > { %v1513_v12 = vmul.f32 1.442695, %v1481_v58  ;;  %v3372_v62 = vpop.f32.mrf.mxu1 }
 0x31a   : > { %v1478_v22 = vsel %vm1384_vm3, %v4465_v6, -inf }
 0x31b   : > { %3585 = vpow2.f32 %v1513_v12  ;;  %1470 = vmax.xlane.f32.xlu1 %v1469_v2  ;;  %1479 = vmax.xlane.f32.xlu0 %v1478_v22 }
 0x31d   : > { %v1399_v45 = vpop.xlane.xlu1 %1398 }
 0x31e   : > { %v1485_v25 = vsub.f32 %v4332_v60, %v1399_v45 }
 0x31f   : > { %1473 = vmax.xlane.f32.xlu0 %v1472_v26 }
 0x320   : > { %v1521_v30 = vmul.f32 1.442695, %v1485_v25 }
 0x321   : > { %v1402_v34 = vpop.xlane.xlu0 %1401  ;;  %v1390_v60 = vpop.xlane.xlu1 %1389 }
 0x322   : > { %3587 = vpow2.f32 %v1521_v30  ;;  %v1482_v54 = vsub.f32 %v4334_v0, %v1390_v60  ;;  %v1486_v58 = vsub.f32 %v4338_v7, %v1402_v34 }
 0x324   : > { %v1515_v3 = vmul.f32 1.442695, %v1482_v54  ;;  %v1523_v12 = vmul.f32 1.442695, %v1486_v58 }
 0x325   : > { %v1393_v49 = vpop.xlane.xlu0 %1392 }
 0x326   : > { %3589 = vpow2.f32 %v1515_v3  ;;  %v1483_v0 = vsub.f32 %v4340_v10, %v1393_v49  ;;  %v1405_v25 = vpop.xlane.xlu1 %1404 }
 0x327   : > { %3591 = vpow2.f32 %v1523_v12 }
 0x328   : > { %v4478_v27 = vpop.eup %3585  ;;  %v1517_v26 = vmul.f32 1.442695, %v1483_v0 }
 0x329   : > { %v1577_v32 = vsel %vm1384_vm3, %v4478_v27, 0.0  ;;  %v1396_v55 = vpop.xlane.xlu0 %1395 }
 0x32a   : > { %1578 = vadd.xlane.f32.xlu1 %v1577_v32  ;;  %v1484_v62 = vsub.f32 %v4348_v17, %v1396_v55 }
 0x32c   : > { %v1519_v22 = vmul.f32 1.442695, %v1484_v62 }
 0x32d   : > { %v1408_v2 = vpop.xlane.xlu0 %1407 }
 0x32e   : > { %3593 = vpow2.f32 %v1519_v22 }
 0x32f   : > { %v4482_v36 = vpop.eup %3587 }
 0x330   : > { %v1589_v41 = vsel %vm1384_vm3, %v4482_v36, 0.0 }
 0x331   : > { %1590 = vadd.xlane.f32.xlu1 %v1589_v41 }
 0x333   : > { %v4495_v7 = vpop.eup %3589 }
 0x334   : > { %v1580_v30 = vsel %vm1384_vm3, %v4495_v7, 0.0  ;;  %v4500_v17 = vpop.eup %3591 }
 0x335   : > { %2317 = vrot.lane.b32.xlu0 %v4185_v57, %s3907_s15  ;;  %v1488_v57 = vsub.f32 %v4354_v23, %v1408_v2  ;;  %v1592_v23 = vsel %vm1384_vm3, %v4500_v17, 0.0 }
 0x337   : > { %v1527_v45 = vmul.f32 1.442695, %v1488_v57 }
 0x339   : > { %3595 = vpow2.f32 %v1527_v45 }
 0x33a   : > { %3597 = vpow2.f32 %v1517_v26 }
 0x33b   : > { %v4504_v41 = vpop.eup %3593 }
 0x33c   : > { %v1586_v10 = vsel %vm1384_vm3, %v4504_v41, 0.0 }
 0x342   : > { %2364 = vrot.lane.b32.xlu1 %v4183_v56, %s3907_s15  ;;  %v1487_v56 = vsub.f32 %v4346_v16, %v1405_v25 }
 0x344   : > { %v1525_v32 = vmul.f32 1.442695, %v1487_v56 }
 0x346   : > { %3599 = vpow2.f32 %v1525_v32  ;;  %v4508_v34 = vpop.eup %3595 }
 0x347   : > { %v1598_v16 = vsel %vm1384_vm3, %v4508_v34, 0.0  ;;  %v4512_v60 = vpop.eup %3597 }
 0x348   : > { %v1583_v49 = vsel %vm1384_vm3, %v4512_v60, 0.0 }
 0x353   : > { %v4516_v54 = vpop.eup %3599 }
 0x354   : > { %1581 = vadd.xlane.f32.xlu0 %v1580_v30  ;;  %v1595_v55 = vsel %vm1384_vm3, %v4516_v54, 0.0 }
 0x358   : > { %1593 = vadd.xlane.f32.xlu0 %v1592_v23 }
 0x35c   : > { %1587 = vadd.xlane.f32.xlu0 %v1586_v10 }
 0x360   : > { %1599 = vadd.xlane.f32.xlu0 %v1598_v16 }
 0x366   : > { %1584 = vadd.xlane.f32.xlu1 %v1583_v49 }
 0x36a   : > { %1596 = vadd.xlane.f32.xlu1 %v1595_v55 }
 0x378   : > { %v1417_v58 = vpop.xlane.xlu1 %1416 }
 0x379   : > { %v1491_v3 = vsub.f32 %v4360_v35, %v1417_v58 }
 0x37b   : > { %v1533_v12 = vmul.f32 1.442695, %v1491_v3 }
 0x37c   : > { %v1411_v62 = vpop.xlane.xlu1 %1410  ;;  %v1420_v2 = vpop.xlane.xlu0 %1419 }
 0x37d   : > { %3601 = vpow2.f32 %v1533_v12  ;;  %v1489_v22 = vsub.f32 %v4362_v40, %v1411_v62  ;;  %v1492_v57 = vsub.f32 %v4366_v48, %v1420_v2 }
 0x37f   : > { %v1529_v45 = vmul.f32 1.442695, %v1489_v22  ;;  %v1535_v0 = vmul.f32 1.442695, %v1492_v57 }
 0x380   : > { %v1414_v25 = vpop.xlane.xlu0 %1413  ;;  %v1429_v26 = vpop.xlane.xlu1 %1428 }
 0x381   : > { %3603 = vpow2.f32 %v1529_v45  ;;  %v1490_v56 = vsub.f32 %v4368_v52, %v1414_v25  ;;  %v1495_v30 = vsub.f32 %v4374_v63, %v1429_v26 }
 0x382   : > { %3605 = vpow2.f32 %v1535_v0 }
 0x383   : > { %v1531_v32 = vmul.f32 1.442695, %v1490_v56  ;;  %v1541_v35 = vmul.f32 1.442695, %v1495_v30 }
 0x384   : > { %v1423_v23 = vpop.xlane.xlu1 %1422  ;;  %v1432_v10 = vpop.xlane.xlu0 %1431 }
 0x385   : > { %3607 = vpow2.f32 %v1531_v32  ;;  %v1493_v16 = vsub.f32 %v4376_v5, %v1423_v23  ;;  %v1496_v40 = vsub.f32 %v4382_v14, %v1432_v10 }
 0x386   : > { %3609 = vpow2.f32 %v1541_v35 }
 0x387   : > { %v1537_v48 = vmul.f32 1.442695, %v1493_v16  ;;  %v1543_v49 = vmul.f32 1.442695, %v1496_v40 }
 0x388   : > { %v1426_v55 = vpop.xlane.xlu0 %1425  ;;  %v1441_v58 = vpop.xlane.xlu1 %1440 }
 0x389   : > { %3611 = vpow2.f32 %v1537_v48  ;;  %v1494_v52 = vsub.f32 %v4386_v21, %v1426_v55  ;;  %v1499_v63 = vsub.f32 %v4392_v28, %v1441_v58 }
 0x38a   : > { %v4529_v3 = vpop.eup %3601  ;;  %3613 = vpow2.f32 %v1543_v49 }
 0x38b   : > { %v1539_v12 = vmul.f32 1.442695, %v1494_v52  ;;  %v1549_v62 = vmul.f32 1.442695, %v1499_v63  ;;  %v1607_v5 = vsel %vm1384_vm3, %v4529_v3, 0.0 }
 0x38c   : > { %v1435_v2 = vpop.xlane.xlu1 %1434  ;;  %v1444_v14 = vpop.xlane.xlu0 %1443  ;;  %1608 = vadd.xlane.f32.xlu1 %v1607_v5 }
 0x38d   : > { %3615 = vpow2.f32 %v1539_v12  ;;  %v1497_v22 = vsub.f32 %v4394_v33, %v1435_v2  ;;  %v1500_v57 = vsub.f32 %v4404_v44, %v1444_v14 }
 0x38e   : > { %v4535_v45 = vpop.eup %3603  ;;  %3617 = vpow2.f32 %v1549_v62 }
 0x38f   : > { %v4537_v21 = vpop.eup %3605  ;;  %v1545_v28 = vmul.f32 1.442695, %v1497_v22  ;;  %v1551_v0 = vmul.f32 1.442695, %v1500_v57  ;;  %v1601_v25 = vsel %vm1384_vm3, %v4535_v45, 0.0 }
 0x390   : > { %v1438_v26 = vpop.xlane.xlu0 %1437  ;;  %v1453_v56 = vpop.xlane.xlu1 %1452  ;;  %1602 = vadd.xlane.f32.xlu1 %v1601_v25  ;;  %v1610_v30 = vsel %vm1384_vm3, %v4537_v21, 0.0 }
 0x391   : > { %3619 = vpow2.f32 %v1545_v28  ;;  %v1498_v33 = vsub.f32 %v4406_v51, %v1438_v26  ;;  %v1503_v44 = vsub.f32 %v4412_v1, %v1453_v56  ;;  %1611 = vadd.xlane.f32.xlu0 %v1610_v30 }
 0x392   : > { %v4545_v32 = vpop.eup %3607  ;;  %3621 = vpow2.f32 %v1551_v0 }
 0x393   : > { %v4547_v35 = vpop.eup %3609  ;;  %v1547_v23 = vmul.f32 1.442695, %v1498_v33  ;;  %v1557_v10 = vmul.f32 1.442695, %v1503_v44  ;;  %v1604_v16 = vsel %vm1384_vm3, %v4545_v32, 0.0 }
 0x394   : > { %v1447_v40 = vpop.xlane.xlu1 %1446  ;;  %v1456_v48 = vpop.xlane.xlu0 %1455  ;;  %v1619_v49 = vsel %vm1384_vm3, %v4547_v35, 0.0 }
 0x395   : > { %3623 = vpow2.f32 %v1547_v23  ;;  %v1501_v51 = vsub.f32 %v4418_v11, %v1447_v40  ;;  %v1504_v1 = vsub.f32 %v4424_v24, %v1456_v48  ;;  %1620 = vadd.xlane.f32.xlu1 %v1619_v49  ;;  %1605 = vadd.xlane.f32.xlu0 %v1604_v16 }
 0x396   : > { %v4555_v55 = vpop.eup %3611  ;;  %3625 = vpow2.f32 %v1557_v10 }
 0x397   : > { %v4557_v58 = vpop.eup %3613  ;;  %v1553_v52 = vmul.f32 1.442695, %v1501_v51  ;;  %v1559_v63 = vmul.f32 1.442695, %v1504_v1  ;;  %v1613_v12 = vsel %vm1384_vm3, %v4555_v55, 0.0 }
 0x398   : > { %v1450_v62 = vpop.xlane.xlu0 %1449  ;;  %v1465_v5 = vpop.xlane.xlu1 %1464  ;;  %v1622_v2 = vsel %vm1384_vm3, %v4557_v58, 0.0 }
 0x399   : > { %3627 = vpow2.f32 %v1553_v52  ;;  %v1502_v11 = vsub.f32 %v4426_v29, %v1450_v62  ;;  %v1507_v24 = vsub.f32 %v4436_v39, %v1465_v5  ;;  %1614 = vadd.xlane.f32.xlu1 %v1613_v12  ;;  %1623 = vadd.xlane.f32.xlu0 %v1622_v2 }
 0x39a   : > { %v4565_v14 = vpop.eup %3615  ;;  %3629 = vpow2.f32 %v1559_v63 }
 0x39b   : > { %v4567_v22 = vpop.eup %3617  ;;  %v1555_v57 = vmul.f32 1.442695, %v1502_v11  ;;  %v1565_v28 = vmul.f32 1.442695, %v1507_v24  ;;  %v1616_v0 = vsel %vm1384_vm3, %v4565_v14, 0.0 }
 0x39c   : > { %v1459_v25 = vpop.xlane.xlu1 %1458  ;;  %v1468_v26 = vpop.xlane.xlu0 %1467  ;;  %v1631_v56 = vsel %vm1384_vm3, %v4567_v22, 0.0 }
 0x39d   : > { %3631 = vpow2.f32 %v1555_v57  ;;  %v1505_v29 = vsub.f32 %v4438_v53, %v1459_v25  ;;  %v1508_v39 = vsub.f32 %v4444_v4, %v1468_v26  ;;  %1632 = vadd.xlane.f32.xlu1 %v1631_v56  ;;  %1617 = vadd.xlane.f32.xlu0 %v1616_v0 }
 0x39e   : > { %v4575_v30 = vpop.eup %3619  ;;  %3633 = vpow2.f32 %v1565_v28 }
 0x39f   : > { %v4577_v33 = vpop.eup %3621  ;;  %v1561_v44 = vmul.f32 1.442695, %v1505_v29  ;;  %v1567_v23 = vmul.f32 1.442695, %v1508_v39  ;;  %v1625_v10 = vsel %vm1384_vm3, %v4575_v30, 0.0 }
 0x3a0   : > { %v1462_v16 = vpop.xlane.xlu0 %1461  ;;  %v1477_v40 = vpop.xlane.xlu1 %1476  ;;  %v1634_v48 = vsel %vm1384_vm3, %v4577_v33, 0.0 }
 0x3a1   : > { %3635 = vpow2.f32 %v1561_v44  ;;  %v1506_v53 = vsub.f32 %v4450_v19, %v1462_v16  ;;  %1626 = vadd.xlane.f32.xlu1 %v1625_v10  ;;  %v1511_v4 = vsub.f32 %v4456_v31, %v1477_v40  ;;  %1635 = vadd.xlane.f32.xlu0 %v1634_v48 }
 0x3a2   : > { %v4585_v49 = vpop.eup %3623  ;;  %3637 = vpow2.f32 %v1567_v23 }
 0x3a3   : > { %v4587_v51 = vpop.eup %3625  ;;  %v1563_v1 = vmul.f32 1.442695, %v1506_v53  ;;  %v1573_v52 = vmul.f32 1.442695, %v1511_v4  ;;  %v1628_v63 = vsel %vm1384_vm3, %v4585_v49, 0.0 }
 0x3a4   : > { %v1643_v12 = vsel %vm1384_vm3, %v4587_v51, 0.0  ;;  %v1471_v62 = vpop.xlane.xlu1 %1470  ;;  %v1480_v5 = vpop.xlane.xlu0 %1479 }
 0x3a5   : > { %3639 = vpow2.f32 %v1563_v1  ;;  %1644 = vadd.xlane.f32.xlu1 %v1643_v12  ;;  %v1509_v19 = vsub.f32 %v4458_v46, %v1471_v62  ;;  %1629 = vadd.xlane.f32.xlu0 %v1628_v63  ;;  %v1512_v31 = vsub.f32 %v4465_v6, %v1480_v5 }
 0x3a6   : > { %v4595_v2 = vpop.eup %3627  ;;  %3641 = vpow2.f32 %v1573_v52 }
 0x3a7   : > { %v4597_v11 = vpop.eup %3629  ;;  %v1569_v24 = vmul.f32 1.442695, %v1509_v19  ;;  %v1575_v57 = vmul.f32 1.442695, %v1512_v31  ;;  %v1637_v28 = vsel %vm1384_vm3, %v4595_v2, 0.0 }
 0x3a8   : > { %v1646_v0 = vsel %vm1384_vm3, %v4597_v11, 0.0  ;;  %v1474_v25 = vpop.xlane.xlu0 %1473 }
 0x3a9   : > { %3643 = vpow2.f32 %v1569_v24  ;;  %1638 = vadd.xlane.f32.xlu1 %v1637_v28  ;;  %1647 = vadd.xlane.f32.xlu0 %v1646_v0  ;;  %v1510_v46 = vsub.f32 %v4469_v13, %v1474_v25 }
 0x3aa   : > { %v4604_v6 = vpop.eup %3631  ;;  %3645 = vpow2.f32 %v1575_v57 }
 0x3ab   : > { %v4606_v26 = vpop.eup %3633  ;;  %v1571_v56 = vmul.f32 1.442695, %v1510_v46  ;;  %v1640_v29 = vsel %vm1384_vm3, %v4604_v6, 0.0 }
 0x3ac   : > { %v1655_v39 = vsel %vm1384_vm3, %v4606_v26, 0.0  ;;  %v4644_v5 = vpop.permute.xlu0 %2317 }
 0x3ad   : > { %3647 = vpow2.f32 %v1571_v56  ;;  %1656 = vadd.xlane.f32.xlu1 %v1655_v39  ;;  %1641 = vadd.xlane.f32.xlu0 %v1640_v29 }
 0x3ae   : > { %v4612_v44 = vpop.eup %3635 }
 0x3af   : > { %v4614_v23 = vpop.eup %3637  ;;  %v1649_v13 = vsel %vm1384_vm3, %v4612_v44, 0.0 }
 0x3b0   : > { %v1658_v10 = vsel %vm1384_vm3, %v4614_v23, 0.0 }
 0x3b1   : > { %1650 = vadd.xlane.f32.xlu1 %v1649_v13  ;;  %1659 = vadd.xlane.f32.xlu0 %v1658_v10 }
 0x3b2   : > { %v4620_v16 = vpop.eup %3639 }
 0x3b3   : > { %v4622_v40 = vpop.eup %3641  ;;  %v1652_v48 = vsel %vm1384_vm3, %v4620_v16, 0.0  ;;  %v1579_v19 = vpop.xlane.xlu1 %1578 }
 0x3b4   : > { %v1667_v53 = vsel %vm1384_vm3, %v4622_v40, 0.0  ;;  %3649 = vrcp.f32 %v1579_v19 }
 0x3b5   : > { %1668 = vadd.xlane.f32.xlu1 %v1667_v53  ;;  %1653 = vadd.xlane.f32.xlu0 %v1652_v48 }
 0x3b6   : > { %v4628_v4 = vpop.eup %3643 }
 0x3b7   : > { %v4630_v1 = vpop.eup %3645  ;;  %v1661_v52 = vsel %vm1384_vm3, %v4628_v4, 0.0 }
 0x3b8   : > { %v1670_v63 = vsel %vm1384_vm3, %v4630_v1, 0.0 }
 0x3b9   : > { %1662 = vadd.xlane.f32.xlu1 %v1661_v52  ;;  %1671 = vadd.xlane.f32.xlu0 %v1670_v63 }
 0x3ba   : > { %v4636_v12 = vpop.eup %3647  ;;  %v1591_v24 = vpop.xlane.xlu1 %1590 }
 0x3bb   : > { %v1664_v62 = vsel %vm1384_vm3, %v4636_v12, 0.0 }
 0x3bd   : > { %1665 = vadd.xlane.f32.xlu0 %v1664_v62 }
 0x3be   : > { %v4646_v25 = vpop.permute.xlu1 %2364 }
 0x3c1   : > { %v3650_v28 = vpop.eup %3649 }
 0x3ca   : > { %2458 = vrot.lane.b32.xlu1 %v4198_v61, %s3907_s15  ;;  %v1705_v61 = vmul.f32 %v3650_v28, %v4478_v27 }
 0x3d3   : > { %2411 = vrot.lane.b32.xlu0 %v4191_v59, %s3907_s15  ;;  %s3823_s15 = sshll.u32 %s3911_s30, 4  ;;  %s3824_s15 = int_to_ptr.vmem [resolvable:$false] %s3823_s15 }
 0x3d4   : > { %p3826_p5 = scmp.lt.s32.totalorder %s4826_s27, %s3824_s15 }
 0x3dd   : > { %v1582_v31 = vpop.xlane.xlu0 %1581 }
 0x3de   : > { %3651 = vrcp.f32 %v1582_v31 }
 0x3e1   : > { %v1594_v57 = vpop.xlane.xlu0 %1593 }
 0x3e2   : > { %3653 = vrcp.f32 %v1594_v57 }
 0x3e3   : > { %3655 = vrcp.f32 %v1591_v24 }
 0x3e5   : > { %v1588_v46 = vpop.xlane.xlu0 %1587 }
 0x3e6   : > { %3657 = vrcp.f32 %v1588_v46 }
 0x3e9   : > { %v1600_v27 = vpop.xlane.xlu0 %1599 }
 0x3eb   : > { %v3652_v0 = vpop.eup %3651 }
 0x3ec   : > { %v1706_v56 = vmul.f32 %v3652_v0, %v4495_v7 }
 0x3ee   : > { %v1737_v59 = vpack.c.bf16 %v1706_v56, %v1705_v61 }
 0x3ef   : > { %v3654_v29 = vpop.eup %3653  ;;  %v1585_v39 = vpop.xlane.xlu1 %1584 }
 0x3f0   : > { %3659 = vrcp.f32 %v1585_v39  ;;  %3376 = vmatmul.mubr.msk.bf16.vlgmr.msra.gmra.mxu0 %vm1384_vm3, %v1737_v59  ;;  %v3656_v13 = vpop.eup %3655  ;;  %v1710_v10 = vmul.f32 %v3654_v29, %v4500_v17 }
 0x3f1   : > { %3386 = vmatpush3.bf16.msra.mxu0 %v4384_v20  ;;  %3387 = vmatprep.mubr.msk.bf16.mxu0 %vm3904_vm1, %v3902_v47  ;;  %v1709_v7 = vmul.f32 %v3656_v13, %v4482_v36 }
 0x3f2   : > { %3397 = vmatprep.subr.bf16.mxu0 %v3902_v47 }
 0x3f3   : > { %v1597_v48 = vpop.xlane.xlu1 %1596  ;;  %v1739_v53 = vpack.c.bf16 %v1710_v10, %v1709_v7  ;;  %v3658_v20 = vpop.eup %3657 }
 0x3f4   : > { %3661 = vrcp.f32 %v1597_v48  ;;  %v1708_v63 = vmul.f32 %v3658_v20, %v4504_v41 }
 0x3f5   : > { %3663 = vrcp.f32 %v1600_v27 }
 0x3f8   : > { %3388 = vmatmul.mubr.msk.bf16.vlgmr.msra.gmra.mxu0 %vm1384_vm3, %v1739_v53 }
 0x3f9   : > { %3398 = vmatpush3.bf16.msra.mxu0 %v4416_v9  ;;  %3399 = vmatprep.mubr.msk.bf16.mxu0 %vm3904_vm1, %v3902_v47 }
 0x3fa   : > { %3409 = vmatprep.subr.bf16.mxu0 %v3902_v47 }
 0x3fd   : > { %v3660_v52 = vpop.eup %3659 }
 0x3fe   : > { %v1707_v17 = vmul.f32 %v3660_v52, %v4512_v60 }
 0x400   : > { %v1738_v62 = vpack.c.bf16 %v1708_v63, %v1707_v17 }
 0x401   : > { %v3662_v19 = vpop.eup %3661 }
 0x402   : > { %3382 = vmatmul.mubr.msk.bf16.vlgmr.msra.gmra.mxu1 %vm1384_vm3, %v1738_v62  ;;  %v3664_v36 = vpop.eup %3663  ;;  %v1711_v9 = vmul.f32 %v3662_v19, %v4516_v54 }
 0x403   : > { %3392 = vmatpush3.bf16.msra.mxu1 %v4400_v42  ;;  %3393 = vmatprep.mubr.msk.bf16.mxu1 %vm3904_vm1, %v3902_v47  ;;  %v1712_v31 = vmul.f32 %v3664_v36, %v4508_v34 }
 0x404   : > { %3403 = vmatprep.subr.bf16.mxu1 %v3902_v47 }
 0x405   : > { %v1740_v24 = vpack.c.bf16 %v1712_v31, %v1711_v9 }
 0x40a   : > { %3394 = vmatmul.mubr.msk.bf16.vlgmr.msra.gmra.mxu1 %vm1384_vm3, %v1740_v24 }
 0x40b   : > { %3404 = vmatpush3.bf16.msra.mxu1 %v4414_v8  ;;  %3405 = vmatprep.mubr.msk.bf16.mxu1 %vm3904_vm1, %v3902_v47 }
 0x40c   : > { %3415 = vmatprep.subr.bf16.mxu1 %v3902_v47 }
 0x415   : > { %v1609_v42 = vpop.xlane.xlu1 %1608 }
 0x416   : > { %3665 = vrcp.f32 %v1609_v42 }
 0x419   : > { %v1603_v41 = vpop.xlane.xlu1 %1602 }
 0x41a   : > { %v1612_v60 = vpop.xlane.xlu0 %1611 }
 0x41b   : > { %3667 = vrcp.f32 %v1612_v60 }
 0x41c   : > { %3669 = vrcp.f32 %v1603_v41 }
 0x41e   : > { %v1621_v57 = vpop.xlane.xlu1 %1620  ;;  %v1606_v54 = vpop.xlane.xlu0 %1605 }
 0x41f   : > { %3671 = vrcp.f32 %v1606_v54 }
 0x420   : > { %3673 = vrcp.f32 %v1621_v57 }
 0x422   : > { %v1615_v34 = vpop.xlane.xlu1 %1614  ;;  %v1624_v28 = vpop.xlane.xlu0 %1623 }
 0x423   : > { %3675 = vrcp.f32 %v1624_v28  ;;  %v3666_v0 = vpop.eup %3665 }
 0x424   : > { %3677 = vrcp.f32 %v1615_v34  ;;  %v1715_v56 = vmul.f32 %v3666_v0, %v4529_v3 }
 0x426   : > { %v1633_v8 = vpop.xlane.xlu1 %1632  ;;  %v1618_v46 = vpop.xlane.xlu0 %1617 }
 0x427   : > { %3679 = vrcp.f32 %v1618_v46 }
 0x428   : > { %v3668_v61 = vpop.eup %3667  ;;  %3681 = vrcp.f32 %v1633_v8 }
 0x429   : > { %v1716_v59 = vmul.f32 %v3668_v61, %v4537_v21  ;;  %v3670_v13 = vpop.eup %3669 }
 0x42a   : > { %v1627_v29 = vpop.xlane.xlu1 %1626  ;;  %v1636_v39 = vpop.xlane.xlu0 %1635  ;;  %v1713_v53 = vmul.f32 %v3670_v13, %v4535_v45 }
 0x42b   : > { %v1742_v10 = vpack.c.bf16 %v1716_v59, %v1715_v56  ;;  %3683 = vrcp.f32 %v1636_v39 }
 0x42c   : > { %v3672_v27 = vpop.eup %3671  ;;  %3685 = vrcp.f32 %v1627_v29 }
 0x42d   : > { %3406 = vmatmul.mubr.msk.bf16.vlgmr.msra.gmra.mxu1 %vm1384_vm3, %v1742_v10  ;;  %v1714_v3 = vmul.f32 %v3672_v27, %v4545_v32  ;;  %v3674_v21 = vpop.eup %3673 }
 0x42e   : > { %3416 = vmatpush3.bf16.msra.mxu1 %v4432_v37  ;;  %v1645_v48 = vpop.xlane.xlu1 %1644  ;;  %v1630_v7 = vpop.xlane.xlu0 %1629  ;;  %3417 = vmatprep.mubr.msk.bf16.mxu1 %vm3904_vm1, %v3902_v47  ;;  %v1719_v63 = vmul.f32 %v3674_v21, %v4547_v35 }
 0x42f   : > { %3427 = vmatprep.subr.bf16.mxu1 %v3902_v47  ;;  %3687 = vrcp.f32 %v1630_v7  ;;  %v1741_v20 = vpack.c.bf16 %v1714_v3, %v1713_v53 }
 0x430   : > { %v3676_v52 = vpop.eup %3675  ;;  %3689 = vrcp.f32 %v1645_v48 }
 0x431   : > { %3400 = vmatmul.mubr.msk.bf16.vlgmr.msra.gmra.mxu0 %vm1384_vm3, %v1741_v20  ;;  %v1720_v45 = vmul.f32 %v3676_v52, %v4557_v58  ;;  %v3678_v62 = vpop.eup %3677 }
 0x432   : > { %v1639_v17 = vpop.xlane.xlu1 %1638  ;;  %v1648_v37 = vpop.xlane.xlu0 %1647  ;;  %3410 = vmatpush3.bf16.msra.mxu0 %v4434_v38  ;;  %3411 = vmatprep.mubr.msk.bf16.mxu0 %vm3904_vm1, %v3902_v47  ;;  %v1717_v35 = vmul.f32 %v3678_v62, %v4555_v55 }
 0x433   : > { %3691 = vrcp.f32 %v1648_v37  ;;  %v1744_v32 = vpack.c.bf16 %v1720_v45, %v1719_v63  ;;  %3421 = vmatprep.subr.bf16.mxu0 %v3902_v47 }
 0x434   : > { %v3680_v19 = vpop.eup %3679  ;;  %3693 = vrcp.f32 %v1639_v17 }
 0x435   : > { %3418 = vmatmul.mubr.msk.bf16.vlgmr.msra.gmra.mxu1 %vm1384_vm3, %v1744_v32  ;;  %v1718_v58 = vmul.f32 %v3680_v19, %v4565_v14  ;;  %v3682_v31 = vpop.eup %3681 }
 0x436   : > { %v1657_v36 = vpop.xlane.xlu1 %1656  ;;  %v1642_v9 = vpop.xlane.xlu0 %1641  ;;  %3428 = vmatpush3.bf16.msra.mxu1 %v4446_v15  ;;  %3429 = vmatprep.mubr.msk.bf16.mxu1 %vm3904_vm1, %v3902_v47  ;;  %v1723_v55 = vmul.f32 %v3682_v31, %v4567_v22 }
 0x437   : > { %3695 = vrcp.f32 %v1642_v9  ;;  %v1743_v38 = vpack.c.bf16 %v1718_v58, %v1717_v35  ;;  %3439 = vmatprep.subr.bf16.mxu1 %v3902_v47 }
 0x438   : > { %v3684_v24 = vpop.eup %3683  ;;  %3697 = vrcp.f32 %v1657_v36 }
 0x439   : > { %3412 = vmatmul.mubr.msk.bf16.vlgmr.msra.gmra.mxu0 %vm1384_vm3, %v1743_v38  ;;  %v1724_v14 = vmul.f32 %v3684_v24, %v4577_v33  ;;  %v3686_v60 = vpop.eup %3685 }
 0x43a   : > { %v1651_v42 = vpop.xlane.xlu1 %1650  ;;  %v1660_v41 = vpop.xlane.xlu0 %1659  ;;  %3422 = vmatpush3.bf16.msra.mxu0 %v4448_v18  ;;  %3423 = vmatprep.mubr.msk.bf16.mxu0 %vm3904_vm1, %v3902_v47  ;;  %v1721_v22 = vmul.f32 %v3686_v60, %v4575_v30 }
 0x43b   : > { %3699 = vrcp.f32 %v1660_v41  ;;  %v1746_v15 = vpack.c.bf16 %v1724_v14, %v1723_v55  ;;  %3433 = vmatprep.subr.bf16.mxu0 %v3902_v47 }
 0x43c   : > { %v3688_v57 = vpop.eup %3687  ;;  %3701 = vrcp.f32 %v1651_v42 }
 0x43d   : > { %3430 = vmatmul.mubr.msk.bf16.vlgmr.msra.gmra.mxu1 %vm1384_vm3, %v1746_v15  ;;  %v1722_v33 = vmul.f32 %v3688_v57, %v4585_v49  ;;  %v3690_v28 = vpop.eup %3689 }
 0x43e   : > { %v1669_v54 = vpop.xlane.xlu1 %1668  ;;  %v1654_v34 = vpop.xlane.xlu0 %1653  ;;  %3440 = vmatpush3.bf16.msra.mxu1 %v4402_v43  ;;  %3441 = vmatprep.mubr.msk.bf16.mxu1 %vm3904_vm1, %v3902_v47  ;;  %v1727_v30 = vmul.f32 %v3690_v28, %v4587_v51 }
 0x43f   : > { %3703 = vrcp.f32 %v1654_v34  ;;  %v1745_v18 = vpack.c.bf16 %v1722_v33, %v1721_v22  ;;  %3451 = vmatprep.subr.bf16.mxu1 %v3902_v47 }
 0x440   : > { %v3692_v0 = vpop.eup %3691  ;;  %3705 = vrcp.f32 %v1669_v54 }
 0x441   : > { %3424 = vmatmul.mubr.msk.bf16.vlgmr.msra.gmra.mxu0 %vm1384_vm3, %v1745_v18  ;;  %v1728_v49 = vmul.f32 %v3692_v0, %v4597_v11  ;;  %v3694_v61 = vpop.eup %3693 }
 0x442   : > { %v1663_v8 = vpop.xlane.xlu1 %1662  ;;  %v1672_v46 = vpop.xlane.xlu0 %1671  ;;  %3434 = vmatpush3.bf16.msra.mxu0 %v4467_v50  ;;  %3435 = vmatprep.mubr.msk.bf16.mxu0 %vm3904_vm1, %v3902_v47  ;;  %v1725_v29 = vmul.f32 %v3694_v61, %v4595_v2 }
 0x443   : > { %3707 = vrcp.f32 %v1672_v46  ;;  %v1748_v43 = vpack.c.bf16 %v1728_v49, %v1727_v30  ;;  %3445 = vmatprep.subr.bf16.mxu0 %v3902_v47 }
 0x444   : > { %v3696_v56 = vpop.eup %3695  ;;  %3709 = vrcp.f32 %v1663_v8 }
 0x445   : > { %3442 = vmatmul.mubr.msk.bf16.vlgmr.msra.gmra.mxu1 %vm1384_vm3, %v1748_v43  ;;  %v1726_v51 = vmul.f32 %v3696_v56, %v4604_v6  ;;  %v3698_v11 = vpop.eup %3697 }
 0x446   : > { %v1666_v59 = vpop.xlane.xlu0 %1665  ;;  %3452 = vmatpush3.bf16.msra.mxu1 %v4646_v25  ;;  %3453 = vmatprep.mubr.msk.bf16.mxu1 %vm3904_vm1, %v3902_v47  ;;  %v1731_v13 = vmul.f32 %v3698_v11, %v4606_v26  ;;  %v2459_v27 = vpop.permute.xlu1 %2458 }
 0x447   : > { %3711 = vrcp.f32 %v1666_v59  ;;  %v1747_v50 = vpack.c.bf16 %v1726_v51, %v1725_v29  ;;  %3463 = vmatprep.subr.bf16.mxu1 %v3902_v47 }
 0x448   : > { %v3700_v39 = vpop.eup %3699 }
 0x449   : > { %3436 = vmatmul.mubr.msk.bf16.vlgmr.msra.gmra.mxu0 %vm1384_vm3, %v1747_v50  ;;  %v1732_v10 = vmul.f32 %v3700_v39, %v4614_v23  ;;  %v3702_v2 = vpop.eup %3701 }
 0x44a   : > { %3446 = vmatpush3.bf16.msra.mxu0 %v4644_v5  ;;  %3447 = vmatprep.mubr.msk.bf16.mxu0 %vm3904_vm1, %v3902_v47  ;;  %v1729_v48 = vmul.f32 %v3702_v2, %v4612_v44  ;;  %v2412_v3 = vpop.permute.xlu0 %2411 }
 0x44b   : > { %v1750_v6 = vpack.c.bf16 %v1732_v10, %v1731_v13  ;;  %3457 = vmatprep.subr.bf16.mxu0 %v3902_v47 }
 0x44c   : > { %v3704_v25 = vpop.eup %3703 }
 0x44d   : > { %3454 = vmatmul.mubr.msk.bf16.vlgmr.msra.gmra.mxu1 %vm1384_vm3, %v1750_v6  ;;  %v1730_v7 = vmul.f32 %v3704_v25, %v4620_v16  ;;  %v3706_v26 = vpop.eup %3705 }
 0x44e   : > { %3464 = vmatpush3.bf16.msra.mxu1 %v2459_v27  ;;  %3465 = vmatprep.mubr.msk.bf16.mxu1 %vm3904_vm1, %v3902_v47  ;;  %v1735_v21 = vmul.f32 %v3706_v26, %v4622_v40 }
 0x44f   : > { %v1749_v23 = vpack.c.bf16 %v1730_v7, %v1729_v48 }
 0x450   : > { %v3708_v5 = vpop.eup %3707 }
 0x451   : > { %v3710_v53 = vpop.eup %3709  ;;  %3448 = vmatmul.mubr.msk.bf16.vlgmr.msra.gmra.mxu0 %vm1384_vm3, %v1749_v23  ;;  %v1736_v20 = vmul.f32 %v3708_v5, %v4630_v1 }
 0x452   : > { %3458 = vmatpush3.bf16.msra.mxu0 %v2412_v3  ;;  %3459 = vmatprep.mubr.msk.bf16.mxu0 %vm3904_vm1, %v3902_v47  ;;  %v1733_v52 = vmul.f32 %v3710_v53, %v4628_v4 }
 0x453   : > { %v1752_v16 = vpack.c.bf16 %v1736_v20, %v1735_v21 }
 0x454   : > { %v3712_v44 = vpop.eup %3711 }
 0x455   : > { %v1734_v17 = vmul.f32 %v3712_v44, %v4636_v12  ;;  %3466 = vmatmul.mubr.msk.bf16.vlgmr.msra.gmra.mxu1 %vm1384_vm3, %v1752_v16 }
 0x457   : > { %v1751_v37 = vpack.c.bf16 %v1734_v17, %v1733_v52 }
 0x459   : > { %3460 = vmatmul.mubr.msk.bf16.vlgmr.msra.gmra.mxu0 %vm1384_vm3, %v1751_v37 }
 0x4b0   : > { %v1793_v63 = vpop.f32.mrf.mxu0 }
 0x4b1   : > { %v3076_v40 = vpack.c.bf16 %v1793_v63, %v1793_v63 }
 0x4b2   : > { %v3377_v45 = vpop.f32.mrf.mxu0 }
 0x4b3   : > { %2550 = vst.msk [vmem:[#allocation2] sm:$0xf] %vm2549_vm4, %v3076_v40 }
 0x4b4   : > { %v1796_v1 = vpop.f32.mrf.mxu0 }
 0x4b5   : > { %v3077_v62 = vpack.c.bf16 %v1796_v1, %v1796_v1  ;;  %v3579_v1 = vld [vmem:[#allocation9 + $0x8] sm:$0xff]  }
 0x4b6   : > { %v3378_v47 = vpop.f32.mrf.mxu0  ;;  %3469 = vmatprep.subr.bf16.mxu0 %v3579_v1 }
 0x4b7   : > { %2551 = vst.msk [vmem:[#allocation2 + $0x4] sm:$0xf] %vm2549_vm4, %v3077_v62  ;;  %3470 = vmatpush3.bf16.msra.mxu0 %v3579_v1 }
 0x4b8   : > { %v1887_v32 = vpop.f32.mrf.mxu0 }
 0x4b9   : > { %v3080_v4 = vpack.c.bf16 %v1887_v32, %v1887_v32 }
 0x4ba   : > { %v3389_v19 = vpop.f32.mrf.mxu0 }
 0x4bb   : > { %2554 = vst.msk [vmem:[#allocation2 + $0x10] sm:$0xf] %vm2549_vm4, %v3080_v4 }
 0x4bc   : > { %v1890_v12 = vpop.f32.mrf.mxu0 }
 0x4bd   : > { %v3081_v36 = vpack.c.bf16 %v1890_v12, %v1890_v12 }
 0x4be   : > { %v3390_v9 = vpop.f32.mrf.mxu0 }
 0x4bf   : > { %2555 = vst.msk [vmem:[#allocation2 + $0x14] sm:$0xf] %vm2549_vm4, %v3081_v36  ;;  %v3580_v36 = vld [vmem:[#allocation9] sm:$0xff]  }
 0x4c0   : > { %3471 = vmatprep.subr.bf16.mxu0 %v3580_v36 }
 0x4c1   : > { %3472 = vmatpush3.bf16.msra.mxu0 %v3580_v36 }
 0x4c2   : > { %v1840_v35 = vpop.f32.mrf.mxu1 }
 0x4c3   : > { %v3078_v58 = vpack.c.bf16 %v1840_v35, %v1840_v35 }
 0x4c4   : > { %v3383_v31 = vpop.f32.mrf.mxu1 }
 0x4c5   : > { %2552 = vst.msk [vmem:[#allocation2 + $0x8] sm:$0xf] %vm2549_vm4, %v3078_v58 }
 0x4c6   : > { %v1843_v38 = vpop.f32.mrf.mxu1 }
 0x4c7   : > { %v3079_v24 = vpack.c.bf16 %v1843_v38, %v1843_v38 }
 0x4c8   : > { %v3384_v42 = vpop.f32.mrf.mxu1 }
 0x4c9   : > { %2553 = vst.msk [vmem:[#allocation2 + $0xc] sm:$0xf] %vm2549_vm4, %v3079_v24 }
 0x4ca   : > { %v1934_v41 = vpop.f32.mrf.mxu1 }
 0x4cb   : > { %v3082_v55 = vpack.c.bf16 %v1934_v41, %v1934_v41 }
 0x4cc   : > { %v3395_v14 = vpop.f32.mrf.mxu1 }
 0x4cd   : > { %2556 = vst.msk [vmem:[#allocation2 + $0x18] sm:$0xf] %vm2549_vm4, %v3082_v55 }
 0x4ce   : > { %v1937_v60 = vpop.f32.mrf.mxu1 }
 0x4cf   : > { %v3083_v15 = vpack.c.bf16 %v1937_v60, %v1937_v60 }
 0x4d0   : > { %v3396_v57 = vpop.f32.mrf.mxu1 }
 0x4d1   : > { %2557 = vst.msk [vmem:[#allocation2 + $0x1c] sm:$0xf] %vm2549_vm4, %v3083_v15 }
 0x4ed   : > { %v2028_v54 = vpop.f32.mrf.mxu1 }
 0x4ee   : > { %v3086_v34 = vpack.c.bf16 %v2028_v54, %v2028_v54 }
 0x4ef   : > { %v3407_v22 = vpop.f32.mrf.mxu1 }
 0x4f0   : > { %2582 = vrot.lane.b32.xlu0 %v3086_v34, %s3908_s19 }
 0x4f1   : > { %v2031_v33 = vpop.f32.mrf.mxu1  ;;  %v1981_v28 = vpop.f32.mrf.mxu0 }
 0x4f2   : > { %v3087_v18 = vpack.c.bf16 %v2031_v33, %v2031_v33  ;;  %v3084_v0 = vpack.c.bf16 %v1981_v28, %v1981_v28 }
 0x4f3   : > { %v3408_v8 = vpop.f32.mrf.mxu1  ;;  %v3401_v46 = vpop.f32.mrf.mxu0 }
 0x4f4   : > { %2584 = vrot.lane.b32.xlu1 %v3087_v18, %s3908_s19  ;;  %2578 = vrot.lane.b32.xlu0 %v3084_v0, %s3908_s19 }
 0x4f5   : > { %v1984_v30 = vpop.f32.mrf.mxu0  ;;  %v2122_v49 = vpop.f32.mrf.mxu1 }
 0x4f6   : > { %v3085_v61 = vpack.c.bf16 %v1984_v30, %v1984_v30  ;;  %v3090_v43 = vpack.c.bf16 %v2122_v49, %v2122_v49 }
 0x4f7   : > { %v3402_v56 = vpop.f32.mrf.mxu0  ;;  %v3419_v59 = vpop.f32.mrf.mxu1 }
 0x4f8   : > { %2580 = vrot.lane.b32.xlu1 %v3085_v61, %s3908_s19  ;;  %2590 = vrot.lane.b32.xlu0 %v3090_v43, %s3908_s19 }
 0x4f9   : > { %v2075_v29 = vpop.f32.mrf.mxu0  ;;  %v2125_v51 = vpop.f32.mrf.mxu1 }
 0x4fa   : > { %v3088_v11 = vpack.c.bf16 %v2075_v29, %v2075_v29  ;;  %v3091_v50 = vpack.c.bf16 %v2125_v51, %v2125_v51 }
 0x4fb   : > { %v3413_v39 = vpop.f32.mrf.mxu0  ;;  %v3420_v13 = vpop.f32.mrf.mxu1 }
 0x4fc   : > { %2586 = vrot.lane.b32.xlu0 %v3088_v11, %s3908_s19  ;;  %2592 = vrot.lane.b32.xlu1 %v3091_v50, %s3908_s19 }
 0x4fd   : > { %v2078_v10 = vpop.f32.mrf.mxu0  ;;  %v2216_v2 = vpop.f32.mrf.mxu1 }
 0x4fe   : > { %v3089_v6 = vpack.c.bf16 %v2078_v10, %v2078_v10  ;;  %v3094_v25 = vpack.c.bf16 %v2216_v2, %v2216_v2 }
 0x4ff   : > { %v3414_v27 = vpop.f32.mrf.mxu0  ;;  %v3431_v48 = vpop.f32.mrf.mxu1 }
 0x500   : > { %2588 = vrot.lane.b32.xlu1 %v3089_v6, %s3908_s19  ;;  %2635 = vrot.lane.b32.xlu0 %v3094_v25, %s3909_s10 }
 0x501   : > { %v2169_v7 = vpop.f32.mrf.mxu0  ;;  %v2219_v26 = vpop.f32.mrf.mxu1 }
 0x502   : > { %v3092_v23 = vpack.c.bf16 %v2169_v7, %v2169_v7  ;;  %v3095_v5 = vpack.c.bf16 %v2219_v26, %v2219_v26 }
 0x503   : > { %v3425_v53 = vpop.f32.mrf.mxu0  ;;  %v3432_v3 = vpop.f32.mrf.mxu1 }
 0x504   : > { %2631 = vrot.lane.b32.xlu0 %v3092_v23, %s3909_s10  ;;  %2637 = vrot.lane.b32.xlu1 %v3095_v5, %s3909_s10 }
 0x505   : > { %v2172_v21 = vpop.f32.mrf.mxu0  ;;  %v2310_v20 = vpop.f32.mrf.mxu1 }
 0x506   : > { %v3093_v44 = vpack.c.bf16 %v2172_v21, %v2172_v21  ;;  %v3098_v55 = vpack.c.bf16 %v2310_v20, %v2310_v20 }
 0x507   : > { %v3426_v16 = vpop.f32.mrf.mxu0  ;;  %v3443_v52 = vpop.f32.mrf.mxu1 }
 0x508   : > { %2633 = vrot.lane.b32.xlu1 %v3093_v44, %s3909_s10 }
 0x509   : > { %v2263_v17 = vpop.f32.mrf.mxu0  ;;  %v2313_v37 = vpop.f32.mrf.mxu1 }
 0x50a   : > { %v3096_v63 = vpack.c.bf16 %v2263_v17, %v2263_v17  ;;  %v3099_v34 = vpack.c.bf16 %v2313_v37, %v2313_v37  ;;  %v3057_v17 = vld [vmem:[%s4876_s5] ss:$0 sm:$0xff] }
 0x50b   : > { %v3437_v40 = vpop.f32.mrf.mxu0  ;;  %v3444_v45 = vpop.f32.mrf.mxu1 }
 0x50c   : > { %2639 = vrot.lane.b32.xlu0 %v3096_v63, %s3909_s10 }
 0x50d   : > { %v2266_v62 = vpop.f32.mrf.mxu0  ;;  %v2404_v47 = vpop.f32.mrf.mxu1 }
 0x50e   : > { %v3097_v32 = vpack.c.bf16 %v2266_v62, %v2266_v62  ;;  %v3102_v4 = vpack.c.bf16 %v2404_v47, %v2404_v47 }
 0x50f   : > { %v3438_v19 = vpop.f32.mrf.mxu0  ;;  %v3455_v12 = vpop.f32.mrf.mxu1 }
 0x510   : > { %2641 = vrot.lane.b32.xlu1 %v3097_v32, %s3909_s10  ;;  %2688 = vrot.lane.b32.xlu0 %v3102_v4, %s3910_s7 }
 0x511   : > { %v2357_v9 = vpop.f32.mrf.mxu0  ;;  %v2407_v35 = vpop.f32.mrf.mxu1 }
 0x512   : > { %v3100_v58 = vpack.c.bf16 %v2357_v9, %v2357_v9  ;;  %v3103_v31 = vpack.c.bf16 %v2407_v35, %v2407_v35 }
 0x513   : > { %v3449_v38 = vpop.f32.mrf.mxu0  ;;  %v3456_v24 = vpop.f32.mrf.mxu1 }
 0x514   : > { %2684 = vrot.lane.b32.xlu0 %v3100_v58, %s3910_s7  ;;  %2690 = vrot.lane.b32.xlu1 %v3103_v31, %s3910_s7 }
 0x515   : > { %v2360_v42 = vpop.f32.mrf.mxu0  ;;  %v2498_v41 = vpop.f32.mrf.mxu1 }
 0x516   : > { %v3101_v14 = vpack.c.bf16 %v2360_v42, %v2360_v42  ;;  %v3106_v0 = vpack.c.bf16 %v2498_v41, %v2498_v41 }
 0x517   : > { %v3450_v60 = vpop.f32.mrf.mxu0  ;;  %v3467_v15 = vpop.f32.mrf.mxu1 }
 0x518   : > { %2643 = vrot.lane.b32.xlu0 %v3098_v55, %s3909_s10  ;;  %2686 = vrot.lane.b32.xlu1 %v3101_v14, %s3910_s7 }
 0x519   : > { %v2451_v57 = vpop.f32.mrf.mxu0  ;;  %v2501_v54 = vpop.f32.mrf.mxu1 }
 0x51a   : > { %v3104_v22 = vpack.c.bf16 %v2451_v57, %v2451_v57  ;;  %v3107_v30 = vpack.c.bf16 %v2501_v54, %v2501_v54 }
 0x51b   : > { %v3461_v33 = vpop.f32.mrf.mxu0  ;;  %v3468_v28 = vpop.f32.mrf.mxu1 }
 0x51c   : > { %2692 = vrot.lane.b32.xlu0 %v3104_v22, %s3910_s7  ;;  %2645 = vrot.lane.b32.xlu1 %v3099_v34, %s3909_s10  ;;  %s3825_s10 = scalar_lea.vmem %s3824_s15, 2048 }
 0x51d   : > { %v2454_v18 = vpop.f32.mrf.mxu0  ;;  %p3827_p3 = scmp.lt.s32.totalorder %s3825_s10, %s3819_s26 }
 0x51e   : > { %v3105_v8 = vpack.c.bf16 %v2454_v18, %v2454_v18 }
 0x51f   : > { %v3462_v46 = vpop.f32.mrf.mxu0  ;;  %p3828_p7 = por %p3827_p3, %p3826_p5 }
 0x520   : > { %2694 = vrot.lane.b32.xlu1 %v3105_v8, %s3910_s7  ;;  %2696 = vrot.lane.b32.xlu0 %v3106_v0, %s3910_s7 }
 0x521   : > { %p3829_p9 = pnand %p3828_p7, %p3822_p0 }
 0x524   : > { %2698 = vrot.lane.b32.xlu1 %v3107_v30, %s3910_s7 }
 0x562   : > { %v2583_v49 = vpop.permute.xlu0 %2582 }
 0x563   : > { %2605 = vst.msk [vmem:[#allocation2 + $0x8] sm:$0xf] %vm2602_vm5, %v2583_v49 }
 0x566   : > { %v2585_v61 = vpop.permute.xlu1 %2584  ;;  %v2579_v43 = vpop.permute.xlu0 %2578 }
 0x567   : > { %2606 = vst.msk [vmem:[#allocation2 + $0xc] sm:$0xf] %vm2602_vm5, %v2585_v61  ;;  %2603 = vst.msk [vmem:[#allocation2] sm:$0xf] %vm2602_vm5, %v2579_v43 }
 0x56a   : > { %v2581_v56 = vpop.permute.xlu1 %2580  ;;  %v2591_v59 = vpop.permute.xlu0 %2590 }
 0x56b   : > { %2604 = vst.msk [vmem:[#allocation2 + $0x4] sm:$0xf] %vm2602_vm5, %v2581_v56  ;;  %2609 = vst.msk [vmem:[#allocation2 + $0x18] sm:$0xf] %vm2602_vm5, %v2591_v59 }
 0x56e   : > { %v2587_v29 = vpop.permute.xlu0 %2586  ;;  %v2593_v51 = vpop.permute.xlu1 %2592 }
 0x56f   : > { %2607 = vst.msk [vmem:[#allocation2 + $0x10] sm:$0xf] %vm2602_vm5, %v2587_v29  ;;  %2610 = vst.msk [vmem:[#allocation2 + $0x1c] sm:$0xf] %vm2602_vm5, %v2593_v51 }
 0x572   : > { %v2589_v11 = vpop.permute.xlu1 %2588  ;;  %v2636_v50 = vpop.permute.xlu0 %2635 }
 0x573   : > { %2608 = vst.msk [vmem:[#allocation2 + $0x14] sm:$0xf] %vm2602_vm5, %v2589_v11 }
 0x574   : > { %2658 = vst.msk [vmem:[#allocation2 + $0x8] sm:$0xf] %vm2655_vm6, %v2636_v50 }
 0x576   : > { %v2632_v39 = vpop.permute.xlu0 %2631  ;;  %v2638_v13 = vpop.permute.xlu1 %2637 }
 0x577   : > { %2656 = vst.msk [vmem:[#allocation2] sm:$0xf] %vm2655_vm6, %v2632_v39  ;;  %2659 = vst.msk [vmem:[#allocation2 + $0xc] sm:$0xf] %vm2655_vm6, %v2638_v13 }
 0x57a   : > { %v2634_v10 = vpop.permute.xlu1 %2633 }
 0x57b   : > { %2657 = vst.msk [vmem:[#allocation2 + $0x4] sm:$0xf] %vm2655_vm6, %v2634_v10 }
 0x57e   : > { %v2640_v2 = vpop.permute.xlu0 %2639 }
 0x57f   : > { %2660 = vst.msk [vmem:[#allocation2 + $0x10] sm:$0xf] %vm2655_vm6, %v2640_v2 }
 0x582   : > { %v2642_v6 = vpop.permute.xlu1 %2641  ;;  %v2689_v25 = vpop.permute.xlu0 %2688 }
 0x583   : > { %2661 = vst.msk [vmem:[#allocation2 + $0x14] sm:$0xf] %vm2655_vm6, %v2642_v6 }
 0x584   : > { %2711 = vst.msk [vmem:[#allocation2 + $0x8] sm:$0xf] %vm2708_vm7, %v2689_v25 }
 0x586   : > { %v2685_v27 = vpop.permute.xlu0 %2684  ;;  %v2691_v48 = vpop.permute.xlu1 %2690 }
 0x587   : > { %2709 = vst.msk [vmem:[#allocation2] sm:$0xf] %vm2708_vm7, %v2685_v27  ;;  %2712 = vst.msk [vmem:[#allocation2 + $0xc] sm:$0xf] %vm2708_vm7, %v2691_v48 }
 0x58a   : > { %v2644_v7 = vpop.permute.xlu0 %2643  ;;  %v2687_v26 = vpop.permute.xlu1 %2686 }
 0x58b   : > { %2662 = vst.msk [vmem:[#allocation2 + $0x18] sm:$0xf] %vm2655_vm6, %v2644_v7 }
 0x58c   : > { %2710 = vst.msk [vmem:[#allocation2 + $0x4] sm:$0xf] %vm2708_vm7, %v2687_v26 }
 0x58e   : > { %v2693_v23 = vpop.permute.xlu0 %2692  ;;  %v2646_v5 = vpop.permute.xlu1 %2645  ;;  %v3582_v20 = vld [vmem:[#allocation2 + $0x8] sm:$0xff]  }
 0x58f   : > { %2713 = vst.msk [vmem:[#allocation2 + $0x10] sm:$0xf] %vm2708_vm7, %v2693_v23 }
 0x590   : > { %2663 = vst.msk [vmem:[#allocation2 + $0x1c] sm:$0xf] %vm2655_vm6, %v2646_v5 }
 0x592   : > { %v2695_v53 = vpop.permute.xlu1 %2694  ;;  %v2697_v3 = vpop.permute.xlu0 %2696 }
 0x593   : > { %v3581_v21 = vld [vmem:[#allocation2] sm:$0xff]   ;;  %2714 = vst.msk [vmem:[#allocation2 + $0x14] sm:$0xf] %vm2708_vm7, %v2695_v53  ;;  %2715 = vst.msk [vmem:[#allocation2 + $0x18] sm:$0xf] %vm2708_vm7, %v2697_v3 }
 0x594   : > { %3473 = vmatprep.mubr.msk.bf16.mxu0 %vm353_vm0, %v3581_v21 }
 0x595   : > { %3474 = vmatmul.mubr.msk.bf16.vlgmr.msra.gmra.mxu0 %vm353_vm0, %v3582_v20 }
 0x596   : > { %v2699_v44 = vpop.permute.xlu1 %2698 }
 0x597   : > { %2716 = vst.msk [vmem:[#allocation2 + $0x1c] sm:$0xf] %vm2708_vm7, %v2699_v44 }
 0x59a   : > { %v3583_v16 = vld [vmem:[#allocation2 + $0x10] sm:$0xff]  }
 0x59b   : > { %3477 = vmatprep.mubr.msk.bf16.mxu0 %vm353_vm0, %v3583_v16 }
 0x59e   : > { %v3584_v52 = vld [vmem:[#allocation2 + $0x18] sm:$0xff]  }
 0x59f   : > { %3478 = vmatmul.mubr.msk.bf16.gmra.mxu0 %vm353_vm0, %v3584_v52 }
 0x655   : > { %v3475_v37 = vpop.f32.mrf.mxu0 }
 0x656   : > { %v2823_v63 = vadd.f32 %v3475_v37, %v3057_v17 }
 0x657   : > { %v2814_v40 = vpop.f32.mrf.mxu0 }
 0x658   : > { %2847 = vst.msk [vmem:[%s314_s16 + $0x10] sm:$0xff] %vm353_vm0, %v2823_v63  ;;  %v2815_v45 = vadd.f32 %v3057_v17, %v2814_v40 }
 0x659   : > { %v3476_v1 = vpop.f32.mrf.mxu0 }
 0x65a   : > { %2845 = vst.msk [vmem:[%s314_s16] sm:$0xff] %vm353_vm0, %v2815_v45  ;;  %v2826_v62 = vadd.f32 %v3476_v1, %v3057_v17 }
 0x65b   : > { %v2817_v47 = vpop.f32.mrf.mxu0 }
 0x65c   : > { %2848 = vst.msk [vmem:[%s314_s16 + $0x18] sm:$0xff] %vm353_vm0, %v2826_v62  ;;  %v2818_v32 = vadd.f32 %v3057_v17, %v2817_v47 }
 0x65e   : > { %2846 = vst.msk [vmem:[%s314_s16 + $0x8] sm:$0xff] %vm353_vm0, %v2818_v32 }
 0x65f   : > { %v3479_v4 = vpop.f32.mrf.mxu0 }
 0x660   : > { %v2839_v19 = vadd.f32 %v3479_v4, %v3057_v17 }
 0x661   : > { %v2830_v12 = vpop.f32.mrf.mxu0 }
 0x662   : > { %2851 = vst.msk [vmem:[%s314_s16 + $0x30] sm:$0xff] %vm353_vm0, %v2839_v19  ;;  %v2831_v36 = vadd.f32 %v3057_v17, %v2830_v12 }
 0x663   : > { %v3480_v9 = vpop.f32.mrf.mxu0 }
 0x664   : > { %2849 = vst.msk [vmem:[%s314_s16 + $0x20] sm:$0xff] %vm353_vm0, %v2831_v36  ;;  %v2842_v35 = vadd.f32 %v3480_v9, %v3057_v17 }
 0x665   : > { %v2833_v58 = vpop.f32.mrf.mxu0 }
 0x666   : > { %2852 = vst.msk [vmem:[%s314_s16 + $0x38] sm:$0xff] %vm353_vm0, %v2842_v35  ;;  %v2834_v31 = vadd.f32 %v3057_v17, %v2833_v58 }
 0x668   : > { %2850 = vst.msk [vmem:[%s314_s16 + $0x28] sm:$0xff] %vm353_vm0, %v2834_v31 }
 0x669   : > { %3832 = shalt.err (!%p3829_p9)
}
 0x66a   : > { %s3833_s7 = scalar_lea.hbm %s4823_s20, 1024  ;;  %s3837_s16 = scalar_lea.hbm %s4877_s6, 2048 }
 0x66b   : > { %p3834_p1 = scmp.ne.s32.totalorder %s4823_s20, %s3833_s7  ;;  %p3838_p11 = scmp.lt.s32.totalorder %s4823_s20, %s4877_s6 }
 0x66c   : > { %p3839_p13 = scmp.lt.s32.totalorder %s3837_s16, %s3833_s7 }
 0x66d   : > { %p3835_p8 = pnand %p3834_p1, %p4895_p6 }
 0x66e   : > { %p3840_p2 = por %p3839_p13, %p3838_p11 }
 0x66f   : > { %p3836_p10 = pneg %p3835_p8 }
 0x671   : > { %p3841_p4 = pnand %p3840_p2, %p3836_p10 }
 0x673   : > { %3844 = shalt.err (!%p3841_p4)
}
 0x674   : > { %s3912_s18 = smov 128  }
 0x675   : > { %3499 = dma.vmem_to_hbm [thread:$0]  (%p4895_p6), %s4826_s27, 1024, %s4823_s20, %s2854_s25, %s3912_s18, %s3912_s18, %s3908_s19  }
 0x676 PF: > { %s2883_s26 = sand.u32 1, %s3879_s21   ;;  %p4896_p12 = scmp.ne.s32.totalorder %s4883_s28, 0 }
 0x677   : > { %p4897_p0 = scmp.ge.s32.totalorder %s3891_s24, 2  ;;  %s2884_s30 = scalar_lea.sflag [#allocation5], %s2883_s26 }
 0x679   : > { %p3516_p5 = pnand %p4897_p0, %p4896_p12 }
 0x67b   : > { %p3517_p3 = pneg %p3516_p5 }
 0x67d   : > { %3874 = dma.done.wait (%p3517_p3), %s2884_s30, 1024  }
 0x67e   : > { %3876 = vsyncadd (%p3517_p3), %s2884_s30, 4294966272  ;;  %p21_p7 = scmp.ge.s32.totalorder %s4028_s9, 4   ;;  %s4898_s21 = smov %s3883_s22 }
 0x67f   : > { %s4899_s22 = smov %s3887_s23  ;;  %s4900_s23 = smov %s4038_s11 }
 0x680   : > { %s4901_s24 = smov %s4028_s9  ;;  %23 = sbr.rel (!%p21_p7) target bundleno = 7 (0x7), region = 101 }
 0x685   :  { %2889 = vsyncpa [#allocation4], 1 }
 0x686   :  { %2891 = vsyncpa [#allocation4 + $0x1], 1 }
 0x687   :  { %2892 = vsyncpa [#allocation7], 1 }
 0x688   :  { %2893 = vsyncpa [#allocation10], 1 }
 0x689   :  { %2894 = vsyncpa [#allocation5], 1 }
 0x68a   :  { %2896 = vsyncpa [#allocation5 + $0x1], 1 }

</bundles_post_ra>
